<compile_context>
chip_gen: v7x
topology: tpu7x:2x2x1
jax: 0.10.0
libtpu: 0.0.40
codegen_flags: <defaults>
</compile_context>

<pallas_src>
import functools

import jax
import jax.numpy as jnp
import numpy as np
from jax.experimental import pallas as pl
from jax.experimental.pallas import tpu as pltpu


# ---------------------------------------------------------------------------
# Kernels
# ---------------------------------------------------------------------------
def _affine_f32(x, w_ref, b_ref):
    """x @ W + b with f32 accumulation.

    Tiny-K layers (SIREN coordinate inputs, K < 8) skip the MXU: a K=2
    contraction would use <2% of an MXU pass and the [tm, 2] x tile is
    lane-sparse, so K broadcast-FMAs on the VPU are cheaper.
    """
    k = w_ref.shape[0]
    if k < 8:
        z = x[:, 0:1].astype(jnp.float32) * w_ref[0:1, :].astype(jnp.float32)
        for i in range(1, k):
            z = z + x[:, i:i + 1].astype(jnp.float32) * w_ref[i:i + 1, :].astype(jnp.float32)
    else:
        z = jnp.dot(x.astype(w_ref.dtype), w_ref[...],
                    preferred_element_type=jnp.float32)
    return z + b_ref[...]                     # bias broadcast [1, out] over [tm, out]


def sine_layer_kernel(x_ref, w_ref, b_ref, o_ref, *, omega_0):
    z = _affine_f32(x_ref[...], w_ref, b_ref)
    if omega_0 != 1.0:       # static: vanishes when omega is folded into (W, b)
        z = jnp.float32(omega_0) * z
    o_ref[...] = jnp.sin(z).astype(o_ref.dtype)


def siren_stack_kernel(x_ref, *refs, omegas):
    """Fused stack of SineLayers.

    refs = (w0, b0, w1, b1, ..., o_ref).  The [tm, hidden] activation stays in
    VMEM / vregs between layers; only x is read and the final activation is
    written back to HBM.
    """
    o_ref = refs[-1]
    h = x_ref[...]
    for l, omega in enumerate(omegas):
        w_ref, b_ref = refs[2 * l], refs[2 * l + 1]
        z = _affine_f32(h, w_ref, b_ref)
        if omega != 1.0:
            z = jnp.float32(omega) * z
        h = jnp.sin(z)                        # f32; cast only at the next matmul / store
    o_ref[...] = h.astype(o_ref.dtype)


# ---------------------------------------------------------------------------
# Tiling / VMEM heuristics
# ---------------------------------------------------------------------------
def _round_up(n, m):
    return ((n + m - 1) // m) * m


def _vmem_limit_bytes():
    """Generation-aware scoped-VMEM limit.

    ~56 MiB of v5e/v6e's 128 MiB physical; ~36 MiB of v7x's 64 MiB per
    TensorCore (headroom left for compiler scratch).  Always passed explicitly
    so we never sit at the 16/32 MiB defaults.
    """
    try:
        phys = int(getattr(pltpu.get_tpu_info(), "vmem_capacity_bytes", 64 << 20))
    except Exception:
        phys = 64 << 20
    return (56 << 20) if phys >= (96 << 20) else (36 << 20)


def _pick_block_rows(n_rows, resident_bytes, per_row_bytes, budget_bytes,
                     min_steps=4, max_rows=4096):
    """Largest row tile fitting the budget, while guaranteeing >= min_steps
    (and an even number of) grid steps so x/out double-buffering overlaps DMA
    with compute and megacore (v7x) gets balanced work."""
    avail = max(budget_bytes - resident_bytes, 1 << 20)
    tm_cap = min(avail // max(per_row_bytes, 1), max_rows)
    tm_cap = max(16, (tm_cap // 16) * 16)
    steps = max(min_steps, pl.cdiv(n_rows, tm_cap))
    if steps > 1 and steps % 2:
        steps += 1                             # even step count for v7x megacore
    tm = _round_up(pl.cdiv(n_rows, steps), 16)
    return int(max(16, min(tm, tm_cap)))


def _call_with_weight_buffer_fallback(build, args):
    """Prefer single-buffered weights (pipeline_mode=pl.Buffered(1); constant
    index_map => no second VMEM copy).  Fall back to default double buffering
    if this jax build rejects buffer_count=1."""
    try:
        return build(True)(*args)
    except Exception:
        return build(False)(*args)


# ---------------------------------------------------------------------------
# Wrappers
# ---------------------------------------------------------------------------
def sine_layer(x, w_t, b, omega_0=30.0, *, block_rows=None, out_dtype=None):
    """Single SineLayer forward: sin(omega_0 * (x @ w_t + b)).

    x: [N, in_f]; w_t: [in_f, out_f] (PyTorch weight pre-transposed);
    b: [out_f] or [1, out_f].  No padding, slicing or dtype casts are done
    here: pass x / w_t already in the MXU dtype (e.g. bf16 end-to-end) and
    out_dtype defaults to x.dtype.  Production path: fold omega_0 into (w_t, b)
    at init and pass omega_0=1.0.
    """
    N, in_f = x.shape
    in_f_w, out_f = w_t.shape
    assert in_f == in_f_w, (in_f, in_f_w)
    if b.ndim == 1:
        b = b.reshape(1, out_f)
    b = b.astype(jnp.float32)                 # added to the f32 accumulator
    out_dtype = out_dtype if out_dtype is not None else x.dtype

    vmem_limit = _vmem_limit_bytes()
    resident = in_f * out_f * jnp.dtype(w_t.dtype).itemsize + out_f * 4
    per_row = (2 * (in_f * jnp.dtype(x.dtype).itemsize
                    + out_f * jnp.dtype(out_dtype).itemsize)    # dbl-buffered x / out
               + 4 * out_f)                                     # f32 epilogue temp
    tm = block_rows if block_rows is not None else _pick_block_rows(
        N, resident, per_row, int(vmem_limit * 0.75))

    def build(single_buffer_weights):
        wkw = {"pipeline_mode": pl.Buffered(1)} if single_buffer_weights else {}
        return pl.pallas_call(
            functools.partial(sine_layer_kernel, omega_0=float(omega_0)),
            out_shape=jax.ShapeDtypeStruct((N, out_f), out_dtype),
            grid_spec=pltpu.PrefetchScalarGridSpec(
                num_scalar_prefetch=0,
                # No jnp.pad: the partial last block is masked on store.
                grid=(pl.cdiv(N, tm),),
                in_specs=[
                    pl.BlockSpec((tm, in_f), lambda i: (i, 0)),             # streamed tile
                    pl.BlockSpec((in_f, out_f), lambda i: (0, 0), **wkw),   # resident W
                    pl.BlockSpec((1, out_f), lambda i: (0, 0), **wkw),      # resident b
                ],
                out_specs=pl.BlockSpec((tm, out_f), lambda i: (i, 0)),
            ),
            compiler_params=pltpu.CompilerParams(
                dimension_semantics=("parallel",),
                vmem_limit_bytes=int(vmem_limit),
            ),
        )

    return _call_with_weight_buffer_fallback(build, (x, w_t, b))


def siren_stack(x, params, omegas, *, block_rows=None, out_dtype=None):
    """Fused stack of SineLayers in ONE pallas_call.

    params: list of (w_t, b) with w_t: [in_l, out_l]; omegas: per-layer omega_0
    (pass 1.0s if omega is folded into the parameters).  All weights/biases are
    VMEM-resident (constant index_map, single-buffered); the activation never
    round-trips to HBM between layers.
    """
    N, in_f = x.shape
    n_layers = len(params)
    omegas = tuple(float(o) for o in omegas)
    assert len(omegas) == n_layers and n_layers >= 1

    flat, widths, shapes = [], [], []
    resident = 0
    prev = in_f
    for (w_t, b) in params:
        k, m = w_t.shape
        assert k == prev, (k, prev)
        prev = m
        widths.append(m)
        shapes.append((k, m))
        if b.ndim == 1:
            b = b.reshape(1, m)
        flat += [w_t, b.astype(jnp.float32)]
        resident += k * m * jnp.dtype(w_t.dtype).itemsize + m * 4
    out_f = widths[-1]
    out_dtype = out_dtype if out_dtype is not None else x.dtype

    vmem_limit = _vmem_limit_bytes()
    max_w = max(widths)
    per_row = (2 * (in_f * jnp.dtype(x.dtype).itemsize
                    + out_f * jnp.dtype(out_dtype).itemsize)    # dbl-buffered x / out
               + 2 * 4 * max_w)                                 # live f32 intermediates
    tm = block_rows if block_rows is not None else _pick_block_rows(
        N, resident, per_row, int(vmem_limit * 0.75))

    def build(single_buffer_weights):
        wkw = {"pipeline_mode": pl.Buffered(1)} if single_buffer_weights else {}
        in_specs = [pl.BlockSpec((tm, in_f), lambda i: (i, 0))]
        for (k, m) in shapes:
            in_specs.append(pl.BlockSpec((k, m), lambda i: (0, 0), **wkw))
            in_specs.append(pl.BlockSpec((1, m), lambda i: (0, 0), **wkw))
        return pl.pallas_call(
            functools.partial(siren_stack_kernel, omegas=omegas),
            out_shape=jax.ShapeDtypeStruct((N, out_f), out_dtype),
            grid_spec=pltpu.PrefetchScalarGridSpec(
                num_scalar_prefetch=0,
                grid=(pl.cdiv(N, tm),),
                in_specs=in_specs,
                out_specs=pl.BlockSpec((tm, out_f), lambda i: (i, 0)),
            ),
            compiler_params=pltpu.CompilerParams(
                dimension_semantics=("parallel",),
                vmem_limit_bytes=int(vmem_limit),
            ),
        )

    return _call_with_weight_buffer_fallback(build, (x, *flat))


# ---------------------------------------------------------------------------
# SIREN init (mirrors SineLayer.init_weights) and omega folding
# ---------------------------------------------------------------------------
def init_sine_layer_params(key, in_features, out_features, is_first, omega_0):
    kw, kb = jax.random.split(key)
    if is_first:
        bound = 1.0 / in_features
    else:
        bound = np.sqrt(6.0 / in_features) / omega_0
    # PyTorch weight is [out, in]; store transposed [in, out] for the kernel.
    w = jax.random.uniform(kw, (out_features, in_features),
                           minval=-bound, maxval=bound, dtype=jnp.float32)
    b_bound = 1.0 / np.sqrt(in_features)      # nn.Linear default bias init
    b = jax.random.uniform(kb, (1, out_features),
                           minval=-b_bound, maxval=b_bound, dtype=jnp.float32)
    return w.T, b


def fold_omega_into_params(w_t, b, omega_0):
    """sin(omega*(xW^T+b)) == sin(x(omega*W)^T + omega*b): pre-scale at init."""
    return w_t * omega_0, b * omega_0


# ---------------------------------------------------------------------------
# Demo / correctness check
# ---------------------------------------------------------------------------
if __name__ == "__main__":
    key = jax.random.PRNGKey(0)
    k_in, k0, k1, k2 = jax.random.split(key, 4)

    omega_0 = 30.0
    batch = 300            # NOT a multiple of the row tile -> exercises the edge block
    coords = 2             # SIREN coordinate input (first layer, small-K VPU path)
    hidden = 64
    out_features = 128

    w0, b0 = init_sine_layer_params(k0, coords, hidden, is_first=True, omega_0=omega_0)
    w1, b1 = init_sine_layer_params(k1, hidden, hidden, is_first=False, omega_0=omega_0)
    w2, b2 = init_sine_layer_params(k2, hidden, out_features, is_first=False, omega_0=omega_0)

    x = jax.random.uniform(k_in, (batch, coords), minval=-1.0, maxval=1.0,
                           dtype=jnp.float32)

    # Pure-JAX reference.
    def ref_layer(h, w, b):
        return jnp.sin(omega_0 * (jnp.dot(h, w, precision=jax.lax.Precision.HIGHEST) + b))

    h0_ref = ref_layer(x, w0, b0)
    h1_ref = ref_layer(h0_ref, w1, b1)
    h2_ref = ref_layer(h1_ref, w2, b2)

    # 1) First layer (in_features=2), omega folded into params (production default):
    #    small-K VPU path, no in-kernel omega multiply.
    w0f, b0f = fold_omega_into_params(w0, b0, omega_0)
    out0 = jax.block_until_ready(sine_layer(x, w0f, b0f, omega_0=1.0))
    np.testing.assert_allclose(np.asarray(out0), np.asarray(h0_ref), rtol=1e-4, atol=1e-4)

    # 2) Hidden layer (64 -> 64), f32 MXU path, omega applied in-kernel
    #    (matches the PyTorch module directly).
    out1 = jax.block_until_ready(sine_layer(h0_ref, w1, b1, omega_0=omega_0))
    np.testing.assert_allclose(np.asarray(out1), np.asarray(h1_ref), rtol=1e-4, atol=1e-4)

    # 3) Fused 3-layer SIREN stack: activations never leave VMEM between layers.
    #    Looser tolerance: omega=30 amplifies tiny matmul-rounding differences
    #    through the depth of the stack.
    out_stack = jax.block_until_ready(
        siren_stack(x, [(w0, b0), (w1, b1), (w2, b2)], omegas=(omega_0,) * 3))
    np.testing.assert_allclose(np.asarray(out_stack), np.asarray(h2_ref),
                               rtol=2e-3, atol=2e-3)

    # 4) bf16 end-to-end hidden layer: bf16 activations in/out, bf16 weights,
    #    f32 accumulation + epilogue (single downcast at the store).
    x_bf = h0_ref.astype(jnp.bfloat16)         # "stored bf16" activation
    w1_bf = w1.astype(jnp.bfloat16)            # "stored bf16" weight
    out_bf = jax.block_until_ready(sine_layer(x_bf, w1_bf, b1, omega_0=omega_0))
    assert out_bf.dtype == jnp.bfloat16
    ref_bf = jnp.sin(omega_0 * (jnp.dot(x_bf, w1_bf, preferred_element_type=jnp.float32)
                                + b1)).astype(jnp.bfloat16)
    np.testing.assert_allclose(np.asarray(out_bf, dtype=np.float32),
                               np.asarray(ref_bf, dtype=np.float32),
                               rtol=2e-2, atol=2e-2)

    print("KERNEL_OK")
</pallas_src>

<mosaic_0001>
module attributes {stable_mosaic.version = 11 : i64} {
  func.func @sine_layer_kernel(%arg0: i32, %arg1: memref<80x2xf32, #tpu.memory_space<vmem>>, %arg2: memref<2x64xf32, #tpu.memory_space<vmem>>, %arg3: memref<1x64xf32, #tpu.memory_space<vmem>>, %arg4: memref<80x64xf32, #tpu.memory_space<vmem>>) attributes {dimension_semantics = [#tpu.dimension_semantics<parallel>], iteration_bounds = array<i64: 4>, scalar_prefetch = 0 : i64, scratch_operands = 0 : i64, tpu.core_type = #tpu.core_type<tc>, window_params = [{transform_indices = @transform_0, window_bounds = array<i64: 80, 2>}, {pipeline_mode = #tpu.pipeline_mode<synchronous>, transform_indices = @transform_1, window_bounds = array<i64: 2, 64>}, {pipeline_mode = #tpu.pipeline_mode<synchronous>, transform_indices = @transform_2, window_bounds = array<i64: 1, 64>}, {transform_indices = @transform_3, window_bounds = array<i64: 80, 64>}]} {
    %c0 = arith.constant 0 : index
    %c0_0 = arith.constant 0 : index
    %0 = vector.load %arg1[%c0, %c0_0] : memref<80x2xf32, #tpu.memory_space<vmem>>, vector<80x2xf32>
    %1 = vector.extract_strided_slice %0 {offsets = [0, 0], sizes = [80, 1], strides = [1, 1]} : vector<80x2xf32> to vector<80x1xf32>
    %c0_1 = arith.constant 0 : index
    %c0_2 = arith.constant 0 : index
    %2 = vector.load %arg2[%c0_1, %c0_2] : memref<2x64xf32, #tpu.memory_space<vmem>>, vector<1x64xf32>
    %3 = vector.broadcast %1 : vector<80x1xf32> to vector<80x64xf32>
    %4 = vector.broadcast %2 : vector<1x64xf32> to vector<80x64xf32>
    %5 = arith.mulf %3, %4 : vector<80x64xf32>
    %6 = vector.extract_strided_slice %0 {offsets = [0, 1], sizes = [80, 1], strides = [1, 1]} : vector<80x2xf32> to vector<80x1xf32>
    %c1 = arith.constant 1 : index
    %c0_3 = arith.constant 0 : index
    %7 = vector.load %arg2[%c1, %c0_3] : memref<2x64xf32, #tpu.memory_space<vmem>>, vector<1x64xf32>
    %8 = vector.broadcast %6 : vector<80x1xf32> to vector<80x64xf32>
    %9 = vector.broadcast %7 : vector<1x64xf32> to vector<80x64xf32>
    %10 = arith.mulf %8, %9 : vector<80x64xf32>
    %11 = arith.addf %5, %10 : vector<80x64xf32>
    %c0_4 = arith.constant 0 : index
    %c0_5 = arith.constant 0 : index
    %12 = vector.load %arg3[%c0_4, %c0_5] : memref<1x64xf32, #tpu.memory_space<vmem>>, vector<1x64xf32>
    %13 = vector.broadcast %12 : vector<1x64xf32> to vector<80x64xf32>
    %14 = arith.addf %11, %13 : vector<80x64xf32>
    %15 = math.sin %14 : vector<80x64xf32>
    %c0_6 = arith.constant 0 : index
    %c0_7 = arith.constant 0 : index
    %16 = vector.load %arg4[%c0_6, %c0_7] : memref<80x64xf32, #tpu.memory_space<vmem>>, vector<80x64xf32>
    tpu.vector_store %arg4[%c0_6, %c0_7], %15 {strides = array<i32>} : memref<80x64xf32, #tpu.memory_space<vmem>>, vector<80x64xf32>,
    return
  }
  func.func @transform_0(%arg0: i32) -> (i32, i32) {
    %c0_i32 = arith.constant 0 : i32
    %c0_i32_0 = arith.constant 0 : i32
    return %arg0, %c0_i32 : i32, i32
  }
  func.func @transform_1(%arg0: i32) -> (i32, i32) {
    %c0_i32 = arith.constant 0 : i32
    %c0_i32_0 = arith.constant 0 : i32
    %c0_i32_1 = arith.constant 0 : i32
    return %c0_i32, %c0_i32_0 : i32, i32
  }
  func.func @transform_2(%arg0: i32) -> (i32, i32) {
    %c0_i32 = arith.constant 0 : i32
    %c0_i32_0 = arith.constant 0 : i32
    %c0_i32_1 = arith.constant 0 : i32
    return %c0_i32, %c0_i32_0 : i32, i32
  }
  func.func @transform_3(%arg0: i32) -> (i32, i32) {
    %c0_i32 = arith.constant 0 : i32
    %c0_i32_0 = arith.constant 0 : i32
    return %arg0, %c0_i32 : i32, i32
  }
}

module attributes {stable_mosaic.version = 11 : i64} {
  func.func @sine_layer_kernel(%arg0: i32, %arg1: memref<80x2xf32, #tpu.memory_space<vmem>>, %arg2: memref<2x64xf32, #tpu.memory_space<vmem>>, %arg3: memref<1x64xf32, #tpu.memory_space<vmem>>, %arg4: memref<80x64xf32, #tpu.memory_space<vmem>>) attributes {dimension_semantics = [#tpu.dimension_semantics<parallel>], iteration_bounds = array<i64: 4>, scalar_prefetch = 0 : i64, scratch_operands = 0 : i64, tpu.core_type = #tpu.core_type<tc>, window_params = [{transform_indices = @transform_0, window_bounds = array<i64: 80, 2>}, {pipeline_mode = #tpu.pipeline_mode<synchronous>, transform_indices = @transform_1, window_bounds = array<i64: 2, 64>}, {pipeline_mode = #tpu.pipeline_mode<synchronous>, transform_indices = @transform_2, window_bounds = array<i64: 1, 64>}, {transform_indices = @transform_3, window_bounds = array<i64: 80, 64>}]} {
    %c0 = arith.constant 0 : index
    %c0_0 = arith.constant 0 : index
    %0 = vector.load %arg1[%c0, %c0_0] : memref<80x2xf32, #tpu.memory_space<vmem>>, vector<80x2xf32>
    %1 = vector.extract_strided_slice %0 {offsets = [0, 0], sizes = [80, 1], strides = [1, 1]} : vector<80x2xf32> to vector<80x1xf32>
    %c0_1 = arith.constant 0 : index
    %c0_2 = arith.constant 0 : index
    %2 = vector.load %arg2[%c0_1, %c0_2] : memref<2x64xf32, #tpu.memory_space<vmem>>, vector<1x64xf32>
    %3 = vector.broadcast %1 : vector<80x1xf32> to vector<80x64xf32>
    %4 = vector.broadcast %2 : vector<1x64xf32> to vector<80x64xf32>
    %5 = arith.mulf %3, %4 : vector<80x64xf32>
    %6 = vector.extract_strided_slice %0 {offsets = [0, 1], sizes = [80, 1], strides = [1, 1]} : vector<80x2xf32> to vector<80x1xf32>
    %c1 = arith.constant 1 : index
    %c0_3 = arith.constant 0 : index
    %7 = vector.load %arg2[%c1, %c0_3] : memref<2x64xf32, #tpu.memory_space<vmem>>, vector<1x64xf32>
    %8 = vector.broadcast %6 : vector<80x1xf32> to vector<80x64xf32>
    %9 = vector.broadcast %7 : vector<1x64xf32> to vector<80x64xf32>
    %10 = arith.mulf %8, %9 : vector<80x64xf32>
    %11 = arith.addf %5, %10 : vector<80x64xf32>
    %c0_4 = arith.constant 0 : index
    %c0_5 = arith.constant 0 : index
    %12 = vector.load %arg3[%c0_4, %c0_5] : memref<1x64xf32, #tpu.memory_space<vmem>>, vector<1x64xf32>
    %13 = vector.broadcast %12 : vector<1x64xf32> to vector<80x64xf32>
    %14 = arith.addf %11, %13 : vector<80x64xf32>
    %15 = math.sin %14 : vector<80x64xf32>
    %c0_6 = arith.constant 0 : index
    %c0_7 = arith.constant 0 : index
    %16 = vector.load %arg4[%c0_6, %c0_7] : memref<80x64xf32, #tpu.memory_space<vmem>>, vector<80x64xf32>
    tpu.vector_store %arg4[%c0_6, %c0_7], %15 {strides = array<i32>} : memref<80x64xf32, #tpu.memory_space<vmem>>, vector<80x64xf32>,
    return
  }
  func.func @transform_0(%arg0: i32) -> (i32, i32) {
    %c0_i32 = arith.constant 0 : i32
    %c0_i32_0 = arith.constant 0 : i32
    return %arg0, %c0_i32 : i32, i32
  }
  func.func @transform_1(%arg0: i32) -> (i32, i32) {
    %c0_i32 = arith.constant 0 : i32
    %c0_i32_0 = arith.constant 0 : i32
    %c0_i32_1 = arith.constant 0 : i32
    return %c0_i32, %c0_i32_0 : i32, i32
  }
  func.func @transform_2(%arg0: i32) -> (i32, i32) {
    %c0_i32 = arith.constant 0 : i32
    %c0_i32_0 = arith.constant 0 : i32
    %c0_i32_1 = arith.constant 0 : i32
    return %c0_i32, %c0_i32_0 : i32, i32
  }
  func.func @transform_3(%arg0: i32) -> (i32, i32) {
    %c0_i32 = arith.constant 0 : i32
    %c0_i32_0 = arith.constant 0 : i32
    return %arg0, %c0_i32 : i32, i32
  }
}

</mosaic_0001>

<bundles_post_ra>
// kernel: tpu_custom_call.1
= control target key start
LH: loop header
LB: loop body
LE: loop exit
PB: predicated region body
PF: predicated region fallthrough
CT: control target
= control target key end

     0   :  { %s2018_s12 = smov 0   ;;  %s2020_s13 = smov 0   ;;  %s2988_s0 = inlined_call_operand.vmem [shape: f32[300,2], index: 0, kind: input, shape index: {}]   ;;  %s2989_s1 = inlined_call_operand.vmem [shape: f32[2,64], index: 1, kind: input, shape index: {}]   ;;  %s2990_s2 = inlined_call_operand.vmem [shape: f32[1,64], index: 2, kind: input, shape index: {}]   ;;  %s2991_s3 = inlined_call_operand.vmem [shape: f32[300,64], index: 3, kind: output, shape index: {}]  }
   0x1   :  { %s2022_s14 = smov 0  }
   0x2 LB: > { %s2031_s15 = sadd.s32 4294967295, %s1956_s14   ;;  %s2033_s16 = sadd.s32 1, %s1956_s14   ;;  %s1956_s14 = sphi %s2022_s14, %s3014_s14   ;;  %s1952_s13 = sphi %s2020_s13, %s3013_s13   ;;  %s1948_s12 = sphi %s2018_s12, %s3012_s12  }
   0x3   : > { %s85_s17 = ssub.s32 %s1956_s14, %s2033_s16  ;;  %s88_s18 = sadd.s32 1, %s1952_s13 }
   0x4   : > { %p86_p0 = scmp.eq.s32.totalorder %s85_s17, 0  ;;  %p98_p1 = scmp.ne.s32.totalorder %s1952_s13, %s1948_s12 }
   0x5   : > { %p99_p2 = scmp.eq.s32.totalorder %s2031_s15, 3  ;;  %p1656_p3 = scmp.ge.s32.totalorder %s1956_s14, 1 }
   0x6   : > { %s2041_s19 = scalar_select %p86_p0, %s1952_s13, %s88_s18  }
   0x7   : > { %p2043_p4 = por %p99_p2, %p98_p1  ;;  %p146_p5 = scmp.lt.s32.totalorder %s1956_s14, 5 }
   0x9   : > { %p147_p6 = pnand %p1656_p3, %p146_p5 }
   0xa   : > { %s2048_s21 = smul.u32 (!%p147_p6), 10, %s2031_s15  ;;  %v1990_v0 = vmov (!%p147_p6), 0   ;;  %v1991_v11 = vmov (!%p147_p6), 1   ;;  %v1658_v16 = vld [vmem:[%s2989_s1] ss:$0 sm:$0xff] (!%p147_p6)  ;;  %s170_s6 = sand.u32 (!%p147_p6), 1, %s1948_s12  }
   0xb   : > { %150 = sbr.rel (%p147_p6) target bundleno = 527 (0x20f), region = 32  ;;  %1853 = vset.pattern.permute.xlu1 (!%p147_p6), %v1990_v0  ;;  %1852 = vset.pattern.permute.xlu0 (!%p147_p6), %v1990_v0  ;;  %v2073_v29 = vld [vmem:[%s2989_s1 + $0x1] ss:$0 sm:$0xff] (!%p147_p6)  ;;  %v2080_v36 = vld [vmem:[%s2990_s2] ss:$0 sm:$0xff] (!%p147_p6) }
   0xc   : > { %p178_p7 = scmp.lt.s32.totalorder (!%p147_p6), %s2048_s21, 37  ;;  %s2333_s7 = smul.u32 (!%p147_p6), 80, %s170_s6 }
   0xe   : > { %s2371_s8 = scalar_lea.vmem (!%p147_p6), [#allocation2], %s2333_s7  }
  0x12   : > { %s179_s22 = scalar_select %p178_p7, %s2048_s21, 37 }
  0x13   : > { %s1408_s14 = ssub.s32 (%p2043_p4), 38, %s2048_s21  ;;  %s1713_s17 = smul.u32 (%p2043_p4), 80, %s2031_s15 }
  0x14   : > { %s1657_s23 = sshll.u32 %s179_s22, 3  ;;  %p1409_p8 = scmp.lt.s32.totalorder (%p2043_p4), %s1408_s14, 10 }
  0x15   : > { %s181_s26 = scalar_lea.vmem %s2988_s0, %s1657_s23  ;;  %s2936_s23 = scalar_lea.vmem (%p2043_p4), %s2991_s3, %s1713_s17  }
  0x16   : > { %v194_v1 = vld [vmem:[%s181_s26 + $0x10] sm:$0xff]  ;;  %v192_v2 = vld [vmem:[%s181_s26] sm:$0xff]  ;;  %v195_v3 = vld [vmem:[%s181_s26 + $0x18] sm:$0xff] }
  0x17   : > { %215 = vperm.xlu1 %1853, %v194_v1   ;;  %205 = vperm.xlu0 %1852, %v192_v2   ;;  %v193_v4 = vld [vmem:[%s181_s26 + $0x8] sm:$0xff]  ;;  %v196_v6 = vld [vmem:[%s181_s26 + $0x20] sm:$0xff]  ;;  %v199_v7 = vld [vmem:[%s181_s26 + $0x38] sm:$0xff] }
  0x18   : > { %v197_v5 = vld [vmem:[%s181_s26 + $0x28] sm:$0xff]  ;;  %v198_v8 = vld [vmem:[%s181_s26 + $0x30] sm:$0xff]  ;;  %v200_v10 = vld [vmem:[%s181_s26 + $0x40] sm:$0xff] }
  0x19   : > { %v201_v9 = vld [vmem:[%s181_s26 + $0x48] sm:$0xff] }
  0x1b   : > { %220 = vperm.xlu1 %1853, %v195_v3   ;;  %210 = vperm.xlu0 %1852, %v193_v4  }
  0x1f   : > { %230 = vperm.xlu1 %1853, %v197_v5   ;;  %225 = vperm.xlu0 %1852, %v196_v6  }
  0x23   : > { %240 = vperm.xlu1 %1853, %v199_v7   ;;  %235 = vperm.xlu0 %1852, %v198_v8  }
  0x27   : > { %250 = vperm.xlu1 %1853, %v201_v9   ;;  %245 = vperm.xlu0 %1852, %v200_v10  }
  0x2b   : > { %1855 = vset.pattern.permute.xlu1 %v1991_v11  ;;  %1854 = vset.pattern.permute.xlu0 %v1991_v11  ;;  %v1992_v11 = vmov 683565275  }
  0x2c   : > { %273 = vperm.xlu1 %1855, %v193_v4   ;;  %269 = vperm.xlu0 %1854, %v192_v2  }
  0x30   : > { %277 = vperm.xlu1 %1855, %v194_v1   ;;  %281 = vperm.xlu0 %1854, %v195_v3  }
  0x34   : > { %285 = vperm.xlu1 %1855, %v196_v6   ;;  %289 = vperm.xlu0 %1854, %v197_v5  }
  0x38   : > { %293 = vperm.xlu1 %1855, %v198_v8   ;;  %297 = vperm.xlu0 %1854, %v199_v7  }
  0x3c   : > { %301 = vperm.xlu1 %1855, %v200_v10   ;;  %305 = vperm.xlu0 %1854, %v201_v9  }
  0x96   : > { %v216_v12 = vpop.permute.xlu1 %215  ;;  %v206_v13 = vpop.permute.xlu0 %205 }
  0x97   : > { %v257_v32 = vmul.f32 %v1658_v16, %v206_v13  ;;  %v259_v43 = vmul.f32 %v1658_v16, %v216_v12 }
  0x9a   : > { %v221_v14 = vpop.permute.xlu1 %220  ;;  %v211_v15 = vpop.permute.xlu0 %210 }
  0x9b   : > { %v258_v33 = vmul.f32 %v1658_v16, %v211_v15  ;;  %v260_v63 = vmul.f32 %v1658_v16, %v221_v14  ;;  %v1993_v15 = vmov 2475754826  }
  0x9e   : > { %v231_v17 = vpop.permute.xlu1 %230  ;;  %v226_v18 = vpop.permute.xlu0 %225 }
  0x9f   : > { %v2058_v19 = vmul.f32 %v1658_v16, %v231_v17  ;;  %v2060_v20 = vmul.f32 %v1658_v16, %v226_v18  ;;  %v1994_v17 = vmov 2131351028  }
  0xa2   : > { %v241_v21 = vpop.permute.xlu1 %240  ;;  %v236_v22 = vpop.permute.xlu0 %235 }
  0xa3   : > { %v2062_v23 = vmul.f32 %v1658_v16, %v241_v21  ;;  %v2064_v24 = vmul.f32 %v1658_v16, %v236_v22  ;;  %v1995_v21 = vmov 2102212464  }
  0xa6   : > { %v251_v25 = vpop.permute.xlu1 %250  ;;  %v246_v26 = vpop.permute.xlu0 %245 }
  0xa7   : > { %v2066_v27 = vmul.f32 %v1658_v16, %v251_v25  ;;  %v2068_v28 = vmul.f32 %v1658_v16, %v246_v26  ;;  %v1996_v25 = vmov 920167782  }
  0xab   : > { %v274_v30 = vpop.permute.xlu1 %273  ;;  %v270_v31 = vpop.permute.xlu0 %269 }
  0xac   : > { %v313_v34 = vmul.f32 %v2073_v29, %v274_v30  ;;  %v312_v35 = vmul.f32 %v2073_v29, %v270_v31 }
  0xae   : > { %v323_v37 = vadd.f32 %v313_v34, %v258_v33  ;;  %v322_v38 = vadd.f32 %v312_v35, %v257_v32  ;;  %v1997_v35 = vmov 1326507024  }
  0xaf   : > { %v278_v39 = vpop.permute.xlu1 %277  ;;  %v282_v53 = vpop.permute.xlu0 %281 }
  0xb0   : > { %v2083_v40 = vadd.f32 %v2080_v36, %v323_v37  ;;  %v2086_v41 = vadd.f32 %v2080_v36, %v322_v38  ;;  %v314_v42 = vmul.f32 %v2073_v29, %v278_v39  ;;  %v315_v58 = vmul.f32 %v2073_v29, %v282_v53 }
  0xb2   : > { %v453_v44 = vand.u32 2147483647, %v2083_v40  ;;  %v456_v45 = vand.u32 2139095040, %v2083_v40  ;;  %v349_v46 = vand.u32 2147483647, %v2086_v41  ;;  %v352_v47 = vand.u32 2139095040, %v2086_v41 }
  0xb3   : > { %v324_v49 = vadd.f32 %v314_v42, %v259_v43  ;;  %v2102_v5 = vadd.f32 %v315_v58, %v260_v63  ;;  %vm455_vm13 = vcmp.lt.s32.totalorder %v2083_v40, 0  ;;  %vm351_vm15 = vcmp.lt.s32.totalorder %v2086_v41, 0 }
  0xb4   : > { %v457_v48 = vshrl.u32 %v456_v45, 23  ;;  %v460_v50 = vand.u32 8388607, %v453_v44  ;;  %v353_v51 = vshrl.u32 %v352_v47, 23  ;;  %v356_v52 = vand.u32 8388607, %v349_v46 }
  0xb5   : > { %v2098_v55 = vadd.f32 %v2080_v36, %v324_v49  ;;  %vm2191_vm14 = vcmp.le.f32.partialorder %v453_v44, 0.7853982 }
  0xb6   : > { %v1665_v54 = vadd.s32 4294967169, %v457_v48  ;;  %v1661_v56 = vadd.s32 4294967169, %v353_v51  ;;  %v461_v59 = vor.u32 8388608, %v460_v50  ;;  %v357_v60 = vor.u32 8388608, %v356_v52 }
  0xb7   : > { %v560_v62 = vand.u32 2139095040, %v2098_v55  ;;  %v557_v9 = vand.u32 2147483647, %v2098_v55 }
  0xb8   : > { %v463_v57 = vadd.s32 1, %v1665_v54  ;;  %v359_v61 = vadd.s32 1, %v1661_v56  ;;  %v2104_v6 = vshll.u32 %v461_v59, 8  ;;  %v2108_v8 = vshll.u32 %v357_v60, 8 }
  0xb9   : > { %v561_v1 = vshrl.u32 %v560_v62, 23 }
  0xba   : > { %vm464_vm0 = vcmp.gt.s32.totalorder %v463_v57, 0  ;;  %vm360_vm1 = vcmp.gt.s32.totalorder %v359_v61, 0 }
  0xbb   : > { %v465_v0 = vsel %vm464_vm0, %v463_v57, 0  ;;  %v361_v4 = vsel %vm360_vm1, %v359_v61, 0  ;;  %v2112_v14 = vadd.s32 4294967169, %v561_v1 }
  0xbc   : > { %v466_v2 = vshrl.u32 %v465_v0, 5  ;;  %v467_v3 = vand.u32 31, %v465_v0  ;;  %v2106_v7 = vshrl.u32 %v361_v4, 5  ;;  %v363_v13 = vand.u32 31, %v361_v4 }
  0xbe   : > { %v468_v10 = vsub.s32 32, %v467_v3  ;;  %v470_v12 = vshll.u32 %v1992_v11, %v467_v3  ;;  %v473_v16 = vshll.u32 %v1993_v15, %v467_v3  ;;  %v476_v18 = vshll.u32 %v1994_v17, %v467_v3 }
  0xbf   : > { %v479_v22 = vshll.u32 %v1995_v21, %v467_v3  ;;  %v482_v26 = vshll.u32 %v1996_v25, %v467_v3  ;;  %vm485_vm2 = vcmp.lt.s32.totalorder %v466_v2, 1  ;;  %vm486_vm3 = vcmp.lt.s32.totalorder %v466_v2, 2 }
  0xc0   : > { %v471_v30 = vshrl.u32 %v1993_v15, %v468_v10  ;;  %v474_v31 = vshrl.u32 %v1994_v17, %v468_v10  ;;  %v477_v32 = vshrl.u32 %v1995_v21, %v468_v10  ;;  %v469_v33 = vshrl.u32 %v1992_v11, %v468_v10 }
  0xc1   : > { %v480_v34 = vshrl.u32 %v1996_v25, %v468_v10  ;;  %v483_v37 = vshrl.u32 %v1997_v35, %v468_v10  ;;  %v364_v43 = vsub.s32 32, %v363_v13  ;;  %vm487_vm4 = vcmp.lt.s32.totalorder %v466_v2, 3 }
  0xc2   : > { %v472_v38 = vor.u32 %v471_v30, %v470_v12  ;;  %v475_v39 = vor.u32 %v474_v31, %v473_v16  ;;  %v478_v42 = vor.u32 %v477_v32, %v476_v18  ;;  %vm488_vm5 = vcmp.lt.s32.totalorder %v466_v2, 4 }
  0xc3   : > { %v481_v45 = vor.u32 %v480_v34, %v479_v22  ;;  %v484_v47 = vor.u32 %v483_v37, %v482_v26  ;;  %v366_v56 = vshll.u32 %v1992_v11, %v363_v13  ;;  %v367_v59 = vshrl.u32 %v1993_v15, %v364_v43 }
  0xc4   : > { %v489_v48 = vsel %vm485_vm2, %v469_v33, %v472_v38  ;;  %v490_v49 = vsel %vm488_vm5, %v478_v42, 2102212464  ;;  %v493_v50 = vsel %vm485_vm2, %v472_v38, %v475_v39  ;;  %v497_v51 = vsel %vm485_vm2, %v475_v39, %v478_v42 }
  0xc5   : > { %v491_v52 = vsel %vm487_vm4, %v475_v39, %v490_v49  ;;  %v494_v53 = vsel %vm488_vm5, %v481_v45, 920167782  ;;  %v498_v54 = vsel %vm488_vm5, %v484_v47, 1326507024  ;;  %v369_v60 = vshll.u32 %v1993_v15, %v363_v13 }
  0xc6   : > { %v495_v57 = vsel %vm487_vm4, %v478_v42, %v494_v53  ;;  %v499_v58 = vsel %vm487_vm4, %v481_v45, %v498_v54  ;;  %v492_v61 = vsel %vm486_vm3, %v489_v48, %v491_v52  ;;  %v370_v0 = vshrl.u32 %v1994_v17, %v364_v43 }
  0xc7   : > { %v496_v62 = vsel %vm486_vm3, %v493_v50, %v495_v57  ;;  %v500_v63 = vsel %vm486_vm3, %v497_v51, %v499_v58  ;;  %v368_v12 = vor.u32 %v367_v59, %v366_v56  ;;  %v372_v18 = vshll.u32 %v1994_v17, %v363_v13 }
  0xc8   : > { %v2135_v1 = vmul.u32.u64.low %v2104_v6, %v500_v63  ;;  %v2136_v3 = vmul.u32.u64.high %v2104_v6, %v500_v63, %v2135_v1  ;;  %v2139_v4 = vmul.u32.u64.low %v2104_v6, %v496_v62  ;;  %v2140_v10 = vmul.u32.u64.high %v2104_v6, %v496_v62, %v2139_v4 }
  0xc9   : > { %v371_v16 = vor.u32 %v370_v0, %v369_v60  ;;  %v373_v22 = vshrl.u32 %v1995_v21, %v364_v43  ;;  %v365_v2 = vshrl.u32 %v1992_v11, %v364_v43  ;;  %v375_v26 = vshll.u32 %v1995_v21, %v363_v13 }
  0xca   : > { %v376_v30 = vshrl.u32 %v1996_v25, %v364_v43  ;;  %v379_v31 = vshrl.u32 %v1997_v35, %v364_v43  ;;  %v508_v32 = vmul.u32 %v2104_v6, %v492_v61  ;;  %v378_v34 = vshll.u32 %v1996_v25, %v363_v13 }
  0xcb   : > { %v374_v33 = vor.u32 %v373_v22, %v372_v18  ;;  %vm381_vm6 = vcmp.lt.s32.totalorder %v2106_v7, 1  ;;  %vm510_vm7 = vc.u32 %v2136_v3, %v2139_v4  ;;  %v511_v37 = vadd.s32 1, %v2140_v10  ;;  %v286_v18 = vpop.permute.xlu1 %285 }
  0xcc   : > { %v377_v38 = vor.u32 %v376_v30, %v375_v26  ;;  %vm382_vm8 = vcmp.lt.s32.totalorder %v2106_v7, 2  ;;  %v380_v39 = vor.u32 %v379_v31, %v378_v34  ;;  %vm383_vm9 = vcmp.lt.s32.totalorder %v2106_v7, 3  ;;  %v290_v30 = vpop.permute.xlu0 %289 }
  0xcd   : > { %vm384_vm10 = vcmp.lt.s32.totalorder %v2106_v7, 4  ;;  %v389_v42 = vsel %vm381_vm6, %v368_v12, %v371_v16  ;;  %v512_v6 = vsel %vm510_vm7, %v511_v37, %v2140_v10  ;;  %v393_v45 = vsel %vm381_vm6, %v371_v16, %v374_v33 }
  0xce   : > { %v386_v43 = vsel %vm384_vm10, %v374_v33, 2102212464  ;;  %v390_v13 = vsel %vm384_vm10, %v377_v38, 920167782  ;;  %v513_v47 = vadd.s32 %v512_v6, %v508_v32  ;;  %v385_v48 = vsel %vm381_vm6, %v365_v2, %v368_v12 }
  0xcf   : > { %v391_v49 = vsel %vm383_vm9, %v374_v33, %v390_v13  ;;  %v394_v50 = vsel %vm384_vm10, %v380_v39, 1326507024  ;;  %v387_v51 = vsel %vm383_vm9, %v371_v16, %v386_v43  ;;  %v567_v54 = vadd.s32 1, %v2112_v14 }
  0xd0   : > { %v392_v52 = vsel %vm382_vm8, %v389_v42, %v391_v49  ;;  %v395_v53 = vsel %vm383_vm9, %v377_v38, %v394_v50  ;;  %v514_v56 = vadd.s32 536870912, %v513_v47  ;;  %v564_v62 = vand.u32 8388607, %v557_v9 }
  0xd1   : > { %v396_v57 = vsel %vm382_vm8, %v393_v45, %v395_v53  ;;  %v2165_v58 = vmul.u32.u64.low %v2108_v8, %v392_v52  ;;  %v2166_v59 = vmul.u32.u64.high %v2108_v8, %v392_v52, %v2165_v58  ;;  %vm568_vm11 = vcmp.gt.s32.totalorder %v567_v54, 0 }
  0xd2   : > { %v2170_v60 = vmul.u32.u64.low %v2108_v8, %v396_v57  ;;  %v2171_v61 = vmul.u32.u64.high %v2108_v8, %v396_v57, %v2170_v60  ;;  %v515_v63 = vshrl.u32 %v514_v56, 30  ;;  %v388_v14 = vsel %vm382_vm8, %v385_v48, %v387_v51 }
  0xd3   : > { %v569_v0 = vsel %vm568_vm11, %v567_v54, 0  ;;  %v407_v12 = vadd.s32 1, %v2166_v59  ;;  %v2180_v16 = vadd.f32 %v2080_v36, %v2102_v5  ;;  %v404_v22 = vmul.u32 %v2108_v8, %v388_v14 }
  0xd4   : > { %v571_v1 = vand.u32 31, %v569_v0  ;;  %v516_v10 = vshll.u32 %v515_v63, 30  ;;  %vm406_vm12 = vc.u32 %v2171_v61, %v2165_v58  ;;  %v565_v2 = vor.u32 8388608, %v564_v62 }
  0xd5   : > { %v408_v31 = vsel %vm406_vm12, %v407_v12, %v2166_v59  ;;  %v539_v32 = vsub.s32 4, %v515_v63  ;;  %v2196_v33 = vmul.f32 %v2073_v29, %v286_v18  ;;  %v509_v34 = vadd.s32 %v2139_v4, %v2136_v3 }
  0xd6   : > { %v572_v26 = vsub.s32 32, %v571_v1  ;;  %v2186_v7 = vsub.s32 %v513_v47, %v516_v10  ;;  %v409_v8 = vadd.s32 %v408_v31, %v404_v22  ;;  %v661_v38 = vand.u32 2147483647, %v2180_v16 }
  0xd7   : > { %v2203_v39 = vmul.f32 %v2073_v29, %v290_v30  ;;  %v2206_v6 = vshll.u32 %v565_v2, 8  ;;  %v664_v43 = vand.u32 2139095040, %v2180_v16  ;;  %v2210_v45 = vshrl.u32 %v569_v0, 5 }
  0xd8   : > { %v519_v37 = vsub.s32 0, %v2186_v7  ;;  %v410_v42 = vadd.s32 536870912, %v409_v8  ;;  %v575_v44 = vshrl.u32 %v1993_v15, %v572_v26  ;;  %v578_v3 = vshrl.u32 %v1994_v17, %v572_v26 }
  0xd9   : > { %v581_v4 = vshrl.u32 %v1995_v21, %v572_v26  ;;  %v2216_v47 = vsel %vm455_vm13, %v539_v32, %v515_v63  ;;  %v574_v49 = vshll.u32 %v1992_v11, %v571_v1  ;;  %v584_v50 = vshrl.u32 %v1996_v25, %v572_v26 }
  0xda   : > { %v1666_v13 = vmin.u32 %v519_v37, %v2186_v7  ;;  %v411_v48 = vshrl.u32 %v410_v42, 30  ;;  %v577_v52 = vshll.u32 %v1993_v15, %v571_v1  ;;  %v580_v53 = vshll.u32 %v1994_v17, %v571_v1 }
  0xdb   : > { %v587_v54 = vshrl.u32 %v1997_v35, %v572_v26  ;;  %v576_v57 = vor.u32 %v575_v44, %v574_v49  ;;  %v583_v59 = vshll.u32 %v1995_v21, %v571_v1  ;;  %v665_v60 = vshrl.u32 %v664_v43, 23 }
  0xdc   : > { %v521_v51 = vclz %v1666_v13  ;;  %v412_v56 = vshll.u32 %v411_v48, 30  ;;  %v579_v63 = vor.u32 %v578_v3, %v577_v52  ;;  %v582_v14 = vor.u32 %v581_v4, %v580_v53 }
  0xdd   : > { %v586_v0 = vshll.u32 %v1996_v25, %v571_v1  ;;  %v542_v10 = vsel %vm2191_vm14, 0, %v2216_v47  ;;  %v573_v18 = vshrl.u32 %v1992_v11, %v572_v26  ;;  %v585_v22 = vor.u32 %v584_v50, %v583_v59 }
  0xde   : > { %v1667_v62 = vadd.s32 4294967294, %v521_v51  ;;  %v2229_v12 = vsub.s32 %v409_v8, %v412_v56  ;;  %v435_v2 = vsub.s32 4, %v411_v48  ;;  %vm589_vm1 = vcmp.lt.s32.totalorder %v2210_v45, 1 }
  0xdf   : > { %v588_v30 = vor.u32 %v587_v54, %v586_v0  ;;  %vm591_vm2 = vcmp.lt.s32.totalorder %v2210_v45, 3  ;;  %vm592_vm3 = vcmp.lt.s32.totalorder %v2210_v45, 4  ;;  %vm2238_vm4 = vcmp.le.f32.partialorder %v349_v46, 0.7853982 }
  0xe0   : > { %vm1668_vm0 = vcmp.lt.s32.totalorder %v1667_v62, 0  ;;  %v415_v32 = vsub.s32 0, %v2229_v12  ;;  %v594_v26 = vsel %vm592_vm3, %v582_v14, 2102212464  ;;  %v597_v42 = vsel %vm589_vm1, %v576_v57, %v579_v63 }
  0xe1   : > { %v524_v31 = vsel %vm1668_vm0, 0, %v1667_v62  ;;  %v598_v13 = vsel %vm592_vm3, %v585_v22, 920167782  ;;  %v601_v3 = vsel %vm589_vm1, %v579_v63, %v582_v14  ;;  %v602_v49 = vsel %vm592_vm3, %v588_v30, 1326507024 }
  0xe2   : > { %v525_v1 = vsub.s32 32, %v524_v31  ;;  %v529_v37 = vsub.s32 4294967266, %v524_v31  ;;  %v526_v44 = vshll.u32 %v2186_v7, %v524_v31  ;;  %v1662_v43 = vmin.u32 %v415_v32, %v2229_v12 }
  0xe3   : > { %v599_v46 = vsel %vm591_vm2, %v582_v14, %v598_v13  ;;  %vm590_vm5 = vcmp.lt.s32.totalorder %v2210_v45, 2  ;;  %v593_v51 = vsel %vm589_vm1, %v573_v18, %v576_v57  ;;  %v595_v7 = vsel %vm591_vm2, %v579_v63, %v594_v26 }
  0xe4   : > { %v527_v4 = vshrl.u32 %v509_v34, %v525_v1  ;;  %v530_v47 = vadd.s32 127, %v529_v37  ;;  %v417_v50 = vclz %v1662_v43  ;;  %v600_v54 = vsel %vm590_vm5, %v597_v42, %v599_v46 }
  0xe5   : > { %v603_v34 = vsel %vm591_vm2, %v585_v22, %v602_v49  ;;  %v2258_v62 = vmul.u32.u64.low %v2206_v6, %v600_v54  ;;  %v2259_v14 = vmul.u32.u64.high %v2206_v6, %v600_v54, %v2258_v62  ;;  %v436_v30 = vsel %vm351_vm15, %v435_v2, %v411_v48 }
  0xe6   : > { %v528_v52 = vor.u32 %v527_v4, %v526_v44  ;;  %v531_v53 = vshll.u32 %v530_v47, 23  ;;  %v1663_v56 = vadd.s32 4294967294, %v417_v50  ;;  %v604_v59 = vsel %vm590_vm5, %v601_v3, %v603_v34 }
  0xe7   : > { %v2264_v57 = vmul.u32.u64.low %v2206_v6, %v604_v59  ;;  %v2265_v18 = vmul.u32.u64.high %v2206_v6, %v604_v59, %v2264_v57  ;;  %v405_v63 = vadd.s32 %v2165_v58, %v2171_v61  ;;  %v596_v45 = vsel %vm590_vm5, %v593_v51, %v595_v7 }
  0xe8   : > { %v532_v0 = vor.u32 4788187, %v531_v53  ;;  %vm1664_vm6 = vcmp.lt.s32.totalorder %v1663_v56, 0  ;;  %v1673_v22 = vadd.s32 4294967169, %v665_v60  ;;  %v535_v32 = vcvt.s32.f32 %v528_v52 }
  0xe9   : > { %v546_v1 = vadd.s32 3, %v542_v10  ;;  %v420_v37 = vsel %vm1664_vm6, 0, %v1663_v56  ;;  %v438_v44 = vsel %vm2238_vm4, 0, %v436_v30  ;;  %v615_v48 = vadd.s32 1, %v2259_v14 }
  0xea   : > { %v533_v31 = vand.u32 2147483647, %v532_v0  ;;  %v421_v26 = vsub.s32 32, %v420_v37  ;;  %v425_v42 = vsub.s32 4294967266, %v420_v37  ;;  %v612_v43 = vmul.u32 %v2206_v6, %v596_v45 }
  0xeb   : > { %vm614_vm7 = vc.u32 %v2265_v18, %v2258_v62  ;;  %v671_v58 = vadd.s32 1, %v1673_v22  ;;  %v422_v61 = vshll.u32 %v2229_v12, %v420_v37  ;;  %v668_v47 = vand.u32 8388607, %v661_v38 }
  0xec   : > { %v536_v2 = vmul.f32 %v535_v32, %v533_v31  ;;  %v423_v60 = vshrl.u32 %v405_v63, %v421_v26  ;;  %v426_v13 = vadd.s32 127, %v425_v42  ;;  %v616_v10 = vsel %vm614_vm7, %v615_v48, %v2259_v14 }
  0xed   : > { %v617_v4 = vadd.s32 %v616_v10, %v612_v43  ;;  %vm672_vm8 = vcmp.gt.s32.totalorder %v671_v58, 0  ;;  %v442_v50 = vadd.s32 3, %v438_v44  ;;  %v326_v12 = vadd.f32 %v2196_v33, %v2060_v20 }
  0xee   : > { %v537_v3 = vxor.u32 2147483648, %v536_v2  ;;  %v424_v46 = vor.u32 %v423_v60, %v422_v61  ;;  %v427_v49 = vshll.u32 %v426_v13, 23  ;;  %v673_v51 = vsel %vm672_vm8, %v671_v58, 0 }
  0xef   : > { %v618_v7 = vadd.s32 536870912, %v617_v4  ;;  %v675_v52 = vand.u32 31, %v673_v51  ;;  %v2285_v54 = vand.u32 3, %v546_v1  ;;  %v669_v59 = vor.u32 8388608, %v668_v47 }
  0xf0   : > { %v538_v6 = vsel %vm455_vm13, %v537_v3, %v536_v2  ;;  %v428_v34 = vor.u32 4788187, %v427_v49  ;;  %v431_v30 = vcvt.s32.f32 %v424_v46  ;;  %v2289_v57 = vand.u32 3, %v442_v50 }
  0xf1   : > { %v541_v53 = vsel %vm2191_vm14, %v2083_v40, %v538_v6  ;;  %v2287_v56 = vshrl.u32 %v618_v7, 30  ;;  %v676_v14 = vsub.s32 32, %v675_v52  ;;  %v2293_v20 = vadd.f32 %v2080_v36, %v326_v12 }
  0xf2   : > { %1856 = vcosq.f32 %v541_v53  ;;  %v429_v0 = vand.u32 2147483647, %v428_v34  ;;  %v2297_v5 = vadd.f32 %v2203_v39, %v2058_v19  ;;  %v2300_v45 = vadd.s32 %v2258_v62, %v2265_v18 }
  0xf3   : > { %1858 = vsinq.f32 %v541_v53  ;;  %v620_v63 = vshll.u32 %v2287_v56, 30  ;;  %v679_v22 = vshrl.u32 %v1993_v15, %v676_v14  ;;  %v682_v31 = vshrl.u32 %v1994_v17, %v676_v14 }
  0xf4   : > { %v432_v33 = vmul.f32 %v431_v30, %v429_v0  ;;  %vm552_vm9 = vcmp.eq.s32.totalorder %v2285_v54, 2  ;;  %v2307_v1 = vshrl.u32 %v673_v51, 5  ;;  %v688_v37 = vshrl.u32 %v1996_v25, %v676_v14 }
  0xf5   : > { %v2305_v32 = vsub.s32 %v617_v4, %v620_v63  ;;  %v2310_v26 = vshll.u32 %v669_v59, 8  ;;  %vm549_vm10 = vcmp.eq.s32.totalorder %v2285_v54, 0  ;;  %v678_v39 = vshll.u32 %v1992_v11, %v675_v52 }
  0xf6   : > { %v433_v19 = vxor.u32 2147483648, %v432_v33  ;;  %v681_v62 = vshll.u32 %v1993_v15, %v675_v52  ;;  %v685_v18 = vshrl.u32 %v1995_v21, %v676_v14  ;;  %vm1389_vm11 = vcmask 523264  }
  0xf7   : > { %vm548_vm12 = vcmp.lt.s32.totalorder %v2285_v54, 2  ;;  %v623_v42 = vsub.s32 0, %v2305_v32  ;;  %v684_v44 = vshll.u32 %v1994_v17, %v675_v52  ;;  %v687_v48 = vshll.u32 %v1995_v21, %v675_v52 }
  0xf8   : > { %v765_v2 = vand.u32 2147483647, %v2293_v20  ;;  %vm545_vm13 = vweird.f32 %v2083_v40  ;;  %v434_v43 = vsel %vm351_vm15, %v433_v19, %v432_v33  ;;  %v680_v58 = vor.u32 %v679_v22, %v678_v39 }
  0xf9   : > { %v683_v61 = vor.u32 %v682_v31, %v681_v62  ;;  %v691_v60 = vshrl.u32 %v1997_v35, %v676_v14  ;;  %v437_v13 = vsel %vm2238_vm4, %v2086_v41, %v434_v43  ;;  %v1670_v10 = vmin.u32 %v623_v42, %v2305_v32 }
  0xfa   : > { %v689_v3 = vor.u32 %v688_v37, %v687_v48  ;;  %v690_v4 = vshll.u32 %v1996_v25, %v675_v52  ;;  %1860 = vcosq.f32 %v437_v13  ;;  %v643_v47 = vsub.s32 4, %v2287_v56 }
  0xfb   : > { %v677_v46 = vshrl.u32 %v1992_v11, %v676_v14  ;;  %v686_v49 = vor.u32 %v685_v18, %v684_v44  ;;  %1862 = vsinq.f32 %v437_v13  ;;  %vm559_vm14 = vcmp.lt.s32.totalorder %v2098_v55, 0 }
  0xfc   : > { %v1857_v50 = vpop.eup %1856  ;;  %v625_v51 = vclz %v1670_v10  ;;  %v692_v8 = vor.u32 %v691_v60, %v690_v4  ;;  %vm693_vm15 = vcmp.lt.s32.totalorder %v2307_v1, 1  ;;  %vm694_vm0 = vcmp.lt.s32.totalorder %v2307_v1, 2 }
  0xfd   : > { %v1859_v6 = vpop.eup %1858  ;;  %v553_v7 = vxor.u32 2147483648, %v1857_v50  ;;  %vm696_vm1 = vcmp.lt.s32.totalorder %v2307_v1, 4  ;;  %v701_v52 = vsel %vm693_vm15, %v680_v58, %v683_v61  ;;  %vm695_vm2 = vcmp.lt.s32.totalorder %v2307_v1, 3 }
  0xfe   : > { %v550_v12 = vxor.u32 2147483648, %v1859_v6  ;;  %v1671_v53 = vadd.s32 4294967294, %v625_v51  ;;  %v702_v34 = vsel %vm696_vm1, %v689_v3, 920167782  ;;  %vm2346_vm3 = vcmp.le.f32.partialorder %v557_v9, 0.7853982 }
  0xff   : > { %v554_v59 = vsel %vm552_vm9, %v553_v7, %v1859_v6  ;;  %v698_v0 = vsel %vm696_vm1, %v686_v49, 2102212464  ;;  %v703_v30 = vsel %vm695_vm2, %v686_v49, %v702_v34  ;;  %v705_v63 = vsel %vm693_vm15, %v683_v61, %v686_v49 }
 0x100   : > { %v551_v33 = vsel %vm549_vm10, %v1857_v50, %v550_v12  ;;  %vm1672_vm4 = vcmp.lt.s32.totalorder %v1671_v53, 0  ;;  %v704_v22 = vsel %vm694_vm0, %v701_v52, %v703_v30  ;;  %v706_v31 = vsel %vm696_vm1, %v692_v8, 1326507024 }
 0x101   : > { %v555_v9 = vsel %vm548_vm12, %v551_v33, %v554_v59  ;;  %vm444_vm5 = vcmp.lt.s32.totalorder %v2289_v57, 2  ;;  %v628_v37 = vsel %vm1672_vm4, 0, %v1671_v53  ;;  %v697_v19 = vsel %vm693_vm15, %v677_v46, %v680_v58 }
 0x102   : > { %v707_v39 = vsel %vm695_vm2, %v689_v3, %v706_v31  ;;  %v556_v62 = vsel %vm545_vm13, nan, %v555_v9  ;;  %vm441_vm6 = vweird.f32 %v2086_v41  ;;  %v629_v18 = vsub.s32 32, %v628_v37 }
 0x103   : > { %v633_v42 = vsub.s32 4294967266, %v628_v37  ;;  %v699_v54 = vsel %vm695_vm2, %v683_v61, %v698_v0  ;;  %1391 = vst.msk [vmem:[%s2371_s8 + $0x8] sm:$0xff] %vm1389_vm11, %v556_v62  ;;  %v630_v44 = vshll.u32 %v2305_v32, %v628_v37  ;;  %v708_v48 = vsel %vm694_vm0, %v705_v63, %v707_v39 }
 0x104   : > { %v2379_v40 = vmul.u32.u64.low %v2310_v26, %v704_v22  ;;  %v2380_v43 = vmul.u32.u64.high %v2310_v26, %v704_v22, %v2379_v40  ;;  %v631_v58 = vshrl.u32 %v2300_v45, %v629_v18  ;;  %v1861_v10 = vpop.eup %1860  ;;  %vm445_vm7 = vcmp.eq.s32.totalorder %v2289_v57, 0 }
 0x105   : > { %v634_v60 = vadd.s32 127, %v633_v42  ;;  %v2384_v13 = vmul.u32.u64.low %v2310_v26, %v708_v48  ;;  %v2385_v61 = vmul.u32.u64.high %v2310_v26, %v708_v48, %v2384_v13  ;;  %vm448_vm8 = vcmp.eq.s32.totalorder %v2289_v57, 2  ;;  %v1863_v4 = vpop.eup %1862  ;;  %v294_v57 = vpop.permute.xlu1 %293 }
 0x106   : > { %v644_v32 = vsel %vm559_vm14, %v643_v47, %v2287_v56  ;;  %v768_v3 = vand.u32 2139095040, %v2293_v20  ;;  %v449_v46 = vxor.u32 2147483648, %v1861_v10  ;;  %v632_v49 = vor.u32 %v631_v58, %v630_v44 }
 0x107   : > { %v635_v45 = vshll.u32 %v634_v60, 23  ;;  %v700_v50 = vsel %vm694_vm0, %v697_v19, %v699_v54  ;;  %v446_v51 = vxor.u32 2147483648, %v1863_v4  ;;  %v719_v8 = vadd.s32 1, %v2380_v43 }
 0x108   : > { %v769_v6 = vshrl.u32 %v768_v3, 23  ;;  %v2398_v7 = vadd.f32 %v2080_v36, %v2297_v5  ;;  %v450_v52 = vsel %vm448_vm8, %v449_v46, %v1863_v4  ;;  %v646_v47 = vsel %vm2346_vm3, 0, %v644_v32 }
 0x109   : > { %v636_v56 = vor.u32 4788187, %v635_v45  ;;  %v772_v12 = vand.u32 8388607, %v765_v2  ;;  %v447_v1 = vsel %vm445_vm7, %v1861_v10, %v446_v51  ;;  %v716_v53 = vmul.u32 %v2310_v26, %v700_v50 }
 0x10a   : > { %vm718_vm9 = vc.u32 %v2385_v61, %v2379_v40  ;;  %v1677_v34 = vadd.s32 4294967169, %v769_v6  ;;  %v451_v5 = vsel %vm444_vm5, %v447_v1, %v450_v52  ;;  %v639_v0 = vcvt.s32.f32 %v632_v49 }
 0x10b   : > { %v637_v59 = vand.u32 2147483647, %v636_v56  ;;  %v720_v30 = vsel %vm718_vm9, %v719_v8, %v2380_v43  ;;  %v452_v63 = vsel %vm441_vm6, nan, %v451_v5  ;;  %v650_v33 = vadd.s32 3, %v646_v47  ;;  %v298_v43 = vpop.permute.xlu0 %297 }
 0x10c   : > { %v721_v22 = vadd.s32 %v720_v30, %v716_v53  ;;  %v775_v31 = vadd.s32 1, %v1677_v34  ;;  %1390 = vst.msk [vmem:[%s2371_s8] sm:$0xff] %vm1389_vm11, %v452_v63  ;;  %v773_v26 = vor.u32 8388608, %v772_v12  ;;  %v869_v37 = vand.u32 2147483647, %v2398_v7 }
 0x10d   : > { %v640_v9 = vmul.f32 %v639_v0, %v637_v59  ;;  %vm663_vm12 = vcmp.lt.s32.totalorder %v2180_v16, 0  ;;  %v872_v18 = vand.u32 2139095040, %v2398_v7  ;;  %v2418_v41 = vand.u32 3, %v650_v33 }
 0x10e   : > { %v722_v19 = vadd.s32 536870912, %v721_v22  ;;  %vm776_vm10 = vcmp.gt.s32.totalorder %v775_v31, 0  ;;  %vm2422_vm13 = vcmp.le.f32.partialorder %v661_v38, 0.7853982  ;;  %v2427_v54 = vadd.s32 %v2379_v40, %v2385_v61 }
 0x10f   : > { %v641_v39 = vxor.u32 2147483648, %v640_v9  ;;  %v777_v62 = vsel %vm776_vm10, %v775_v31, 0  ;;  %v2431_v60 = vshll.u32 %v773_v26, 8  ;;  %v2435_v13 = vand.u32 8388607, %v869_v37 }
 0x110   : > { %v723_v44 = vshrl.u32 %v722_v19, 30  ;;  %v779_v48 = vand.u32 31, %v777_v62  ;;  %v318_v38 = vmul.f32 %v2073_v29, %v294_v57  ;;  %v778_v3 = vshrl.u32 %v777_v62, 5 }
 0x111   : > { %v642_v58 = vsel %vm559_vm14, %v641_v39, %v640_v9  ;;  %v873_v4 = vshrl.u32 %v872_v18, 23  ;;  %v2442_v46 = vmul.f32 %v2073_v29, %v298_v43  ;;  %vm656_vm14 = vcmp.eq.s32.totalorder %v2418_v41, 2 }
 0x112   : > { %v645_v10 = vsel %vm2346_vm3, %v2098_v55, %v642_v58  ;;  %v724_v40 = vshll.u32 %v723_v44, 30  ;;  %v747_v61 = vsub.s32 4, %v723_v44  ;;  %v780_v32 = vsub.s32 32, %v779_v48 }
 0x113   : > { %1864 = vcosq.f32 %v645_v10  ;;  %v782_v45 = vshll.u32 %v1992_v11, %v779_v48  ;;  %v785_v50 = vshll.u32 %v1993_v15, %v779_v48  ;;  %v788_v8 = vshll.u32 %v1994_v17, %v779_v48 }
 0x114   : > { %1866 = vsinq.f32 %v645_v10  ;;  %v2444_v49 = vsub.s32 %v721_v22, %v724_v40  ;;  %v783_v51 = vshrl.u32 %v1993_v15, %v780_v32  ;;  %v786_v14 = vshrl.u32 %v1994_v17, %v780_v32 }
 0x115   : > { %v789_v6 = vshrl.u32 %v1995_v21, %v780_v32  ;;  %v2455_v29 = vsel %vm663_vm12, %v747_v61, %v723_v44  ;;  %v791_v56 = vshll.u32 %v1995_v21, %v779_v48  ;;  %v792_v47 = vshrl.u32 %v1996_v25, %v780_v32 }
 0x116   : > { %v727_v52 = vsub.s32 0, %v2444_v49  ;;  %v784_v12 = vor.u32 %v783_v51, %v782_v45  ;;  %v787_v1 = vor.u32 %v786_v14, %v785_v50  ;;  %v877_v34 = vor.u32 8388608, %v2435_v13 }
 0x117   : > { %v790_v53 = vor.u32 %v789_v6, %v788_v8  ;;  %vm653_vm15 = vcmp.eq.s32.totalorder %v2418_v41, 0  ;;  %v793_v59 = vor.u32 %v792_v47, %v791_v56  ;;  %v795_v0 = vshrl.u32 %v1997_v35, %v780_v32 }
 0x118   : > { %v1674_v5 = vmin.u32 %v727_v52, %v2444_v49  ;;  %v328_v30 = vadd.f32 %v318_v38, %v2064_v24  ;;  %vm652_vm0 = vcmp.lt.s32.totalorder %v2418_v41, 2  ;;  %v750_v63 = vsel %vm2422_vm13, 0, %v2455_v29 }
 0x119   : > { %v781_v33 = vshrl.u32 %v1992_v11, %v780_v32  ;;  %v794_v22 = vshll.u32 %v1996_v25, %v779_v48  ;;  %v1681_v31 = vadd.s32 4294967169, %v873_v4  ;;  %vm649_vm1 = vweird.f32 %v2098_v55 }
 0x11a   : > { %v729_v9 = vclz %v1674_v5  ;;  %vm797_vm2 = vcmp.lt.s32.totalorder %v778_v3, 1  ;;  %vm799_vm3 = vcmp.lt.s32.totalorder %v778_v3, 3  ;;  %vm800_vm4 = vcmp.lt.s32.totalorder %v778_v3, 4 }
 0x11b   : > { %v796_v26 = vor.u32 %v795_v0, %v794_v22  ;;  %v801_v19 = vsel %vm797_vm2, %v781_v33, %v784_v12  ;;  %v802_v24 = vsel %vm800_vm4, %v790_v53, 2102212464  ;;  %v805_v57 = vsel %vm797_vm2, %v784_v12, %v787_v1 }
 0x11c   : > { %v1675_v39 = vadd.s32 4294967294, %v729_v9  ;;  %v803_v62 = vsel %vm799_vm3, %v787_v1, %v802_v24  ;;  %v806_v18 = vsel %vm800_vm4, %v793_v59, 920167782  ;;  %v809_v44 = vsel %vm797_vm2, %v787_v1, %v790_v53 }
 0x11d   : > { %v1865_v43 = vpop.eup %1864  ;;  %vm798_vm5 = vcmp.lt.s32.totalorder %v778_v3, 2  ;;  %v807_v48 = vsel %vm799_vm3, %v790_v53, %v806_v18  ;;  %v810_v58 = vsel %vm800_vm4, %v796_v26, 1326507024  ;;  %v879_v13 = vadd.s32 1, %v1681_v31 }
 0x11e   : > { %v1867_v38 = vpop.eup %1866  ;;  %v657_v10 = vxor.u32 2147483648, %v1865_v43  ;;  %vm1676_vm6 = vcmp.lt.s32.totalorder %v1675_v39, 0  ;;  %v804_v40 = vsel %vm798_vm5, %v801_v19, %v803_v62  ;;  %v811_v61 = vsel %vm799_vm3, %v793_v59, %v810_v58 }
 0x11f   : > { %v654_v32 = vxor.u32 2147483648, %v1867_v38  ;;  %v732_v4 = vsel %vm1676_vm6, 0, %v1675_v39  ;;  %v808_v45 = vsel %vm798_vm5, %v805_v57, %v807_v48  ;;  %v812_v50 = vsel %vm798_vm5, %v809_v44, %v811_v61 }
 0x120   : > { %v658_v51 = vsel %vm656_vm14, %v657_v10, %v1867_v38  ;;  %v733_v14 = vsub.s32 32, %v732_v4  ;;  %v734_v8 = vshll.u32 %v2444_v49, %v732_v4  ;;  %v737_v6 = vsub.s32 4294967266, %v732_v4 }
 0x121   : > { %v655_v52 = vsel %vm653_vm15, %v1865_v43, %v654_v32  ;;  %v2481_v29 = vmul.u32.u64.low %v2431_v60, %v812_v50  ;;  %v2482_v56 = vmul.u32.u64.high %v2431_v60, %v812_v50, %v2481_v29  ;;  %vm880_vm7 = vcmp.gt.s32.totalorder %v879_v13, 0 }
 0x122   : > { %v659_v3 = vsel %vm652_vm0, %v655_v52, %v658_v51  ;;  %v735_v47 = vshrl.u32 %v2427_v54, %v733_v14  ;;  %v738_v12 = vadd.s32 127, %v737_v6  ;;  %v881_v1 = vsel %vm880_vm7, %v879_v13, 0 }
 0x123   : > { %v660_v53 = vsel %vm649_vm1, nan, %v659_v3  ;;  %v2490_v49 = vmul.u32.u64.low %v2431_v60, %v808_v45  ;;  %v2491_v5 = vmul.u32.u64.high %v2431_v60, %v808_v45, %v2490_v49  ;;  %v2494_v59 = vshrl.u32 %v881_v1, 5 }
 0x124   : > { %1392 = vst.msk [vmem:[%s2371_s8 + $0x10] sm:$0xff] %vm1389_vm11, %v660_v53  ;;  %v736_v0 = vor.u32 %v735_v47, %v734_v8  ;;  %v739_v33 = vshll.u32 %v738_v12, 23  ;;  %v883_v41 = vand.u32 31, %v881_v1  ;;  %v2498_v22 = vshll.u32 %v877_v34, 8 }
 0x125   : > { %v754_v54 = vadd.s32 3, %v750_v63  ;;  %v820_v31 = vmul.u32 %v2431_v60, %v804_v40  ;;  %v2502_v55 = vadd.f32 %v2080_v36, %v328_v30  ;;  %v2506_v9 = vadd.f32 %v2442_v46, %v2062_v23 }
 0x126   : > { %v740_v26 = vor.u32 4788187, %v739_v33  ;;  %vm822_vm8 = vc.u32 %v2482_v56, %v2490_v49  ;;  %v884_v19 = vsub.s32 32, %v883_v41  ;;  %vm901_vm9 = vcmp.lt.s32.totalorder %v2494_v59, 1 }
 0x127   : > { %v743_v24 = vcvt.s32.f32 %v736_v0  ;;  %v823_v34 = vadd.s32 1, %v2491_v5  ;;  %v886_v63 = vshll.u32 %v1992_v11, %v883_v41  ;;  %v889_v60 = vshll.u32 %v1993_v15, %v883_v41 }
 0x128   : > { %v741_v36 = vand.u32 2147483647, %v740_v26  ;;  %v887_v30 = vshrl.u32 %v1993_v15, %v884_v19  ;;  %v890_v23 = vshrl.u32 %v1994_v17, %v884_v19  ;;  %v892_v46 = vshll.u32 %v1994_v17, %v883_v41 }
 0x129   : > { %v824_v57 = vsel %vm822_vm8, %v823_v34, %v2491_v5  ;;  %v893_v39 = vshrl.u32 %v1995_v21, %v884_v19  ;;  %v895_v62 = vshll.u32 %v1995_v21, %v883_v41  ;;  %v896_v18 = vshrl.u32 %v1996_v25, %v884_v19 }
 0x12a   : > { %v744_v44 = vmul.f32 %v743_v24, %v741_v36  ;;  %v825_v43 = vadd.s32 %v824_v57, %v820_v31  ;;  %v888_v48 = vor.u32 %v887_v30, %v886_v63  ;;  %v891_v58 = vor.u32 %v890_v23, %v889_v60 }
 0x12b   : > { %v894_v13 = vor.u32 %v893_v39, %v892_v46  ;;  %v897_v38 = vor.u32 %v896_v18, %v895_v62  ;;  %v898_v10 = vshll.u32 %v1996_v25, %v883_v41  ;;  %v899_v40 = vshrl.u32 %v1997_v35, %v884_v19 }
 0x12c   : > { %v745_v61 = vxor.u32 2147483648, %v744_v44  ;;  %v826_v32 = vadd.s32 536870912, %v825_v43  ;;  %vm902_vm10 = vcmp.lt.s32.totalorder %v2494_v59, 2  ;;  %vm904_vm14 = vcmp.lt.s32.totalorder %v2494_v59, 4 }
 0x12d   : > { %v900_v4 = vor.u32 %v899_v40, %v898_v10  ;;  %vm903_vm15 = vcmp.lt.s32.totalorder %v2494_v59, 3  ;;  %v909_v45 = vsel %vm901_vm9, %v888_v48, %v891_v58  ;;  %v910_v50 = vsel %vm904_vm14, %v897_v38, 920167782 }
 0x12e   : > { %v746_v51 = vsel %vm663_vm12, %v745_v61, %v744_v44  ;;  %v827_v14 = vshrl.u32 %v826_v32, 30  ;;  %v885_v8 = vshrl.u32 %v1992_v11, %v884_v19  ;;  %v911_v6 = vsel %vm903_vm15, %v894_v13, %v910_v50 }
 0x12f   : > { %v749_v52 = vsel %vm2422_vm13, %v2180_v16, %v746_v51  ;;  %v906_v29 = vsel %vm904_vm14, %v894_v13, 2102212464  ;;  %v912_v3 = vsel %vm902_vm10, %v909_v45, %v911_v6  ;;  %v913_v47 = vsel %vm901_vm9, %v891_v58, %v894_v13 }
 0x130   : > { %1868 = vcosq.f32 %v749_v52  ;;  %v828_v12 = vshll.u32 %v827_v14, 30  ;;  %v851_v1 = vsub.s32 4, %v827_v14  ;;  %v914_v53 = vsel %vm904_vm14, %v900_v4, 1326507024 }
 0x131   : > { %1870 = vsinq.f32 %v749_v52  ;;  %v915_v42 = vsel %vm903_vm15, %v897_v38, %v914_v53  ;;  %v2549_v5 = vmul.u32.u64.low %v2498_v22, %v912_v3  ;;  %v2550_v0 = vmul.u32.u64.high %v2498_v22, %v912_v3, %v2549_v5 }
 0x132   : > { %v2553_v33 = vsub.s32 %v825_v43, %v828_v12  ;;  %v905_v41 = vsel %vm901_vm9, %v885_v8, %v888_v48  ;;  %v907_v31 = vsel %vm903_vm15, %v891_v58, %v906_v29  ;;  %v916_v26 = vsel %vm902_vm10, %v913_v47, %v915_v42 }
 0x133   : > { %v2562_v19 = vmul.u32.u64.low %v2498_v22, %v916_v26  ;;  %v2563_v24 = vmul.u32.u64.high %v2498_v22, %v916_v26, %v2562_v19  ;;  %v755_v34 = vand.u32 3, %v754_v54  ;;  %vm767_vm12 = vcmp.lt.s32.totalorder %v2293_v20, 0  ;;  %v2578_v54 = vld [vmem:[%s2990_s2] ss:$0 sm:$0xff] }
 0x134   : > { %v831_v63 = vsub.s32 0, %v2553_v33  ;;  %v976_v60 = vand.u32 2139095040, %v2502_v55  ;;  %v852_v36 = vsel %vm767_vm12, %v851_v1, %v827_v14  ;;  %v908_v30 = vsel %vm902_vm10, %v905_v41, %v907_v31 }
 0x135   : > { %v927_v23 = vadd.s32 1, %v2550_v0  ;;  %v973_v46 = vand.u32 2147483647, %v2502_v55  ;;  %v2582_v62 = vadd.f32 %v2578_v54, %v2506_v9  ;;  %vm753_vm13 = vweird.f32 %v2180_v16 }
 0x136   : > { %v1678_v57 = vmin.u32 %v831_v63, %v2553_v33  ;;  %v977_v39 = vshrl.u32 %v976_v60, 23  ;;  %vm2587_vm0 = vcmp.le.f32.partialorder %v765_v2, 0.7853982  ;;  %vm926_vm1 = vc.u32 %v2563_v24, %v2549_v5 }
 0x137   : > { %vm756_vm2 = vcmp.lt.s32.totalorder %v755_v34, 2  ;;  %v854_v44 = vsel %vm2587_vm0, 0, %v852_v36  ;;  %v924_v43 = vmul.u32 %v2498_v22, %v908_v30  ;;  %vm757_vm3 = vcmp.eq.s32.totalorder %v755_v34, 0 }
 0x138   : > { %v833_v18 = vclz %v1678_v57  ;;  %v928_v9 = vsel %vm926_vm1, %v927_v23, %v2550_v0  ;;  %v1685_v48 = vadd.s32 4294967169, %v977_v39  ;;  %v980_v2 = vand.u32 8388607, %v973_v46 }
 0x139   : > { %vm760_vm4 = vcmp.eq.s32.totalorder %v755_v34, 2  ;;  %v929_v38 = vadd.s32 %v928_v9, %v924_v43  ;;  %v1080_v10 = vand.u32 2139095040, %v2582_v62  ;;  %v821_v32 = vadd.s32 %v2490_v49, %v2482_v56 }
 0x13a   : > { %v1869_v58 = vpop.eup %1868  ;;  %v1679_v13 = vadd.s32 4294967294, %v833_v18  ;;  %v858_v4 = vadd.s32 3, %v854_v44  ;;  %v983_v22 = vadd.s32 1, %v1685_v48  ;;  %v981_v6 = vor.u32 8388608, %v980_v2 }
 0x13b   : > { %v1871_v40 = vpop.eup %1870  ;;  %v761_v61 = vxor.u32 2147483648, %v1869_v58  ;;  %v930_v50 = vadd.s32 536870912, %v929_v38  ;;  %v1081_v51 = vshrl.u32 %v1080_v10, 23  ;;  %v1077_v47 = vand.u32 2147483647, %v2582_v62 }
 0x13c   : > { %v758_v45 = vxor.u32 2147483648, %v1871_v40  ;;  %vm1680_vm5 = vcmp.lt.s32.totalorder %v1679_v13, 0  ;;  %vm984_vm6 = vcmp.gt.s32.totalorder %v983_v22, 0  ;;  %v2610_v31 = vand.u32 3, %v858_v4 }
 0x13d   : > { %v762_v14 = vsel %vm760_vm4, %v761_v61, %v1871_v40  ;;  %v836_v8 = vsel %vm1680_vm5, 0, %v1679_v13  ;;  %v931_v49 = vshrl.u32 %v930_v50, 30  ;;  %v985_v1 = vsel %vm984_vm6, %v983_v22, 0 }
 0x13e   : > { %v759_v52 = vsel %vm757_vm3, %v1869_v58, %v758_v45  ;;  %v837_v29 = vsub.s32 32, %v836_v8  ;;  %v841_v3 = vsub.s32 4294967266, %v836_v8  ;;  %v838_v56 = vshll.u32 %v2553_v33, %v836_v8 }
 0x13f   : > { %v763_v12 = vsel %vm756_vm2, %v759_v52, %v762_v14  ;;  %v1689_v41 = vadd.s32 4294967169, %v1081_v51  ;;  %vm871_vm7 = vcmp.lt.s32.totalorder %v2398_v7, 0  ;;  %v932_v26 = vshll.u32 %v931_v49, 30 }
 0x140   : > { %v764_v53 = vsel %vm753_vm13, nan, %v763_v12  ;;  %v839_v42 = vshrl.u32 %v821_v32, %v837_v29  ;;  %v842_v0 = vadd.s32 127, %v841_v3  ;;  %v987_v19 = vand.u32 31, %v985_v1 }
 0x141   : > { %1393 = vst.msk [vmem:[%s2371_s8 + $0x18] sm:$0xff] %vm1389_vm11, %v764_v53  ;;  %v925_v33 = vadd.s32 %v2549_v5, %v2563_v24  ;;  %v2615_v60 = vshll.u32 %v981_v6, 8  ;;  %v2617_v16 = vsub.s32 %v929_v38, %v932_v26  ;;  %v2619_v36 = vshrl.u32 %v985_v1, 5 }
 0x142   : > { %v840_v34 = vor.u32 %v839_v42, %v838_v56  ;;  %v843_v63 = vshll.u32 %v842_v0, 23  ;;  %v988_v30 = vsub.s32 32, %v987_v19  ;;  %v2623_v23 = vand.u32 8388607, %v1077_v47 }
 0x143   : > { %v955_v39 = vsub.s32 4, %v931_v49  ;;  %v990_v18 = vshll.u32 %v1992_v11, %v987_v19  ;;  %v1087_v44 = vadd.s32 1, %v1689_v41  ;;  %vm2628_vm8 = vcmp.le.f32.partialorder %v869_v37, 0.7853982 }
 0x144   : > { %v844_v57 = vor.u32 4788187, %v843_v63  ;;  %v847_v43 = vcvt.s32.f32 %v840_v34  ;;  %v935_v24 = vsub.s32 0, %v2617_v16  ;;  %v991_v9 = vshrl.u32 %v1993_v15, %v988_v30 }
 0x145   : > { %v993_v48 = vshll.u32 %v1993_v15, %v987_v19  ;;  %v994_v58 = vshrl.u32 %v1994_v17, %v988_v30  ;;  %v996_v13 = vshll.u32 %v1994_v17, %v987_v19  ;;  %v997_v38 = vshrl.u32 %v1995_v21, %v988_v30 }
 0x146   : > { %v845_v2 = vand.u32 2147483647, %v844_v57  ;;  %v1682_v10 = vmin.u32 %v935_v24, %v2617_v16  ;;  %v992_v40 = vor.u32 %v991_v9, %v990_v18  ;;  %v999_v37 = vshll.u32 %v1995_v21, %v987_v19 }
 0x147   : > { %vm1005_vm9 = vcmp.lt.s32.totalorder %v2619_v36, 1  ;;  %v995_v32 = vor.u32 %v994_v58, %v993_v48  ;;  %v998_v4 = vor.u32 %v997_v38, %v996_v13  ;;  %v1000_v22 = vshrl.u32 %v1996_v25, %v988_v30  ;;  %v302_v48 = vpop.permute.xlu1 %301 }
 0x148   : > { %v848_v61 = vmul.f32 %v847_v43, %v845_v2  ;;  %v937_v45 = vclz %v1682_v10  ;;  %v956_v50 = vsel %vm871_vm7, %v955_v39, %v931_v49  ;;  %v989_v51 = vshrl.u32 %v1992_v11, %v988_v30 }
 0x149   : > { %vm1006_vm10 = vcmp.lt.s32.totalorder %v2619_v36, 2  ;;  %v1001_v8 = vor.u32 %v1000_v22, %v999_v37  ;;  %v1002_v6 = vshll.u32 %v1996_v25, %v987_v19  ;;  %v1003_v52 = vshrl.u32 %v1997_v35, %v988_v30 }
 0x14a   : > { %v849_v14 = vxor.u32 2147483648, %v848_v61  ;;  %v1683_v29 = vadd.s32 4294967294, %v937_v45  ;;  %vm1007_vm14 = vcmp.lt.s32.totalorder %v2619_v36, 3  ;;  %vm1008_vm15 = vcmp.lt.s32.totalorder %v2619_v36, 4  ;;  %v2695_v36 = vld [vmem:[%s2989_s1 + $0x1] ss:$0 sm:$0xff] }
 0x14b   : > { %v1009_v3 = vsel %vm1005_vm9, %v989_v51, %v992_v40  ;;  %v1004_v56 = vor.u32 %v1003_v52, %v1002_v6  ;;  %v1010_v49 = vsel %vm1008_vm15, %v998_v4, 2102212464  ;;  %v1013_v1 = vsel %vm1005_vm9, %v992_v40, %v995_v32 }
 0x14c   : > { %v850_v12 = vsel %vm767_vm12, %v849_v14, %v848_v61  ;;  %vm1684_vm13 = vcmp.lt.s32.totalorder %v1683_v29, 0  ;;  %v1011_v42 = vsel %vm1007_vm14, %v995_v32, %v1010_v49  ;;  %v1014_v0 = vsel %vm1008_vm15, %v1001_v8, 920167782 }
 0x14d   : > { %v853_v53 = vsel %vm2587_vm0, %v2293_v20, %v850_v12  ;;  %v940_v41 = vsel %vm1684_vm13, 0, %v1683_v29  ;;  %v958_v26 = vsel %vm2628_vm8, 0, %v956_v50  ;;  %v1015_v19 = vsel %vm1007_vm14, %v998_v4, %v1014_v0 }
 0x14e   : > { %1872 = vcosq.f32 %v853_v53  ;;  %v941_v34 = vsub.s32 32, %v940_v41  ;;  %v945_v63 = vsub.s32 4294967266, %v940_v41  ;;  %v1012_v59 = vsel %vm1006_vm10, %v1009_v3, %v1011_v42 }
 0x14f   : > { %1874 = vsinq.f32 %v853_v53  ;;  %v942_v30 = vshll.u32 %v2617_v16, %v940_v41  ;;  %v1016_v57 = vsel %vm1006_vm10, %v1013_v1, %v1015_v19  ;;  %v1017_v39 = vsel %vm1005_vm9, %v995_v32, %v998_v4 }
 0x150   : > { %v1018_v18 = vsel %vm1008_vm15, %v1004_v56, 1326507024  ;;  %v943_v43 = vshrl.u32 %v925_v33, %v941_v34  ;;  %v946_v24 = vadd.s32 127, %v945_v63  ;;  %vm1088_vm12 = vcmp.gt.s32.totalorder %v1087_v44, 0 }
 0x151   : > { %v1019_v9 = vsel %vm1007_vm14, %v1001_v8, %v1018_v18  ;;  %v2683_v16 = vmul.u32.u64.low %v2615_v60, %v1016_v57  ;;  %v2684_v58 = vmul.u32.u64.high %v2615_v60, %v1016_v57, %v2683_v16  ;;  %v1089_v13 = vsel %vm1088_vm12, %v1087_v44, 0 }
 0x152   : > { %v1020_v2 = vsel %vm1006_vm10, %v1017_v39, %v1019_v9  ;;  %v944_v38 = vor.u32 %v943_v43, %v942_v30  ;;  %v947_v10 = vshll.u32 %v946_v24, 23  ;;  %vm860_vm0 = vcmp.lt.s32.totalorder %v2610_v31, 2 }
 0x153   : > { %v2688_v40 = vmul.u32.u64.low %v2615_v60, %v1020_v2  ;;  %v2689_v33 = vmul.u32.u64.high %v2615_v60, %v1020_v2, %v2688_v40  ;;  %v1091_v37 = vand.u32 31, %v1089_v13  ;;  %v320_v61 = vmul.f32 %v2695_v36, %v302_v48 }
 0x154   : > { %vm857_vm1 = vweird.f32 %v2293_v20  ;;  %vm861_vm2 = vcmp.eq.s32.totalorder %v2610_v31, 0  ;;  %vm864_vm3 = vcmp.eq.s32.totalorder %v2610_v31, 2  ;;  %v948_v44 = vor.u32 4788187, %v947_v10 }
 0x155   : > { %v1085_v32 = vor.u32 8388608, %v2623_v23  ;;  %v962_v4 = vadd.s32 3, %v958_v26  ;;  %v1028_v22 = vmul.u32 %v2615_v60, %v1012_v59  ;;  %v1031_v45 = vadd.s32 1, %v2684_v58 }
 0x156   : > { %v1092_v50 = vsub.s32 32, %v1091_v37  ;;  %v949_v51 = vand.u32 2147483647, %v948_v44  ;;  %v951_v14 = vcvt.s32.f32 %v944_v38  ;;  %vm1030_vm4 = vc.u32 %v2689_v33, %v2683_v16 }
 0x157   : > { %v1094_v8 = vshll.u32 %v1992_v11, %v1091_v37  ;;  %v1032_v52 = vsel %vm1030_vm4, %v1031_v45, %v2684_v58  ;;  %v1097_v23 = vshll.u32 %v1993_v15, %v1091_v37  ;;  %v1090_v42 = vshrl.u32 %v1089_v13, 5 }
 0x158   : > { %v1873_v6 = vpop.eup %1872  ;;  %v1095_v29 = vshrl.u32 %v1993_v15, %v1092_v50  ;;  %v1098_v3 = vshrl.u32 %v1994_v17, %v1092_v50  ;;  %v952_v56 = vmul.f32 %v951_v14, %v949_v51  ;;  %v1033_v49 = vadd.s32 %v1032_v52, %v1028_v22 }
 0x159   : > { %v1875_v60 = vpop.eup %1874  ;;  %v865_v12 = vxor.u32 2147483648, %v1873_v6  ;;  %v1101_v1 = vshrl.u32 %v1995_v21, %v1092_v50  ;;  %v1100_v41 = vshll.u32 %v1994_v17, %v1091_v37  ;;  %v1103_v30 = vshll.u32 %v1995_v21, %v1091_v37 }
 0x15a   : > { %v862_v53 = vxor.u32 2147483648, %v1875_v60  ;;  %v1096_v0 = vor.u32 %v1095_v29, %v1094_v8  ;;  %v953_v19 = vxor.u32 2147483648, %v952_v56  ;;  %v1034_v34 = vadd.s32 536870912, %v1033_v49 }
 0x15b   : > { %v866_v26 = vsel %vm864_vm3, %v865_v12, %v1875_v60  ;;  %v1099_v63 = vor.u32 %v1098_v3, %v1097_v23  ;;  %v1104_v57 = vshrl.u32 %v1996_v25, %v1092_v50  ;;  %v1107_v39 = vshrl.u32 %v1997_v35, %v1092_v50 }
 0x15c   : > { %v863_v59 = vsel %vm861_vm2, %v1873_v6, %v862_v53  ;;  %v954_v43 = vsel %vm871_vm7, %v953_v19, %v952_v56  ;;  %v1035_v24 = vshrl.u32 %v1034_v34, 30  ;;  %v1102_v9 = vor.u32 %v1101_v1, %v1100_v41 }
 0x15d   : > { %v867_v18 = vsel %vm860_vm0, %v863_v59, %v866_v26  ;;  %v957_v2 = vsel %vm2628_vm8, %v2398_v7, %v954_v43  ;;  %v1105_v58 = vor.u32 %v1104_v57, %v1103_v30  ;;  %v1106_v13 = vshll.u32 %v1996_v25, %v1091_v37  ;;  %v306_v37 = vpop.permute.xlu0 %305 }
 0x15e   : > { %v868_v48 = vsel %vm857_vm1, nan, %v867_v18  ;;  %1876 = vcosq.f32 %v957_v2  ;;  %v2732_v31 = vand.u32 3, %v962_v4  ;;  %v1036_v38 = vshll.u32 %v1035_v24, 30 }
 0x15f   : > { %1394 = vst.msk [vmem:[%s2371_s8 + $0x20] sm:$0xff] %vm1389_vm11, %v868_v48  ;;  %v2734_v10 = vshll.u32 %v1085_v32, 8  ;;  %1878 = vsinq.f32 %v957_v2  ;;  %v1108_v40 = vor.u32 %v1107_v39, %v1106_v13  ;;  %vm1109_vm5 = vcmp.lt.s32.totalorder %v1090_v42, 1 }
 0x160   : > { %v330_v20 = vadd.f32 %v320_v61, %v2068_v28  ;;  %v2737_v44 = vsub.s32 %v1033_v49, %v1036_v38  ;;  %v1093_v5 = vshrl.u32 %v1992_v11, %v1092_v50  ;;  %vm1112_vm6 = vcmp.lt.s32.totalorder %v1090_v42, 4 }
 0x161   : > { %v1117_v22 = vsel %vm1109_vm5, %v1096_v0, %v1099_v63  ;;  %v1059_v45 = vsub.s32 4, %v1035_v24  ;;  %vm1111_vm7 = vcmp.lt.s32.totalorder %v1090_v42, 3  ;;  %v1114_v51 = vsel %vm1112_vm6, %v1102_v9, 2102212464 }
 0x162   : > { %v1118_v4 = vsel %vm1112_vm6, %v1105_v58, 920167782  ;;  %v1039_v14 = vsub.s32 0, %v2737_v44  ;;  %vm1110_vm8 = vcmp.lt.s32.totalorder %v1090_v42, 2  ;;  %v1121_v8 = vsel %vm1109_vm5, %v1099_v63, %v1102_v9 }
 0x163   : > { %v1119_v32 = vsel %vm1111_vm7, %v1102_v9, %v1118_v4  ;;  %v1113_v6 = vsel %vm1109_vm5, %v1093_v5, %v1096_v0  ;;  %v1122_v28 = vsel %vm1112_vm6, %v1108_v40, 1326507024  ;;  %v321_v61 = vmul.f32 %v2695_v36, %v306_v37 }
 0x164   : > { %v1120_v52 = vsel %vm1110_vm8, %v1117_v22, %v1119_v32  ;;  %v1686_v50 = vmin.u32 %v1039_v14, %v2737_v44  ;;  %v1115_v29 = vsel %vm1111_vm7, %v1099_v63, %v1114_v51  ;;  %v1123_v23 = vsel %vm1111_vm7, %v1105_v58, %v1122_v28 }
 0x165   : > { %v2745_v3 = vadd.f32 %v2578_v54, %v330_v20  ;;  %vm961_vm9 = vweird.f32 %v2398_v7  ;;  %vm975_vm10 = vcmp.lt.s32.totalorder %v2502_v55, 0  ;;  %v1124_v60 = vsel %vm1110_vm8, %v1121_v8, %v1123_v23 }
 0x166   : > { %v2751_v12 = vmul.u32.u64.low %v2734_v10, %v1120_v52  ;;  %v2752_v56 = vmul.u32.u64.high %v2734_v10, %v1120_v52, %v2751_v12  ;;  %vm964_vm14 = vcmp.lt.s32.totalorder %v2732_v31, 2  ;;  %vm2758_vm15 = vcmp.le.f32.partialorder %v973_v46, 0.7853982 }
 0x167   : > { %v1041_v49 = vclz %v1686_v50  ;;  %v1060_v1 = vsel %vm975_vm10, %v1059_v45, %v1035_v24  ;;  %vm965_vm13 = vcmp.eq.s32.totalorder %v2732_v31, 0  ;;  %v1116_v53 = vsel %vm1110_vm8, %v1113_v6, %v1115_v29 }
 0x168   : > { %v2767_v0 = vmul.u32.u64.low %v2734_v10, %v1124_v60  ;;  %v2768_v41 = vmul.u32.u64.high %v2734_v10, %v1124_v60, %v2767_v0  ;;  %v1877_v26 = vpop.eup %1876  ;;  %vm968_vm12 = vcmp.eq.s32.totalorder %v2732_v31, 2  ;;  %v1184_v46 = vand.u32 2139095040, %v2745_v3 }
 0x169   : > { %v1687_v19 = vadd.s32 4294967294, %v1041_v49  ;;  %v331_v34 = vadd.f32 %v321_v61, %v2066_v27  ;;  %v1879_v63 = vpop.eup %1878  ;;  %v969_v59 = vxor.u32 2147483648, %v1877_v26  ;;  %v1029_v30 = vadd.s32 %v2683_v16, %v2689_v33 }
 0x16a   : > { %v1062_v42 = vsel %vm2758_vm15, 0, %v1060_v1  ;;  %v1135_v57 = vadd.s32 1, %v2752_v56  ;;  %v966_v39 = vxor.u32 2147483648, %v1879_v63  ;;  %v1132_v18 = vmul.u32 %v2734_v10, %v1116_v53 }
 0x16b   : > { %vm1688_vm0 = vcmp.lt.s32.totalorder %v1687_v19, 0  ;;  %v1185_v43 = vshrl.u32 %v1184_v46, 23  ;;  %v970_v24 = vsel %vm968_vm12, %v969_v59, %v1879_v63  ;;  %vm1134_vm1 = vc.u32 %v2768_v41, %v2751_v12 }
 0x16c   : > { %v1044_v9 = vsel %vm1688_vm0, 0, %v1687_v19  ;;  %v1181_v27 = vand.u32 2147483647, %v2745_v3  ;;  %v967_v16 = vsel %vm965_vm13, %v1877_v26, %v966_v39  ;;  %v2785_v2 = vadd.f32 %v2578_v54, %v331_v34 }
 0x16d   : > { %v1045_v33 = vsub.s32 32, %v1044_v9  ;;  %v1049_v48 = vsub.s32 4294967266, %v1044_v9  ;;  %v971_v58 = vsel %vm964_vm14, %v967_v16, %v970_v24  ;;  %v1046_v13 = vshll.u32 %v2737_v44, %v1044_v9 }
 0x16e   : > { %v1136_v38 = vsel %vm1134_vm1, %v1135_v57, %v2752_v56  ;;  %v1693_v10 = vadd.s32 4294967169, %v1185_v43  ;;  %v972_v40 = vsel %vm961_vm9, nan, %v971_v58  ;;  %v1066_v4 = vadd.s32 3, %v1062_v42 }
 0x16f   : > { %v1047_v20 = vshrl.u32 %v1029_v30, %v1045_v33  ;;  %v1050_v5 = vadd.s32 127, %v1049_v48  ;;  %v1137_v22 = vadd.s32 %v1136_v38, %v1132_v18  ;;  %1395 = vst.msk [vmem:[%s2371_s8 + $0x28] sm:$0xff] %vm1389_vm11, %v972_v40  ;;  %v1188_v31 = vand.u32 8388607, %v1181_v27 }
 0x170   : > { %v1191_v37 = vadd.s32 1, %v1693_v10  ;;  %v1288_v7 = vand.u32 2139095040, %v2785_v2  ;;  %v2801_v61 = vand.u32 3, %v1066_v4  ;;  %v1133_v48 = vadd.s32 %v2751_v12, %v2768_v41 }
 0x171   : > { %v1048_v45 = vor.u32 %v1047_v20, %v1046_v13  ;;  %v1051_v54 = vshll.u32 %v1050_v5, 23  ;;  %v1138_v51 = vadd.s32 536870912, %v1137_v22  ;;  %v1189_v60 = vor.u32 8388608, %v1188_v31 }
 0x172   : > { %vm1192_vm2 = vcmp.gt.s32.totalorder %v1191_v37, 0  ;;  %v1289_v56 = vshrl.u32 %v1288_v7, 23  ;;  %vm1065_vm8 = vweird.f32 %v2502_v55  ;;  %vm1068_vm9 = vcmp.lt.s32.totalorder %v2801_v61, 2 }
 0x173   : > { %v1052_v44 = vor.u32 4788187, %v1051_v54  ;;  %v2797_v14 = vshrl.u32 %v1138_v51, 30  ;;  %v1193_v32 = vsel %vm1192_vm2, %v1191_v37, 0  ;;  %v1055_v52 = vcvt.s32.f32 %v1048_v45 }
 0x174   : > { %v1195_v8 = vand.u32 31, %v1193_v32  ;;  %v1194_v49 = vshrl.u32 %v1193_v32, 5  ;;  %v1229_v13 = vshll.u32 %v1189_v60, 8  ;;  %v1697_v40 = vadd.s32 4294967169, %v1289_v56 }
 0x175   : > { %v1053_v6 = vand.u32 2147483647, %v1052_v44  ;;  %v1140_v28 = vshll.u32 %v2797_v14, 30  ;;  %vm1079_vm14 = vcmp.lt.s32.totalorder %v2582_v62, 0  ;;  %vm1069_vm12 = vcmp.eq.s32.totalorder %v2801_v61, 0 }
 0x176   : > { %v1196_v50 = vsub.s32 32, %v1195_v8  ;;  %v1198_v1 = vshll.u32 %v1992_v11, %v1195_v8  ;;  %v1201_v46 = vshll.u32 %v1993_v15, %v1195_v8  ;;  %v1204_v59 = vshll.u32 %v1994_v17, %v1195_v8 }
 0x177   : > { %v1056_v29 = vmul.f32 %v1055_v52, %v1053_v6  ;;  %v2803_v23 = vsub.s32 %v1137_v22, %v1140_v28  ;;  %v1207_v30 = vshll.u32 %v1995_v21, %v1195_v8  ;;  %v1210_v43 = vshll.u32 %v1996_v25, %v1195_v8 }
 0x178   : > { %v1199_v53 = vshrl.u32 %v1993_v15, %v1196_v50  ;;  %v1202_v0 = vshrl.u32 %v1994_v17, %v1196_v50  ;;  %v1205_v34 = vshrl.u32 %v1995_v21, %v1196_v50  ;;  %v1208_v42 = vshrl.u32 %v1996_v25, %v1196_v50 }
 0x179   : > { %v1057_v26 = vxor.u32 2147483648, %v1056_v29  ;;  %v1143_v19 = vsub.s32 0, %v2803_v23  ;;  %v1211_v33 = vshrl.u32 %v1997_v35, %v1196_v50  ;;  %v1197_v38 = vshrl.u32 %v1992_v11, %v1196_v50 }
 0x17a   : > { %v1200_v63 = vor.u32 %v1199_v53, %v1198_v1  ;;  %v1203_v18 = vor.u32 %v1202_v0, %v1201_v46  ;;  %v1206_v9 = vor.u32 %v1205_v34, %v1204_v59  ;;  %v1209_v16 = vor.u32 %v1208_v42, %v1207_v30 }
 0x17b   : > { %v1058_v57 = vsel %vm975_vm10, %v1057_v26, %v1056_v29  ;;  %v1690_v39 = vmin.u32 %v1143_v19, %v2803_v23  ;;  %v1212_v10 = vor.u32 %v1211_v33, %v1210_v43  ;;  %vm1213_vm3 = vcmp.lt.s32.totalorder %v1194_v49, 1 }
 0x17c   : > { %v1061_v24 = vsel %vm2758_vm15, %v2502_v55, %v1058_v57  ;;  %vm1215_vm4 = vcmp.lt.s32.totalorder %v1194_v49, 3  ;;  %vm1216_vm5 = vcmp.lt.s32.totalorder %v1194_v49, 4  ;;  %v1221_v5 = vsel %vm1213_vm3, %v1200_v63, %v1203_v18 }
 0x17d   : > { %1880 = vcosq.f32 %v1061_v24  ;;  %v1145_v58 = vclz %v1690_v39  ;;  %v1218_v36 = vsel %vm1216_vm5, %v1206_v9, 2102212464  ;;  %v1222_v22 = vsel %vm1216_vm5, %v1209_v16, 920167782 }
 0x17e   : > { %1882 = vsinq.f32 %v1061_v24  ;;  %v1225_v37 = vsel %vm1213_vm3, %v1203_v18, %v1206_v9  ;;  %vm1214_vm7 = vcmp.lt.s32.totalorder %v1194_v49, 2  ;;  %v1223_v45 = vsel %vm1215_vm4, %v1206_v9, %v1222_v22 }
 0x17f   : > { %v1691_v20 = vadd.s32 4294967294, %v1145_v58  ;;  %v1226_v12 = vsel %vm1216_vm5, %v1212_v10, 1326507024  ;;  %v1217_v54 = vsel %vm1213_vm3, %v1197_v38, %v1200_v63  ;;  %v1224_v51 = vsel %vm1214_vm7, %v1221_v5, %v1223_v45 }
 0x180   : > { %v1227_v4 = vsel %vm1215_vm4, %v1209_v16, %v1226_v12  ;;  %v1219_v32 = vsel %vm1215_vm4, %v1203_v18, %v1218_v36  ;;  %v2834_v52 = vmul.u32.u64.low %v1229_v13, %v1224_v51  ;;  %v2835_v28 = vmul.u32.u64.high %v1229_v13, %v1224_v51, %v2834_v52 }
 0x181   : > { %vm1692_vm6 = vcmp.lt.s32.totalorder %v1691_v20, 0  ;;  %v1228_v7 = vsel %vm1214_vm7, %v1225_v37, %v1227_v4  ;;  %v1295_v56 = vadd.s32 1, %v1697_v40  ;;  %vm1072_vm10 = vcmp.eq.s32.totalorder %v2801_v61, 2 }
 0x182   : > { %v1148_v41 = vsel %vm1692_vm6, 0, %v1691_v20  ;;  %v2831_v8 = vmul.u32.u64.low %v1229_v13, %v1228_v7  ;;  %v2832_v6 = vmul.u32.u64.high %v1229_v13, %v1228_v7, %v2831_v8  ;;  %v1220_v1 = vsel %vm1214_vm7, %v1217_v54, %v1219_v32 }
 0x183   : > { %v1149_v31 = vsub.s32 32, %v1148_v41  ;;  %v1153_v44 = vsub.s32 4294967266, %v1148_v41  ;;  %v1150_v50 = vshll.u32 %v2803_v23, %v1148_v41  ;;  %v1285_v19 = vand.u32 2147483647, %v2785_v2 }
 0x184   : > { %vm1296_vm15 = vcmp.gt.s32.totalorder %v1295_v56, 0  ;;  %v1163_v23 = vsub.s32 4, %v2797_v14  ;;  %vm1238_vm13 = vc.u32 %v2832_v6, %v2834_v52  ;;  %v1239_v63 = vadd.s32 1, %v2835_v28 }
 0x185   : > { %v1151_v29 = vshrl.u32 %v1133_v48, %v1149_v31  ;;  %v1154_v60 = vadd.s32 127, %v1153_v44  ;;  %v1236_v42 = vmul.u32 %v1229_v13, %v1220_v1  ;;  %v1297_v49 = vsel %vm1296_vm15, %v1295_v56, 0 }
 0x186   : > { %v1240_v39 = vsel %vm1238_vm13, %v1239_v63, %v2835_v28  ;;  %v1299_v18 = vand.u32 31, %v1297_v49  ;;  %vm2856_vm0 = vcmp.le.f32.partialorder %v1077_v47, 0.7853982  ;;  %v1292_v58 = vand.u32 8388607, %v1285_v19 }
 0x187   : > { %v1881_v53 = vpop.eup %1880  ;;  %v1152_v0 = vor.u32 %v1151_v29, %v1150_v50  ;;  %v1155_v26 = vshll.u32 %v1154_v60, 23  ;;  %v1241_v16 = vadd.s32 %v1240_v39, %v1236_v42  ;;  %v1164_v40 = vsel %vm1079_vm14, %v1163_v23, %v2797_v14 }
 0x188   : > { %v1883_v46 = vpop.eup %1882  ;;  %v1073_v34 = vxor.u32 2147483648, %v1881_v53  ;;  %v1300_v13 = vsub.s32 32, %v1299_v18  ;;  %v1302_v47 = vshll.u32 %v1992_v11, %v1299_v18  ;;  %v1305_v36 = vshll.u32 %v1993_v15, %v1299_v18 }
 0x189   : > { %v1070_v59 = vxor.u32 2147483648, %v1883_v46  ;;  %v1156_v30 = vor.u32 4788187, %v1155_v26  ;;  %v1159_v9 = vcvt.s32.f32 %v1152_v0  ;;  %v1242_v61 = vadd.s32 536870912, %v1241_v16 }
 0x18a   : > { %v1074_v57 = vsel %vm1072_vm10, %v1073_v34, %v1883_v46  ;;  %v1303_v20 = vshrl.u32 %v1993_v15, %v1300_v13  ;;  %v1306_v5 = vshrl.u32 %v1994_v17, %v1300_v13  ;;  %v1309_v55 = vshrl.u32 %v1995_v21, %v1300_v13 }
 0x18b   : > { %v1071_v43 = vsel %vm1069_vm12, %v1881_v53, %v1070_v59  ;;  %v1157_v24 = vand.u32 2147483647, %v1156_v30  ;;  %v2873_v37 = vshrl.u32 %v1242_v61, 30  ;;  %v1312_v45 = vshrl.u32 %v1996_v25, %v1300_v13 }
 0x18c   : > { %v1075_v33 = vsel %vm1068_vm9, %v1071_v43, %v1074_v57  ;;  %v1166_v14 = vsel %vm2856_vm0, 0, %v1164_v40  ;;  %v1298_v12 = vshrl.u32 %v1297_v49, 5  ;;  %v1308_v41 = vshll.u32 %v1994_v17, %v1299_v18 }
 0x18d   : > { %v1076_v38 = vsel %vm1065_vm8, nan, %v1075_v33  ;;  %v1160_v10 = vmul.f32 %v1159_v9, %v1157_v24  ;;  %v1311_v54 = vshll.u32 %v1995_v21, %v1299_v18  ;;  %v1244_v51 = vshll.u32 %v2873_v37, 30 }
 0x18e   : > { %1396 = vst.msk [vmem:[%s2371_s8 + $0x30] sm:$0xff] %vm1389_vm11, %v1076_v38  ;;  %v1304_v4 = vor.u32 %v1303_v20, %v1302_v47  ;;  %v1307_v31 = vor.u32 %v1306_v5, %v1305_v36  ;;  %v1314_v7 = vshll.u32 %v1996_v25, %v1299_v18  ;;  %v1315_v8 = vshrl.u32 %v1997_v35, %v1300_v13 }
 0x18f   : > { %v1161_v22 = vxor.u32 2147483648, %v1160_v10  ;;  %v1313_v32 = vor.u32 %v1312_v45, %v1311_v54  ;;  %v1245_v17 = vsub.s32 %v1241_v16, %v1244_v51  ;;  %v1310_v28 = vor.u32 %v1309_v55, %v1308_v41 }
 0x190   : > { %v1293_v21 = vor.u32 8388608, %v1292_v58  ;;  %v1316_v50 = vor.u32 %v1315_v8, %v1314_v7  ;;  %v1170_v29 = vadd.s32 3, %v1166_v14  ;;  %vm1317_vm1 = vcmp.lt.s32.totalorder %v1298_v12, 1 }
 0x191   : > { %v1162_v15 = vsel %vm1079_vm14, %v1161_v22, %v1160_v10  ;;  %v1247_v60 = vsub.s32 0, %v1245_v17  ;;  %vm1320_vm2 = vcmp.lt.s32.totalorder %v1298_v12, 4  ;;  %v1301_v56 = vshrl.u32 %v1992_v11, %v1300_v13 }
 0x192   : > { %v1165_v44 = vsel %vm2856_vm0, %v2582_v62, %v1162_v15  ;;  %vm1319_vm3 = vcmp.lt.s32.totalorder %v1298_v12, 3  ;;  %v1325_v1 = vsel %vm1317_vm1, %v1304_v4, %v1307_v31  ;;  %v1326_v53 = vsel %vm1320_vm2, %v1313_v32, 920167782 }
 0x193   : > { %1884 = vcosq.f32 %v1165_v44  ;;  %v1694_v0 = vmin.u32 %v1247_v60, %v1245_v17  ;;  %vm1318_vm4 = vcmp.lt.s32.totalorder %v1298_v12, 2  ;;  %v1322_v25 = vsel %vm1320_vm2, %v1310_v28, 2102212464 }
 0x194   : > { %1886 = vsinq.f32 %v1165_v44  ;;  %v1327_v35 = vsel %vm1319_vm3, %v1310_v28, %v1326_v53  ;;  %v1329_v46 = vsel %vm1317_vm1, %v1307_v31, %v1310_v28  ;;  %v1330_v34 = vsel %vm1320_vm2, %v1316_v50, 1326507024 }
 0x195   : > { %v1328_v26 = vsel %vm1318_vm4, %v1325_v1, %v1327_v35  ;;  %v1333_v23 = vshll.u32 %v1293_v21, 8  ;;  %v1171_v63 = vand.u32 3, %v1170_v29  ;;  %v1249_v59 = vclz %v1694_v0 }
 0x196   : > { %v1321_v30 = vsel %vm1317_vm1, %v1301_v56, %v1304_v4  ;;  %v1323_v42 = vsel %vm1319_vm3, %v1307_v31, %v1322_v25  ;;  %v1331_v11 = vsel %vm1319_vm3, %v1313_v32, %v1330_v34  ;;  %v1237_v10 = vadd.s32 %v2834_v52, %v2832_v6 }
 0x197   : > { %v2894_v49 = vmul.u32.u64.low %v1333_v23, %v1328_v26  ;;  %v2895_v57 = vmul.u32.u64.high %v1333_v23, %v1328_v26, %v2894_v49  ;;  %v1695_v39 = vadd.s32 4294967294, %v1249_v59  ;;  %v1332_v18 = vsel %vm1318_vm4, %v1329_v46, %v1331_v11 }
 0x198   : > { %v2898_v43 = vmul.u32.u64.low %v1333_v23, %v1332_v18  ;;  %v2899_v24 = vmul.u32.u64.high %v1333_v23, %v1332_v18, %v2898_v43  ;;  %vm1172_vm5 = vcmp.lt.s32.totalorder %v1171_v63, 2  ;;  %vm1173_vm6 = vcmp.eq.s32.totalorder %v1171_v63, 0 }
 0x199   : > { %vm1696_vm7 = vcmp.lt.s32.totalorder %v1695_v39, 0  ;;  %v1324_v16 = vsel %vm1318_vm4, %v1321_v30, %v1323_v42  ;;  %vm1176_vm8 = vcmp.eq.s32.totalorder %v1171_v63, 2  ;;  %v1343_v13 = vadd.s32 1, %v2895_v57 }
 0x19a   : > { %v1252_v58 = vsel %vm1696_vm7, 0, %v1695_v39  ;;  %v1340_v36 = vmul.u32 %v1333_v23, %v1324_v16  ;;  %vm1342_vm9 = vc.u32 %v2899_v24, %v2894_v49  ;;  %vm1169_vm10 = vweird.f32 %v2582_v62 }
 0x19b   : > { %v1253_v40 = vsub.s32 32, %v1252_v58  ;;  %v1257_v61 = vsub.s32 4294967266, %v1252_v58  ;;  %v1254_v20 = vshll.u32 %v1245_v17, %v1252_v58  ;;  %v1344_v45 = vsel %vm1342_vm9, %v1343_v13, %v2895_v57 }
 0x19c   : > { %v1345_v12 = vadd.s32 %v1344_v45, %v1340_v36  ;;  %v1267_v7 = vsub.s32 4, %v2873_v37  ;;  %vm1183_vm14 = vcmp.lt.s32.totalorder %v2745_v3, 0  ;;  %vm1182_vm15 = vcmp.le.f32.partialorder %v1181_v27, 0.7853982 }
 0x19d   : > { %v1885_v9 = vpop.eup %1884  ;;  %v1255_v22 = vshrl.u32 %v1237_v10, %v1253_v40  ;;  %v1258_v55 = vadd.s32 127, %v1257_v61  ;;  %v1341_v25 = vadd.s32 %v2894_v49, %v2899_v24  ;;  %vm1273_vm2 = vweird.f32 %v2745_v3 }
 0x19e   : > { %v1887_v33 = vpop.eup %1886  ;;  %v1177_v48 = vxor.u32 2147483648, %v1885_v9  ;;  %v1346_v54 = vadd.s32 536870912, %v1345_v12  ;;  %v1268_v21 = vsel %vm1183_vm14, %v1267_v7, %v2873_v37  ;;  %vm1287_vm3 = vcmp.lt.s32.totalorder %v2785_v2, 0 }
 0x19f   : > { %v1174_v38 = vxor.u32 2147483648, %v1887_v33  ;;  %v1256_v52 = vor.u32 %v1255_v22, %v1254_v20  ;;  %v1259_v41 = vshll.u32 %v1258_v55, 23  ;;  %v1270_v60 = vsel %vm1182_vm15, 0, %v1268_v21 }
 0x1a0   : > { %v1178_v47 = vsel %vm1176_vm8, %v1177_v48, %v1887_v33  ;;  %v1347_v51 = vshrl.u32 %v1346_v54, 30  ;;  %v1274_v53 = vadd.s32 3, %v1270_v60  ;;  %vm1286_vm4 = vcmp.le.f32.partialorder %v1285_v19, 0.7853982 }
 0x1a1   : > { %v1175_v5 = vsel %vm1173_vm6, %v1885_v9, %v1174_v38  ;;  %v1260_v15 = vor.u32 4788187, %v1259_v41  ;;  %v1263_v31 = vcvt.s32.f32 %v1256_v52  ;;  %vm1377_vm8 = vweird.f32 %v2785_v2 }
 0x1a2   : > { %v1179_v14 = vsel %vm1172_vm5, %v1175_v5, %v1178_v47  ;;  %v1348_v44 = vshll.u32 %v1347_v51, 30  ;;  %v1275_v46 = vand.u32 3, %v1274_v53  ;;  %v1371_v33 = vsub.s32 4, %v1347_v51 }
 0x1a3   : > { %v1180_v6 = vsel %vm1169_vm10, nan, %v1179_v14  ;;  %v1261_v4 = vand.u32 2147483647, %v1260_v15 }
 0x1a4   : > { %1397 = vst.msk [vmem:[%s2371_s8 + $0x38] sm:$0xff] %vm1389_vm11, %v1180_v6  ;;  %v1349_v8 = vsub.s32 %v1345_v12, %v1348_v44  ;;  %vm1280_vm12 = vcmp.eq.s32.totalorder %v1275_v46, 2  ;;  %vm1277_vm0 = vcmp.eq.s32.totalorder %v1275_v46, 0  ;;  %vm1276_vm1 = vcmp.lt.s32.totalorder %v1275_v46, 2 }
 0x1a5   : > { %v1264_v32 = vmul.f32 %v1263_v31, %v1261_v4  ;;  %v1372_v13 = vsel %vm1287_vm3, %v1371_v33, %v1347_v51 }
 0x1a6   : > { %v1351_v62 = vsub.s32 0, %v1349_v8 }
 0x1a7   : > { %v1265_v17 = vxor.u32 2147483648, %v1264_v32 }
 0x1a8   : > { %v1698_v29 = vmin.u32 %v1351_v62, %v1349_v8 }
 0x1a9   : > { %v1266_v28 = vsel %vm1183_vm14, %v1265_v17, %v1264_v32 }
 0x1aa   : > { %v1269_v50 = vsel %vm1182_vm15, %v2745_v3, %v1266_v28  ;;  %v1353_v56 = vclz %v1698_v29  ;;  %v1374_v3 = vsel %vm1286_vm4, 0, %v1372_v13 }
 0x1ab   : > { %1888 = vcosq.f32 %v1269_v50  ;;  %v1378_v10 = vadd.s32 3, %v1374_v3 }
 0x1ac   : > { %1890 = vsinq.f32 %v1269_v50  ;;  %v1699_v1 = vadd.s32 4294967294, %v1353_v56 }
 0x1ad   : > { %v1379_v40 = vand.u32 3, %v1378_v10 }
 0x1ae   : > { %vm1700_vm13 = vcmp.lt.s32.totalorder %v1699_v1, 0 }
 0x1af   : > { %v1356_v0 = vsel %vm1700_vm13, 0, %v1699_v1  ;;  %vm1384_vm5 = vcmp.eq.s32.totalorder %v1379_v40, 2  ;;  %vm1381_vm6 = vcmp.eq.s32.totalorder %v1379_v40, 0  ;;  %vm1380_vm7 = vcmp.lt.s32.totalorder %v1379_v40, 2 }
 0x1b0   : > { %v1357_v35 = vsub.s32 32, %v1356_v0  ;;  %v1361_v26 = vsub.s32 4294967266, %v1356_v0  ;;  %v1358_v27 = vshll.u32 %v1349_v8, %v1356_v0 }
 0x1b2   : > { %v1359_v34 = vshrl.u32 %v1341_v25, %v1357_v35  ;;  %v1362_v23 = vadd.s32 127, %v1361_v26 }
 0x1b4   : > { %v1360_v30 = vor.u32 %v1359_v34, %v1358_v27  ;;  %v1363_v42 = vshll.u32 %v1362_v23, 23 }
 0x1b5   : > { %v1889_v37 = vpop.eup %1888 }
 0x1b6   : > { %v1891_v63 = vpop.eup %1890  ;;  %v1281_v59 = vxor.u32 2147483648, %v1889_v37  ;;  %v1364_v39 = vor.u32 4788187, %v1363_v42  ;;  %v1367_v24 = vcvt.s32.f32 %v1360_v30 }
 0x1b7   : > { %v1278_v11 = vxor.u32 2147483648, %v1891_v63 }
 0x1b8   : > { %v1282_v57 = vsel %vm1280_vm12, %v1281_v59, %v1891_v63  ;;  %v1365_v43 = vand.u32 2147483647, %v1364_v39 }
 0x1b9   : > { %v1279_v18 = vsel %vm1277_vm0, %v1889_v37, %v1278_v11 }
 0x1ba   : > { %v1283_v49 = vsel %vm1276_vm1, %v1279_v18, %v1282_v57  ;;  %v1368_v16 = vmul.f32 %v1367_v24, %v1365_v43 }
 0x1bb   : > { %v1284_v9 = vsel %vm1273_vm2, nan, %v1283_v49 }
 0x1bc   : > { %1398 = vst.msk [vmem:[%s2371_s8 + $0x40] sm:$0xff] %vm1389_vm11, %v1284_v9  ;;  %v1369_v48 = vxor.u32 2147483648, %v1368_v16 }
 0x1be   : > { %v1370_v58 = vsel %vm1287_vm3, %v1369_v48, %v1368_v16 }
 0x1bf   : > { %v1373_v38 = vsel %vm1286_vm4, %v2785_v2, %v1370_v58 }
 0x1c0   : > { %1892 = vcosq.f32 %v1373_v38 }
 0x1c1   : > { %1894 = vsinq.f32 %v1373_v38 }
 0x1ca   : > { %v1893_v61 = vpop.eup %1892 }
 0x1cb   : > { %v1895_v47 = vpop.eup %1894  ;;  %v1385_v20 = vxor.u32 2147483648, %v1893_v61  ;;  %1406 = sbr.rel (!%p2043_p4) target bundleno = 527 (0x20f), region = 36 }
 0x1cc   : > { %v1382_v36 = vxor.u32 2147483648, %v1895_v47 }
 0x1cd   : > { %v1386_v5 = vsel %vm1384_vm5, %v1385_v20, %v1895_v47 }
 0x1ce   : > { %v1383_v22 = vsel %vm1381_vm6, %v1893_v61, %v1382_v36 }
 0x1cf   : > { %v1387_v19 = vsel %vm1380_vm7, %v1383_v22, %v1386_v5 }
 0x1d0   : > { %v1388_v55 = vsel %vm1377_vm8, nan, %v1387_v19 }
 0x1d1   : > { %1399 = vst.msk [vmem:[%s2371_s8 + $0x48] sm:$0xff] %vm1389_vm11, %v1388_v55 }
 0x1d2   : > { %s3016_s14 = smov (!%p1409_p8, %s1408_s14), 10 }
 0x1d3   : > { %s1701_s24 = sshll.u32 %s3016_s14, 7 }
 0x1d4   : > { %p1704_p9 = scmp.eq.s32.totalorder %s1701_s24, 0 }
 0x1d5   : > { %1898 = sdivrem.u32 (!%p1704_p9), %s3016_s14, 10 }
 0x1d6   : > { %1417 = sbr.rel (%p1704_p9) target bundleno = 527 (0x20f), region = 40 }
 0x1de   : > { %s2942_s20 = spop.drf %1898 }
 0x1df   : > { %p1705_p10 = scmp.le.s32.totalorder %s2942_s20, 0 }
 0x1e0   : > { %s3009_s15 = smov (!%p1705_p10), %s2936_s23  ;;  %s3010_s21 = smov (!%p1705_p10), %s2371_s8 }
 0x1e1   : > { %1609 = sbr.rel (%p1705_p10) target bundleno = 498 (0x1f2), region = 116  ;;  %s2951_s25 = smov (!%p1705_p10), 0  }
 0x1e2   : > { %s2953_s26 = smov (!%p1705_p10), 0  }
 0x1e8 LB: >> { %v1499_v2 = vld [vmem:[%s1964_s21] sm:$0xff]  ;;  %v1501_v45 = vld [vmem:[%s1964_s21 + $0x8] sm:$0xff]  ;;  %v1503_v14 = vld [vmem:[%s1964_s21 + $0x10] sm:$0xff]  ;;  %s1519_s27 = sadd.s32 1, %s1968_s25  ;;  %s1493_s26 = sadd.s32 1, %s1972_s26   ;;  %s1972_s26 = sphi %s2953_s26, %s1493_s26   ;;  %s1968_s25 = sphi %s2951_s25, %s3011_s25   ;;  %s1964_s21 = sphi %s3010_s21, %s1524_s21   ;;  %s1960_s15 = sphi %s3009_s15, %s1525_s15  }
 0x1e9   : >> { %1500 = vst [vmem:[%s1960_s15] sm:$0xff] %v1499_v2  ;;  %1502 = vst [vmem:[%s1960_s15 + $0x8] sm:$0xff] %v1501_v45  ;;  %v1505_v12 = vld [vmem:[%s1964_s21 + $0x18] sm:$0xff]  ;;  %v1507_v6 = vld [vmem:[%s1964_s21 + $0x20] sm:$0xff]  ;;  %p1520_p11 = scmp.ge.s32.totalorder %s1519_s27, %s2942_s20  ;;  %p1492_p12 = scmp.ge.s32.totalorder %s1493_s26, %s2942_s20 }
 0x1ea   : >> { %1504 = vst [vmem:[%s1960_s15 + $0x10] sm:$0xff] %v1503_v14  ;;  %v1509_v52 = vld [vmem:[%s1964_s21 + $0x28] sm:$0xff]  ;;  %1506 = vst [vmem:[%s1960_s15 + $0x18] sm:$0xff] %v1505_v12  ;;  %v1511_v41 = vld [vmem:[%s1964_s21 + $0x30] sm:$0xff] }
 0x1eb   : >> { %1508 = vst [vmem:[%s1960_s15 + $0x20] sm:$0xff] %v1507_v6  ;;  %1510 = vst [vmem:[%s1960_s15 + $0x28] sm:$0xff] %v1509_v52  ;;  %v1513_v54 = vld [vmem:[%s1964_s21 + $0x38] sm:$0xff]  ;;  %v1515_v15 = vld [vmem:[%s1964_s21 + $0x40] sm:$0xff]  ;;  %s3018_s27 = smov (%p1520_p11, %s1519_s27), 0  ;;  %1495 = sbr.rel (!%p1492_p12) target bundleno = 488 (0x1e8), region = 122 }
 0x1ec   : >> { %1512 = vst [vmem:[%s1960_s15 + $0x30] sm:$0xff] %v1511_v41  ;;  %1514 = vst [vmem:[%s1960_s15 + $0x38] sm:$0xff] %v1513_v54  ;;  %v1517_v51 = vld [vmem:[%s1964_s21 + $0x48] sm:$0xff]  ;;  %s1522_s28 = smul.u32 80, %s3018_s27  ;;  %s3011_s25 = smov %s3018_s27 }
 0x1ed   : >> { %1516 = vst [vmem:[%s1960_s15 + $0x40] sm:$0xff] %v1515_v15  ;;  %1518 = vst [vmem:[%s1960_s15 + $0x48] sm:$0xff] %v1517_v51 }
 0x1ee   : >> { %s1524_s21 = scalar_lea.vmem %s2371_s8, %s1522_s28 [#allocation2]   ;;  %s1525_s15 = scalar_lea.vmem %s2936_s23, %s1522_s28  }
 0x1f2 PF: > { %1900 = sdivrem.u32 %s3016_s14, 10 }
 0x1f3   : > { %s1706_s29 = smul.u32 80, %s2942_s20 }
 0x1f5   : > { %s1530_s30 = scalar_lea.vmem %s2371_s8, %s1706_s29 [#allocation2]   ;;  %s1532_s4 = scalar_lea.vmem %s2936_s23, %s1706_s29  }
 0x1fb   : > { %s1901_s5 = spop.drf %1900 }
 0x1fc   : > { %p1708_p13 = scmp.le.s32.totalorder %s1901_s5, 0 }
 0x1fd   : > { %s1974_s6 = smov (!%p1708_p13), %s1532_s4   ;;  %s1978_s7 = smov (!%p1708_p13), %s1530_s30  }
 0x1fe   : > { %1623 = sbr.rel (%p1708_p13) target bundleno = 527 (0x20f), region = 127  ;;  %s1982_s9 = smov (!%p1708_p13), 0  }
 0x1ff   : > { %s1986_s10 = smov (!%p1708_p13), 0  }
 0x205 LB: >> { %v1542_v4 = vld [vmem:[%s1980_s7] sm:$0xff]  ;;  %s1544_s11 = sadd.s32 1, %s1984_s9  ;;  %s1536_s10 = sadd.s32 1, %s1988_s10   ;;  %s1988_s10 = sphi %s1986_s10, %s1536_s10   ;;  %s1984_s9 = sphi %s1982_s9, %s1983_s9   ;;  %s1980_s7 = sphi %s1978_s7, %s1549_s7   ;;  %s1976_s6 = sphi %s1974_s6, %s1550_s6  }
 0x206   : >> { %1543 = vst [vmem:[%s1976_s6] sm:$0xff] %v1542_v4  ;;  %p1545_p0 = scmp.ge.s32.totalorder %s1544_s11, %s1901_s5  ;;  %p1535_p1 = scmp.ge.s32.totalorder %s1536_s10, %s1901_s5 }
 0x208   : >> { %s3020_s11 = smov (%p1545_p0, %s1544_s11), 0  ;;  %1538 = sbr.rel (!%p1535_p1) target bundleno = 517 (0x205), region = 133 }
 0x209   : >> { %s1709_s8 = sshll.u32 %s3020_s11, 3  ;;  %s1983_s9 = smov %s3020_s11  }
 0x20a   : >> { %s1549_s7 = scalar_lea.vmem %s1530_s30, %s1709_s8 [#allocation2]   ;;  %s1550_s6 = scalar_lea.vmem %s1532_s4, %s1709_s8  }
 0x20f PF: > { %p10_p2 = scmp.ge.s32.totalorder %s2033_s16, 6   ;;  %s3012_s12 = smov %s1952_s13 }
 0x210   : > { %s3013_s13 = smov %s2041_s19  ;;  %s3014_s14 = smov %s2033_s16 }
 0x211   :  { %12 = sbr.rel (!%p10_p2) target bundleno = 2 (0x2), region = 144 }

// kernel: tpu_custom_call.1
= control target key start
LH: loop header
LB: loop body
LE: loop exit
PB: predicated region body
PF: predicated region fallthrough
CT: control target
= control target key end

     0   :  { %s2018_s12 = smov 0   ;;  %s2020_s13 = smov 0   ;;  %s2988_s0 = inlined_call_operand.vmem [shape: f32[300,2], index: 0, kind: input, shape index: {}]   ;;  %s2989_s1 = inlined_call_operand.vmem [shape: f32[2,64], index: 1, kind: input, shape index: {}]   ;;  %s2990_s2 = inlined_call_operand.vmem [shape: f32[1,64], index: 2, kind: input, shape index: {}]   ;;  %s2991_s3 = inlined_call_operand.vmem [shape: f32[300,64], index: 3, kind: output, shape index: {}]  }
   0x1   :  { %s2022_s14 = smov 0  }
   0x2 LB: > { %s2031_s15 = sadd.s32 4294967295, %s1956_s14   ;;  %s2033_s16 = sadd.s32 1, %s1956_s14   ;;  %s1956_s14 = sphi %s2022_s14, %s3014_s14   ;;  %s1952_s13 = sphi %s2020_s13, %s3013_s13   ;;  %s1948_s12 = sphi %s2018_s12, %s3012_s12  }
   0x3   : > { %s85_s17 = ssub.s32 %s1956_s14, %s2033_s16  ;;  %s88_s18 = sadd.s32 1, %s1952_s13 }
   0x4   : > { %p86_p0 = scmp.eq.s32.totalorder %s85_s17, 0  ;;  %p98_p1 = scmp.ne.s32.totalorder %s1952_s13, %s1948_s12 }
   0x5   : > { %p99_p2 = scmp.eq.s32.totalorder %s2031_s15, 3  ;;  %p1656_p3 = scmp.ge.s32.totalorder %s1956_s14, 1 }
   0x6   : > { %s2041_s19 = scalar_select %p86_p0, %s1952_s13, %s88_s18  }
   0x7   : > { %p2043_p4 = por %p99_p2, %p98_p1  ;;  %p146_p5 = scmp.lt.s32.totalorder %s1956_s14, 5 }
   0x9   : > { %p147_p6 = pnand %p1656_p3, %p146_p5 }
   0xa   : > { %s2048_s21 = smul.u32 (!%p147_p6), 10, %s2031_s15  ;;  %v1990_v0 = vmov (!%p147_p6), 0   ;;  %v1991_v11 = vmov (!%p147_p6), 1   ;;  %v1658_v16 = vld [vmem:[%s2989_s1] ss:$0 sm:$0xff] (!%p147_p6)  ;;  %s170_s6 = sand.u32 (!%p147_p6), 1, %s1948_s12  }
   0xb   : > { %150 = sbr.rel (%p147_p6) target bundleno = 527 (0x20f), region = 32  ;;  %1853 = vset.pattern.permute.xlu1 (!%p147_p6), %v1990_v0  ;;  %1852 = vset.pattern.permute.xlu0 (!%p147_p6), %v1990_v0  ;;  %v2073_v29 = vld [vmem:[%s2989_s1 + $0x1] ss:$0 sm:$0xff] (!%p147_p6)  ;;  %v2080_v36 = vld [vmem:[%s2990_s2] ss:$0 sm:$0xff] (!%p147_p6) }
   0xc   : > { %p178_p7 = scmp.lt.s32.totalorder (!%p147_p6), %s2048_s21, 37  ;;  %s2333_s7 = smul.u32 (!%p147_p6), 80, %s170_s6 }
   0xe   : > { %s2371_s8 = scalar_lea.vmem (!%p147_p6), [#allocation2], %s2333_s7  }
  0x12   : > { %s179_s22 = scalar_select %p178_p7, %s2048_s21, 37 }
  0x13   : > { %s1408_s14 = ssub.s32 (%p2043_p4), 38, %s2048_s21  ;;  %s1713_s17 = smul.u32 (%p2043_p4), 80, %s2031_s15 }
  0x14   : > { %s1657_s23 = sshll.u32 %s179_s22, 3  ;;  %p1409_p8 = scmp.lt.s32.totalorder (%p2043_p4), %s1408_s14, 10 }
  0x15   : > { %s181_s26 = scalar_lea.vmem %s2988_s0, %s1657_s23  ;;  %s2936_s23 = scalar_lea.vmem (%p2043_p4), %s2991_s3, %s1713_s17  }
  0x16   : > { %v194_v1 = vld [vmem:[%s181_s26 + $0x10] sm:$0xff]  ;;  %v192_v2 = vld [vmem:[%s181_s26] sm:$0xff]  ;;  %v195_v3 = vld [vmem:[%s181_s26 + $0x18] sm:$0xff] }
  0x17   : > { %215 = vperm.xlu1 %1853, %v194_v1   ;;  %205 = vperm.xlu0 %1852, %v192_v2   ;;  %v193_v4 = vld [vmem:[%s181_s26 + $0x8] sm:$0xff]  ;;  %v196_v6 = vld [vmem:[%s181_s26 + $0x20] sm:$0xff]  ;;  %v199_v7 = vld [vmem:[%s181_s26 + $0x38] sm:$0xff] }
  0x18   : > { %v197_v5 = vld [vmem:[%s181_s26 + $0x28] sm:$0xff]  ;;  %v198_v8 = vld [vmem:[%s181_s26 + $0x30] sm:$0xff]  ;;  %v200_v10 = vld [vmem:[%s181_s26 + $0x40] sm:$0xff] }
  0x19   : > { %v201_v9 = vld [vmem:[%s181_s26 + $0x48] sm:$0xff] }
  0x1b   : > { %220 = vperm.xlu1 %1853, %v195_v3   ;;  %210 = vperm.xlu0 %1852, %v193_v4  }
  0x1f   : > { %230 = vperm.xlu1 %1853, %v197_v5   ;;  %225 = vperm.xlu0 %1852, %v196_v6  }
  0x23   : > { %240 = vperm.xlu1 %1853, %v199_v7   ;;  %235 = vperm.xlu0 %1852, %v198_v8  }
  0x27   : > { %250 = vperm.xlu1 %1853, %v201_v9   ;;  %245 = vperm.xlu0 %1852, %v200_v10  }
  0x2b   : > { %1855 = vset.pattern.permute.xlu1 %v1991_v11  ;;  %1854 = vset.pattern.permute.xlu0 %v1991_v11  ;;  %v1992_v11 = vmov 683565275  }
  0x2c   : > { %273 = vperm.xlu1 %1855, %v193_v4   ;;  %269 = vperm.xlu0 %1854, %v192_v2  }
  0x30   : > { %277 = vperm.xlu1 %1855, %v194_v1   ;;  %281 = vperm.xlu0 %1854, %v195_v3  }
  0x34   : > { %285 = vperm.xlu1 %1855, %v196_v6   ;;  %289 = vperm.xlu0 %1854, %v197_v5  }
  0x38   : > { %293 = vperm.xlu1 %1855, %v198_v8   ;;  %297 = vperm.xlu0 %1854, %v199_v7  }
  0x3c   : > { %301 = vperm.xlu1 %1855, %v200_v10   ;;  %305 = vperm.xlu0 %1854, %v201_v9  }
  0x96   : > { %v216_v12 = vpop.permute.xlu1 %215  ;;  %v206_v13 = vpop.permute.xlu0 %205 }
  0x97   : > { %v257_v32 = vmul.f32 %v1658_v16, %v206_v13  ;;  %v259_v43 = vmul.f32 %v1658_v16, %v216_v12 }
  0x9a   : > { %v221_v14 = vpop.permute.xlu1 %220  ;;  %v211_v15 = vpop.permute.xlu0 %210 }
  0x9b   : > { %v258_v33 = vmul.f32 %v1658_v16, %v211_v15  ;;  %v260_v63 = vmul.f32 %v1658_v16, %v221_v14  ;;  %v1993_v15 = vmov 2475754826  }
  0x9e   : > { %v231_v17 = vpop.permute.xlu1 %230  ;;  %v226_v18 = vpop.permute.xlu0 %225 }
  0x9f   : > { %v2058_v19 = vmul.f32 %v1658_v16, %v231_v17  ;;  %v2060_v20 = vmul.f32 %v1658_v16, %v226_v18  ;;  %v1994_v17 = vmov 2131351028  }
  0xa2   : > { %v241_v21 = vpop.permute.xlu1 %240  ;;  %v236_v22 = vpop.permute.xlu0 %235 }
  0xa3   : > { %v2062_v23 = vmul.f32 %v1658_v16, %v241_v21  ;;  %v2064_v24 = vmul.f32 %v1658_v16, %v236_v22  ;;  %v1995_v21 = vmov 2102212464  }
  0xa6   : > { %v251_v25 = vpop.permute.xlu1 %250  ;;  %v246_v26 = vpop.permute.xlu0 %245 }
  0xa7   : > { %v2066_v27 = vmul.f32 %v1658_v16, %v251_v25  ;;  %v2068_v28 = vmul.f32 %v1658_v16, %v246_v26  ;;  %v1996_v25 = vmov 920167782  }
  0xab   : > { %v274_v30 = vpop.permute.xlu1 %273  ;;  %v270_v31 = vpop.permute.xlu0 %269 }
  0xac   : > { %v313_v34 = vmul.f32 %v2073_v29, %v274_v30  ;;  %v312_v35 = vmul.f32 %v2073_v29, %v270_v31 }
  0xae   : > { %v323_v37 = vadd.f32 %v313_v34, %v258_v33  ;;  %v322_v38 = vadd.f32 %v312_v35, %v257_v32  ;;  %v1997_v35 = vmov 1326507024  }
  0xaf   : > { %v278_v39 = vpop.permute.xlu1 %277  ;;  %v282_v53 = vpop.permute.xlu0 %281 }
  0xb0   : > { %v2083_v40 = vadd.f32 %v2080_v36, %v323_v37  ;;  %v2086_v41 = vadd.f32 %v2080_v36, %v322_v38  ;;  %v314_v42 = vmul.f32 %v2073_v29, %v278_v39  ;;  %v315_v58 = vmul.f32 %v2073_v29, %v282_v53 }
  0xb2   : > { %v453_v44 = vand.u32 2147483647, %v2083_v40  ;;  %v456_v45 = vand.u32 2139095040, %v2083_v40  ;;  %v349_v46 = vand.u32 2147483647, %v2086_v41  ;;  %v352_v47 = vand.u32 2139095040, %v2086_v41 }
  0xb3   : > { %v324_v49 = vadd.f32 %v314_v42, %v259_v43  ;;  %v2102_v5 = vadd.f32 %v315_v58, %v260_v63  ;;  %vm455_vm13 = vcmp.lt.s32.totalorder %v2083_v40, 0  ;;  %vm351_vm15 = vcmp.lt.s32.totalorder %v2086_v41, 0 }
  0xb4   : > { %v457_v48 = vshrl.u32 %v456_v45, 23  ;;  %v460_v50 = vand.u32 8388607, %v453_v44  ;;  %v353_v51 = vshrl.u32 %v352_v47, 23  ;;  %v356_v52 = vand.u32 8388607, %v349_v46 }
  0xb5   : > { %v2098_v55 = vadd.f32 %v2080_v36, %v324_v49  ;;  %vm2191_vm14 = vcmp.le.f32.partialorder %v453_v44, 0.7853982 }
  0xb6   : > { %v1665_v54 = vadd.s32 4294967169, %v457_v48  ;;  %v1661_v56 = vadd.s32 4294967169, %v353_v51  ;;  %v461_v59 = vor.u32 8388608, %v460_v50  ;;  %v357_v60 = vor.u32 8388608, %v356_v52 }
  0xb7   : > { %v560_v62 = vand.u32 2139095040, %v2098_v55  ;;  %v557_v9 = vand.u32 2147483647, %v2098_v55 }
  0xb8   : > { %v463_v57 = vadd.s32 1, %v1665_v54  ;;  %v359_v61 = vadd.s32 1, %v1661_v56  ;;  %v2104_v6 = vshll.u32 %v461_v59, 8  ;;  %v2108_v8 = vshll.u32 %v357_v60, 8 }
  0xb9   : > { %v561_v1 = vshrl.u32 %v560_v62, 23 }
  0xba   : > { %vm464_vm0 = vcmp.gt.s32.totalorder %v463_v57, 0  ;;  %vm360_vm1 = vcmp.gt.s32.totalorder %v359_v61, 0 }
  0xbb   : > { %v465_v0 = vsel %vm464_vm0, %v463_v57, 0  ;;  %v361_v4 = vsel %vm360_vm1, %v359_v61, 0  ;;  %v2112_v14 = vadd.s32 4294967169, %v561_v1 }
  0xbc   : > { %v466_v2 = vshrl.u32 %v465_v0, 5  ;;  %v467_v3 = vand.u32 31, %v465_v0  ;;  %v2106_v7 = vshrl.u32 %v361_v4, 5  ;;  %v363_v13 = vand.u32 31, %v361_v4 }
  0xbe   : > { %v468_v10 = vsub.s32 32, %v467_v3  ;;  %v470_v12 = vshll.u32 %v1992_v11, %v467_v3  ;;  %v473_v16 = vshll.u32 %v1993_v15, %v467_v3  ;;  %v476_v18 = vshll.u32 %v1994_v17, %v467_v3 }
  0xbf   : > { %v479_v22 = vshll.u32 %v1995_v21, %v467_v3  ;;  %v482_v26 = vshll.u32 %v1996_v25, %v467_v3  ;;  %vm485_vm2 = vcmp.lt.s32.totalorder %v466_v2, 1  ;;  %vm486_vm3 = vcmp.lt.s32.totalorder %v466_v2, 2 }
  0xc0   : > { %v471_v30 = vshrl.u32 %v1993_v15, %v468_v10  ;;  %v474_v31 = vshrl.u32 %v1994_v17, %v468_v10  ;;  %v477_v32 = vshrl.u32 %v1995_v21, %v468_v10  ;;  %v469_v33 = vshrl.u32 %v1992_v11, %v468_v10 }
  0xc1   : > { %v480_v34 = vshrl.u32 %v1996_v25, %v468_v10  ;;  %v483_v37 = vshrl.u32 %v1997_v35, %v468_v10  ;;  %v364_v43 = vsub.s32 32, %v363_v13  ;;  %vm487_vm4 = vcmp.lt.s32.totalorder %v466_v2, 3 }
  0xc2   : > { %v472_v38 = vor.u32 %v471_v30, %v470_v12  ;;  %v475_v39 = vor.u32 %v474_v31, %v473_v16  ;;  %v478_v42 = vor.u32 %v477_v32, %v476_v18  ;;  %vm488_vm5 = vcmp.lt.s32.totalorder %v466_v2, 4 }
  0xc3   : > { %v481_v45 = vor.u32 %v480_v34, %v479_v22  ;;  %v484_v47 = vor.u32 %v483_v37, %v482_v26  ;;  %v366_v56 = vshll.u32 %v1992_v11, %v363_v13  ;;  %v367_v59 = vshrl.u32 %v1993_v15, %v364_v43 }
  0xc4   : > { %v489_v48 = vsel %vm485_vm2, %v469_v33, %v472_v38  ;;  %v490_v49 = vsel %vm488_vm5, %v478_v42, 2102212464  ;;  %v493_v50 = vsel %vm485_vm2, %v472_v38, %v475_v39  ;;  %v497_v51 = vsel %vm485_vm2, %v475_v39, %v478_v42 }
  0xc5   : > { %v491_v52 = vsel %vm487_vm4, %v475_v39, %v490_v49  ;;  %v494_v53 = vsel %vm488_vm5, %v481_v45, 920167782  ;;  %v498_v54 = vsel %vm488_vm5, %v484_v47, 1326507024  ;;  %v369_v60 = vshll.u32 %v1993_v15, %v363_v13 }
  0xc6   : > { %v495_v57 = vsel %vm487_vm4, %v478_v42, %v494_v53  ;;  %v499_v58 = vsel %vm487_vm4, %v481_v45, %v498_v54  ;;  %v492_v61 = vsel %vm486_vm3, %v489_v48, %v491_v52  ;;  %v370_v0 = vshrl.u32 %v1994_v17, %v364_v43 }
  0xc7   : > { %v496_v62 = vsel %vm486_vm3, %v493_v50, %v495_v57  ;;  %v500_v63 = vsel %vm486_vm3, %v497_v51, %v499_v58  ;;  %v368_v12 = vor.u32 %v367_v59, %v366_v56  ;;  %v372_v18 = vshll.u32 %v1994_v17, %v363_v13 }
  0xc8   : > { %v2135_v1 = vmul.u32.u64.low %v2104_v6, %v500_v63  ;;  %v2136_v3 = vmul.u32.u64.high %v2104_v6, %v500_v63, %v2135_v1  ;;  %v2139_v4 = vmul.u32.u64.low %v2104_v6, %v496_v62  ;;  %v2140_v10 = vmul.u32.u64.high %v2104_v6, %v496_v62, %v2139_v4 }
  0xc9   : > { %v371_v16 = vor.u32 %v370_v0, %v369_v60  ;;  %v373_v22 = vshrl.u32 %v1995_v21, %v364_v43  ;;  %v365_v2 = vshrl.u32 %v1992_v11, %v364_v43  ;;  %v375_v26 = vshll.u32 %v1995_v21, %v363_v13 }
  0xca   : > { %v376_v30 = vshrl.u32 %v1996_v25, %v364_v43  ;;  %v379_v31 = vshrl.u32 %v1997_v35, %v364_v43  ;;  %v508_v32 = vmul.u32 %v2104_v6, %v492_v61  ;;  %v378_v34 = vshll.u32 %v1996_v25, %v363_v13 }
  0xcb   : > { %v374_v33 = vor.u32 %v373_v22, %v372_v18  ;;  %vm381_vm6 = vcmp.lt.s32.totalorder %v2106_v7, 1  ;;  %vm510_vm7 = vc.u32 %v2136_v3, %v2139_v4  ;;  %v511_v37 = vadd.s32 1, %v2140_v10  ;;  %v286_v18 = vpop.permute.xlu1 %285 }
  0xcc   : > { %v377_v38 = vor.u32 %v376_v30, %v375_v26  ;;  %vm382_vm8 = vcmp.lt.s32.totalorder %v2106_v7, 2  ;;  %v380_v39 = vor.u32 %v379_v31, %v378_v34  ;;  %vm383_vm9 = vcmp.lt.s32.totalorder %v2106_v7, 3  ;;  %v290_v30 = vpop.permute.xlu0 %289 }
  0xcd   : > { %vm384_vm10 = vcmp.lt.s32.totalorder %v2106_v7, 4  ;;  %v389_v42 = vsel %vm381_vm6, %v368_v12, %v371_v16  ;;  %v512_v6 = vsel %vm510_vm7, %v511_v37, %v2140_v10  ;;  %v393_v45 = vsel %vm381_vm6, %v371_v16, %v374_v33 }
  0xce   : > { %v386_v43 = vsel %vm384_vm10, %v374_v33, 2102212464  ;;  %v390_v13 = vsel %vm384_vm10, %v377_v38, 920167782  ;;  %v513_v47 = vadd.s32 %v512_v6, %v508_v32  ;;  %v385_v48 = vsel %vm381_vm6, %v365_v2, %v368_v12 }
  0xcf   : > { %v391_v49 = vsel %vm383_vm9, %v374_v33, %v390_v13  ;;  %v394_v50 = vsel %vm384_vm10, %v380_v39, 1326507024  ;;  %v387_v51 = vsel %vm383_vm9, %v371_v16, %v386_v43  ;;  %v567_v54 = vadd.s32 1, %v2112_v14 }
  0xd0   : > { %v392_v52 = vsel %vm382_vm8, %v389_v42, %v391_v49  ;;  %v395_v53 = vsel %vm383_vm9, %v377_v38, %v394_v50  ;;  %v514_v56 = vadd.s32 536870912, %v513_v47  ;;  %v564_v62 = vand.u32 8388607, %v557_v9 }
  0xd1   : > { %v396_v57 = vsel %vm382_vm8, %v393_v45, %v395_v53  ;;  %v2165_v58 = vmul.u32.u64.low %v2108_v8, %v392_v52  ;;  %v2166_v59 = vmul.u32.u64.high %v2108_v8, %v392_v52, %v2165_v58  ;;  %vm568_vm11 = vcmp.gt.s32.totalorder %v567_v54, 0 }
  0xd2   : > { %v2170_v60 = vmul.u32.u64.low %v2108_v8, %v396_v57  ;;  %v2171_v61 = vmul.u32.u64.high %v2108_v8, %v396_v57, %v2170_v60  ;;  %v515_v63 = vshrl.u32 %v514_v56, 30  ;;  %v388_v14 = vsel %vm382_vm8, %v385_v48, %v387_v51 }
  0xd3   : > { %v569_v0 = vsel %vm568_vm11, %v567_v54, 0  ;;  %v407_v12 = vadd.s32 1, %v2166_v59  ;;  %v2180_v16 = vadd.f32 %v2080_v36, %v2102_v5  ;;  %v404_v22 = vmul.u32 %v2108_v8, %v388_v14 }
  0xd4   : > { %v571_v1 = vand.u32 31, %v569_v0  ;;  %v516_v10 = vshll.u32 %v515_v63, 30  ;;  %vm406_vm12 = vc.u32 %v2171_v61, %v2165_v58  ;;  %v565_v2 = vor.u32 8388608, %v564_v62 }
  0xd5   : > { %v408_v31 = vsel %vm406_vm12, %v407_v12, %v2166_v59  ;;  %v539_v32 = vsub.s32 4, %v515_v63  ;;  %v2196_v33 = vmul.f32 %v2073_v29, %v286_v18  ;;  %v509_v34 = vadd.s32 %v2139_v4, %v2136_v3 }
  0xd6   : > { %v572_v26 = vsub.s32 32, %v571_v1  ;;  %v2186_v7 = vsub.s32 %v513_v47, %v516_v10  ;;  %v409_v8 = vadd.s32 %v408_v31, %v404_v22  ;;  %v661_v38 = vand.u32 2147483647, %v2180_v16 }
  0xd7   : > { %v2203_v39 = vmul.f32 %v2073_v29, %v290_v30  ;;  %v2206_v6 = vshll.u32 %v565_v2, 8  ;;  %v664_v43 = vand.u32 2139095040, %v2180_v16  ;;  %v2210_v45 = vshrl.u32 %v569_v0, 5 }
  0xd8   : > { %v519_v37 = vsub.s32 0, %v2186_v7  ;;  %v410_v42 = vadd.s32 536870912, %v409_v8  ;;  %v575_v44 = vshrl.u32 %v1993_v15, %v572_v26  ;;  %v578_v3 = vshrl.u32 %v1994_v17, %v572_v26 }
  0xd9   : > { %v581_v4 = vshrl.u32 %v1995_v21, %v572_v26  ;;  %v2216_v47 = vsel %vm455_vm13, %v539_v32, %v515_v63  ;;  %v574_v49 = vshll.u32 %v1992_v11, %v571_v1  ;;  %v584_v50 = vshrl.u32 %v1996_v25, %v572_v26 }
  0xda   : > { %v1666_v13 = vmin.u32 %v519_v37, %v2186_v7  ;;  %v411_v48 = vshrl.u32 %v410_v42, 30  ;;  %v577_v52 = vshll.u32 %v1993_v15, %v571_v1  ;;  %v580_v53 = vshll.u32 %v1994_v17, %v571_v1 }
  0xdb   : > { %v587_v54 = vshrl.u32 %v1997_v35, %v572_v26  ;;  %v576_v57 = vor.u32 %v575_v44, %v574_v49  ;;  %v583_v59 = vshll.u32 %v1995_v21, %v571_v1  ;;  %v665_v60 = vshrl.u32 %v664_v43, 23 }
  0xdc   : > { %v521_v51 = vclz %v1666_v13  ;;  %v412_v56 = vshll.u32 %v411_v48, 30  ;;  %v579_v63 = vor.u32 %v578_v3, %v577_v52  ;;  %v582_v14 = vor.u32 %v581_v4, %v580_v53 }
  0xdd   : > { %v586_v0 = vshll.u32 %v1996_v25, %v571_v1  ;;  %v542_v10 = vsel %vm2191_vm14, 0, %v2216_v47  ;;  %v573_v18 = vshrl.u32 %v1992_v11, %v572_v26  ;;  %v585_v22 = vor.u32 %v584_v50, %v583_v59 }
  0xde   : > { %v1667_v62 = vadd.s32 4294967294, %v521_v51  ;;  %v2229_v12 = vsub.s32 %v409_v8, %v412_v56  ;;  %v435_v2 = vsub.s32 4, %v411_v48  ;;  %vm589_vm1 = vcmp.lt.s32.totalorder %v2210_v45, 1 }
  0xdf   : > { %v588_v30 = vor.u32 %v587_v54, %v586_v0  ;;  %vm591_vm2 = vcmp.lt.s32.totalorder %v2210_v45, 3  ;;  %vm592_vm3 = vcmp.lt.s32.totalorder %v2210_v45, 4  ;;  %vm2238_vm4 = vcmp.le.f32.partialorder %v349_v46, 0.7853982 }
  0xe0   : > { %vm1668_vm0 = vcmp.lt.s32.totalorder %v1667_v62, 0  ;;  %v415_v32 = vsub.s32 0, %v2229_v12  ;;  %v594_v26 = vsel %vm592_vm3, %v582_v14, 2102212464  ;;  %v597_v42 = vsel %vm589_vm1, %v576_v57, %v579_v63 }
  0xe1   : > { %v524_v31 = vsel %vm1668_vm0, 0, %v1667_v62  ;;  %v598_v13 = vsel %vm592_vm3, %v585_v22, 920167782  ;;  %v601_v3 = vsel %vm589_vm1, %v579_v63, %v582_v14  ;;  %v602_v49 = vsel %vm592_vm3, %v588_v30, 1326507024 }
  0xe2   : > { %v525_v1 = vsub.s32 32, %v524_v31  ;;  %v529_v37 = vsub.s32 4294967266, %v524_v31  ;;  %v526_v44 = vshll.u32 %v2186_v7, %v524_v31  ;;  %v1662_v43 = vmin.u32 %v415_v32, %v2229_v12 }
  0xe3   : > { %v599_v46 = vsel %vm591_vm2, %v582_v14, %v598_v13  ;;  %vm590_vm5 = vcmp.lt.s32.totalorder %v2210_v45, 2  ;;  %v593_v51 = vsel %vm589_vm1, %v573_v18, %v576_v57  ;;  %v595_v7 = vsel %vm591_vm2, %v579_v63, %v594_v26 }
  0xe4   : > { %v527_v4 = vshrl.u32 %v509_v34, %v525_v1  ;;  %v530_v47 = vadd.s32 127, %v529_v37  ;;  %v417_v50 = vclz %v1662_v43  ;;  %v600_v54 = vsel %vm590_vm5, %v597_v42, %v599_v46 }
  0xe5   : > { %v603_v34 = vsel %vm591_vm2, %v585_v22, %v602_v49  ;;  %v2258_v62 = vmul.u32.u64.low %v2206_v6, %v600_v54  ;;  %v2259_v14 = vmul.u32.u64.high %v2206_v6, %v600_v54, %v2258_v62  ;;  %v436_v30 = vsel %vm351_vm15, %v435_v2, %v411_v48 }
  0xe6   : > { %v528_v52 = vor.u32 %v527_v4, %v526_v44  ;;  %v531_v53 = vshll.u32 %v530_v47, 23  ;;  %v1663_v56 = vadd.s32 4294967294, %v417_v50  ;;  %v604_v59 = vsel %vm590_vm5, %v601_v3, %v603_v34 }
  0xe7   : > { %v2264_v57 = vmul.u32.u64.low %v2206_v6, %v604_v59  ;;  %v2265_v18 = vmul.u32.u64.high %v2206_v6, %v604_v59, %v2264_v57  ;;  %v405_v63 = vadd.s32 %v2165_v58, %v2171_v61  ;;  %v596_v45 = vsel %vm590_vm5, %v593_v51, %v595_v7 }
  0xe8   : > { %v532_v0 = vor.u32 4788187, %v531_v53  ;;  %vm1664_vm6 = vcmp.lt.s32.totalorder %v1663_v56, 0  ;;  %v1673_v22 = vadd.s32 4294967169, %v665_v60  ;;  %v535_v32 = vcvt.s32.f32 %v528_v52 }
  0xe9   : > { %v546_v1 = vadd.s32 3, %v542_v10  ;;  %v420_v37 = vsel %vm1664_vm6, 0, %v1663_v56  ;;  %v438_v44 = vsel %vm2238_vm4, 0, %v436_v30  ;;  %v615_v48 = vadd.s32 1, %v2259_v14 }
  0xea   : > { %v533_v31 = vand.u32 2147483647, %v532_v0  ;;  %v421_v26 = vsub.s32 32, %v420_v37  ;;  %v425_v42 = vsub.s32 4294967266, %v420_v37  ;;  %v612_v43 = vmul.u32 %v2206_v6, %v596_v45 }
  0xeb   : > { %vm614_vm7 = vc.u32 %v2265_v18, %v2258_v62  ;;  %v671_v58 = vadd.s32 1, %v1673_v22  ;;  %v422_v61 = vshll.u32 %v2229_v12, %v420_v37  ;;  %v668_v47 = vand.u32 8388607, %v661_v38 }
  0xec   : > { %v536_v2 = vmul.f32 %v535_v32, %v533_v31  ;;  %v423_v60 = vshrl.u32 %v405_v63, %v421_v26  ;;  %v426_v13 = vadd.s32 127, %v425_v42  ;;  %v616_v10 = vsel %vm614_vm7, %v615_v48, %v2259_v14 }
  0xed   : > { %v617_v4 = vadd.s32 %v616_v10, %v612_v43  ;;  %vm672_vm8 = vcmp.gt.s32.totalorder %v671_v58, 0  ;;  %v442_v50 = vadd.s32 3, %v438_v44  ;;  %v326_v12 = vadd.f32 %v2196_v33, %v2060_v20 }
  0xee   : > { %v537_v3 = vxor.u32 2147483648, %v536_v2  ;;  %v424_v46 = vor.u32 %v423_v60, %v422_v61  ;;  %v427_v49 = vshll.u32 %v426_v13, 23  ;;  %v673_v51 = vsel %vm672_vm8, %v671_v58, 0 }
  0xef   : > { %v618_v7 = vadd.s32 536870912, %v617_v4  ;;  %v675_v52 = vand.u32 31, %v673_v51  ;;  %v2285_v54 = vand.u32 3, %v546_v1  ;;  %v669_v59 = vor.u32 8388608, %v668_v47 }
  0xf0   : > { %v538_v6 = vsel %vm455_vm13, %v537_v3, %v536_v2  ;;  %v428_v34 = vor.u32 4788187, %v427_v49  ;;  %v431_v30 = vcvt.s32.f32 %v424_v46  ;;  %v2289_v57 = vand.u32 3, %v442_v50 }
  0xf1   : > { %v541_v53 = vsel %vm2191_vm14, %v2083_v40, %v538_v6  ;;  %v2287_v56 = vshrl.u32 %v618_v7, 30  ;;  %v676_v14 = vsub.s32 32, %v675_v52  ;;  %v2293_v20 = vadd.f32 %v2080_v36, %v326_v12 }
  0xf2   : > { %1856 = vcosq.f32 %v541_v53  ;;  %v429_v0 = vand.u32 2147483647, %v428_v34  ;;  %v2297_v5 = vadd.f32 %v2203_v39, %v2058_v19  ;;  %v2300_v45 = vadd.s32 %v2258_v62, %v2265_v18 }
  0xf3   : > { %1858 = vsinq.f32 %v541_v53  ;;  %v620_v63 = vshll.u32 %v2287_v56, 30  ;;  %v679_v22 = vshrl.u32 %v1993_v15, %v676_v14  ;;  %v682_v31 = vshrl.u32 %v1994_v17, %v676_v14 }
  0xf4   : > { %v432_v33 = vmul.f32 %v431_v30, %v429_v0  ;;  %vm552_vm9 = vcmp.eq.s32.totalorder %v2285_v54, 2  ;;  %v2307_v1 = vshrl.u32 %v673_v51, 5  ;;  %v688_v37 = vshrl.u32 %v1996_v25, %v676_v14 }
  0xf5   : > { %v2305_v32 = vsub.s32 %v617_v4, %v620_v63  ;;  %v2310_v26 = vshll.u32 %v669_v59, 8  ;;  %vm549_vm10 = vcmp.eq.s32.totalorder %v2285_v54, 0  ;;  %v678_v39 = vshll.u32 %v1992_v11, %v675_v52 }
  0xf6   : > { %v433_v19 = vxor.u32 2147483648, %v432_v33  ;;  %v681_v62 = vshll.u32 %v1993_v15, %v675_v52  ;;  %v685_v18 = vshrl.u32 %v1995_v21, %v676_v14  ;;  %vm1389_vm11 = vcmask 523264  }
  0xf7   : > { %vm548_vm12 = vcmp.lt.s32.totalorder %v2285_v54, 2  ;;  %v623_v42 = vsub.s32 0, %v2305_v32  ;;  %v684_v44 = vshll.u32 %v1994_v17, %v675_v52  ;;  %v687_v48 = vshll.u32 %v1995_v21, %v675_v52 }
  0xf8   : > { %v765_v2 = vand.u32 2147483647, %v2293_v20  ;;  %vm545_vm13 = vweird.f32 %v2083_v40  ;;  %v434_v43 = vsel %vm351_vm15, %v433_v19, %v432_v33  ;;  %v680_v58 = vor.u32 %v679_v22, %v678_v39 }
  0xf9   : > { %v683_v61 = vor.u32 %v682_v31, %v681_v62  ;;  %v691_v60 = vshrl.u32 %v1997_v35, %v676_v14  ;;  %v437_v13 = vsel %vm2238_vm4, %v2086_v41, %v434_v43  ;;  %v1670_v10 = vmin.u32 %v623_v42, %v2305_v32 }
  0xfa   : > { %v689_v3 = vor.u32 %v688_v37, %v687_v48  ;;  %v690_v4 = vshll.u32 %v1996_v25, %v675_v52  ;;  %1860 = vcosq.f32 %v437_v13  ;;  %v643_v47 = vsub.s32 4, %v2287_v56 }
  0xfb   : > { %v677_v46 = vshrl.u32 %v1992_v11, %v676_v14  ;;  %v686_v49 = vor.u32 %v685_v18, %v684_v44  ;;  %1862 = vsinq.f32 %v437_v13  ;;  %vm559_vm14 = vcmp.lt.s32.totalorder %v2098_v55, 0 }
  0xfc   : > { %v1857_v50 = vpop.eup %1856  ;;  %v625_v51 = vclz %v1670_v10  ;;  %v692_v8 = vor.u32 %v691_v60, %v690_v4  ;;  %vm693_vm15 = vcmp.lt.s32.totalorder %v2307_v1, 1  ;;  %vm694_vm0 = vcmp.lt.s32.totalorder %v2307_v1, 2 }
  0xfd   : > { %v1859_v6 = vpop.eup %1858  ;;  %v553_v7 = vxor.u32 2147483648, %v1857_v50  ;;  %vm696_vm1 = vcmp.lt.s32.totalorder %v2307_v1, 4  ;;  %v701_v52 = vsel %vm693_vm15, %v680_v58, %v683_v61  ;;  %vm695_vm2 = vcmp.lt.s32.totalorder %v2307_v1, 3 }
  0xfe   : > { %v550_v12 = vxor.u32 2147483648, %v1859_v6  ;;  %v1671_v53 = vadd.s32 4294967294, %v625_v51  ;;  %v702_v34 = vsel %vm696_vm1, %v689_v3, 920167782  ;;  %vm2346_vm3 = vcmp.le.f32.partialorder %v557_v9, 0.7853982 }
  0xff   : > { %v554_v59 = vsel %vm552_vm9, %v553_v7, %v1859_v6  ;;  %v698_v0 = vsel %vm696_vm1, %v686_v49, 2102212464  ;;  %v703_v30 = vsel %vm695_vm2, %v686_v49, %v702_v34  ;;  %v705_v63 = vsel %vm693_vm15, %v683_v61, %v686_v49 }
 0x100   : > { %v551_v33 = vsel %vm549_vm10, %v1857_v50, %v550_v12  ;;  %vm1672_vm4 = vcmp.lt.s32.totalorder %v1671_v53, 0  ;;  %v704_v22 = vsel %vm694_vm0, %v701_v52, %v703_v30  ;;  %v706_v31 = vsel %vm696_vm1, %v692_v8, 1326507024 }
 0x101   : > { %v555_v9 = vsel %vm548_vm12, %v551_v33, %v554_v59  ;;  %vm444_vm5 = vcmp.lt.s32.totalorder %v2289_v57, 2  ;;  %v628_v37 = vsel %vm1672_vm4, 0, %v1671_v53  ;;  %v697_v19 = vsel %vm693_vm15, %v677_v46, %v680_v58 }
 0x102   : > { %v707_v39 = vsel %vm695_vm2, %v689_v3, %v706_v31  ;;  %v556_v62 = vsel %vm545_vm13, nan, %v555_v9  ;;  %vm441_vm6 = vweird.f32 %v2086_v41  ;;  %v629_v18 = vsub.s32 32, %v628_v37 }
 0x103   : > { %v633_v42 = vsub.s32 4294967266, %v628_v37  ;;  %v699_v54 = vsel %vm695_vm2, %v683_v61, %v698_v0  ;;  %1391 = vst.msk [vmem:[%s2371_s8 + $0x8] sm:$0xff] %vm1389_vm11, %v556_v62  ;;  %v630_v44 = vshll.u32 %v2305_v32, %v628_v37  ;;  %v708_v48 = vsel %vm694_vm0, %v705_v63, %v707_v39 }
 0x104   : > { %v2379_v40 = vmul.u32.u64.low %v2310_v26, %v704_v22  ;;  %v2380_v43 = vmul.u32.u64.high %v2310_v26, %v704_v22, %v2379_v40  ;;  %v631_v58 = vshrl.u32 %v2300_v45, %v629_v18  ;;  %v1861_v10 = vpop.eup %1860  ;;  %vm445_vm7 = vcmp.eq.s32.totalorder %v2289_v57, 0 }
 0x105   : > { %v634_v60 = vadd.s32 127, %v633_v42  ;;  %v2384_v13 = vmul.u32.u64.low %v2310_v26, %v708_v48  ;;  %v2385_v61 = vmul.u32.u64.high %v2310_v26, %v708_v48, %v2384_v13  ;;  %vm448_vm8 = vcmp.eq.s32.totalorder %v2289_v57, 2  ;;  %v1863_v4 = vpop.eup %1862  ;;  %v294_v57 = vpop.permute.xlu1 %293 }
 0x106   : > { %v644_v32 = vsel %vm559_vm14, %v643_v47, %v2287_v56  ;;  %v768_v3 = vand.u32 2139095040, %v2293_v20  ;;  %v449_v46 = vxor.u32 2147483648, %v1861_v10  ;;  %v632_v49 = vor.u32 %v631_v58, %v630_v44 }
 0x107   : > { %v635_v45 = vshll.u32 %v634_v60, 23  ;;  %v700_v50 = vsel %vm694_vm0, %v697_v19, %v699_v54  ;;  %v446_v51 = vxor.u32 2147483648, %v1863_v4  ;;  %v719_v8 = vadd.s32 1, %v2380_v43 }
 0x108   : > { %v769_v6 = vshrl.u32 %v768_v3, 23  ;;  %v2398_v7 = vadd.f32 %v2080_v36, %v2297_v5  ;;  %v450_v52 = vsel %vm448_vm8, %v449_v46, %v1863_v4  ;;  %v646_v47 = vsel %vm2346_vm3, 0, %v644_v32 }
 0x109   : > { %v636_v56 = vor.u32 4788187, %v635_v45  ;;  %v772_v12 = vand.u32 8388607, %v765_v2  ;;  %v447_v1 = vsel %vm445_vm7, %v1861_v10, %v446_v51  ;;  %v716_v53 = vmul.u32 %v2310_v26, %v700_v50 }
 0x10a   : > { %vm718_vm9 = vc.u32 %v2385_v61, %v2379_v40  ;;  %v1677_v34 = vadd.s32 4294967169, %v769_v6  ;;  %v451_v5 = vsel %vm444_vm5, %v447_v1, %v450_v52  ;;  %v639_v0 = vcvt.s32.f32 %v632_v49 }
 0x10b   : > { %v637_v59 = vand.u32 2147483647, %v636_v56  ;;  %v720_v30 = vsel %vm718_vm9, %v719_v8, %v2380_v43  ;;  %v452_v63 = vsel %vm441_vm6, nan, %v451_v5  ;;  %v650_v33 = vadd.s32 3, %v646_v47  ;;  %v298_v43 = vpop.permute.xlu0 %297 }
 0x10c   : > { %v721_v22 = vadd.s32 %v720_v30, %v716_v53  ;;  %v775_v31 = vadd.s32 1, %v1677_v34  ;;  %1390 = vst.msk [vmem:[%s2371_s8] sm:$0xff] %vm1389_vm11, %v452_v63  ;;  %v773_v26 = vor.u32 8388608, %v772_v12  ;;  %v869_v37 = vand.u32 2147483647, %v2398_v7 }
 0x10d   : > { %v640_v9 = vmul.f32 %v639_v0, %v637_v59  ;;  %vm663_vm12 = vcmp.lt.s32.totalorder %v2180_v16, 0  ;;  %v872_v18 = vand.u32 2139095040, %v2398_v7  ;;  %v2418_v41 = vand.u32 3, %v650_v33 }
 0x10e   : > { %v722_v19 = vadd.s32 536870912, %v721_v22  ;;  %vm776_vm10 = vcmp.gt.s32.totalorder %v775_v31, 0  ;;  %vm2422_vm13 = vcmp.le.f32.partialorder %v661_v38, 0.7853982  ;;  %v2427_v54 = vadd.s32 %v2379_v40, %v2385_v61 }
 0x10f   : > { %v641_v39 = vxor.u32 2147483648, %v640_v9  ;;  %v777_v62 = vsel %vm776_vm10, %v775_v31, 0  ;;  %v2431_v60 = vshll.u32 %v773_v26, 8  ;;  %v2435_v13 = vand.u32 8388607, %v869_v37 }
 0x110   : > { %v723_v44 = vshrl.u32 %v722_v19, 30  ;;  %v779_v48 = vand.u32 31, %v777_v62  ;;  %v318_v38 = vmul.f32 %v2073_v29, %v294_v57  ;;  %v778_v3 = vshrl.u32 %v777_v62, 5 }
 0x111   : > { %v642_v58 = vsel %vm559_vm14, %v641_v39, %v640_v9  ;;  %v873_v4 = vshrl.u32 %v872_v18, 23  ;;  %v2442_v46 = vmul.f32 %v2073_v29, %v298_v43  ;;  %vm656_vm14 = vcmp.eq.s32.totalorder %v2418_v41, 2 }
 0x112   : > { %v645_v10 = vsel %vm2346_vm3, %v2098_v55, %v642_v58  ;;  %v724_v40 = vshll.u32 %v723_v44, 30  ;;  %v747_v61 = vsub.s32 4, %v723_v44  ;;  %v780_v32 = vsub.s32 32, %v779_v48 }
 0x113   : > { %1864 = vcosq.f32 %v645_v10  ;;  %v782_v45 = vshll.u32 %v1992_v11, %v779_v48  ;;  %v785_v50 = vshll.u32 %v1993_v15, %v779_v48  ;;  %v788_v8 = vshll.u32 %v1994_v17, %v779_v48 }
 0x114   : > { %1866 = vsinq.f32 %v645_v10  ;;  %v2444_v49 = vsub.s32 %v721_v22, %v724_v40  ;;  %v783_v51 = vshrl.u32 %v1993_v15, %v780_v32  ;;  %v786_v14 = vshrl.u32 %v1994_v17, %v780_v32 }
 0x115   : > { %v789_v6 = vshrl.u32 %v1995_v21, %v780_v32  ;;  %v2455_v29 = vsel %vm663_vm12, %v747_v61, %v723_v44  ;;  %v791_v56 = vshll.u32 %v1995_v21, %v779_v48  ;;  %v792_v47 = vshrl.u32 %v1996_v25, %v780_v32 }
 0x116   : > { %v727_v52 = vsub.s32 0, %v2444_v49  ;;  %v784_v12 = vor.u32 %v783_v51, %v782_v45  ;;  %v787_v1 = vor.u32 %v786_v14, %v785_v50  ;;  %v877_v34 = vor.u32 8388608, %v2435_v13 }
 0x117   : > { %v790_v53 = vor.u32 %v789_v6, %v788_v8  ;;  %vm653_vm15 = vcmp.eq.s32.totalorder %v2418_v41, 0  ;;  %v793_v59 = vor.u32 %v792_v47, %v791_v56  ;;  %v795_v0 = vshrl.u32 %v1997_v35, %v780_v32 }
 0x118   : > { %v1674_v5 = vmin.u32 %v727_v52, %v2444_v49  ;;  %v328_v30 = vadd.f32 %v318_v38, %v2064_v24  ;;  %vm652_vm0 = vcmp.lt.s32.totalorder %v2418_v41, 2  ;;  %v750_v63 = vsel %vm2422_vm13, 0, %v2455_v29 }
 0x119   : > { %v781_v33 = vshrl.u32 %v1992_v11, %v780_v32  ;;  %v794_v22 = vshll.u32 %v1996_v25, %v779_v48  ;;  %v1681_v31 = vadd.s32 4294967169, %v873_v4  ;;  %vm649_vm1 = vweird.f32 %v2098_v55 }
 0x11a   : > { %v729_v9 = vclz %v1674_v5  ;;  %vm797_vm2 = vcmp.lt.s32.totalorder %v778_v3, 1  ;;  %vm799_vm3 = vcmp.lt.s32.totalorder %v778_v3, 3  ;;  %vm800_vm4 = vcmp.lt.s32.totalorder %v778_v3, 4 }
 0x11b   : > { %v796_v26 = vor.u32 %v795_v0, %v794_v22  ;;  %v801_v19 = vsel %vm797_vm2, %v781_v33, %v784_v12  ;;  %v802_v24 = vsel %vm800_vm4, %v790_v53, 2102212464  ;;  %v805_v57 = vsel %vm797_vm2, %v784_v12, %v787_v1 }
 0x11c   : > { %v1675_v39 = vadd.s32 4294967294, %v729_v9  ;;  %v803_v62 = vsel %vm799_vm3, %v787_v1, %v802_v24  ;;  %v806_v18 = vsel %vm800_vm4, %v793_v59, 920167782  ;;  %v809_v44 = vsel %vm797_vm2, %v787_v1, %v790_v53 }
 0x11d   : > { %v1865_v43 = vpop.eup %1864  ;;  %vm798_vm5 = vcmp.lt.s32.totalorder %v778_v3, 2  ;;  %v807_v48 = vsel %vm799_vm3, %v790_v53, %v806_v18  ;;  %v810_v58 = vsel %vm800_vm4, %v796_v26, 1326507024  ;;  %v879_v13 = vadd.s32 1, %v1681_v31 }
 0x11e   : > { %v1867_v38 = vpop.eup %1866  ;;  %v657_v10 = vxor.u32 2147483648, %v1865_v43  ;;  %vm1676_vm6 = vcmp.lt.s32.totalorder %v1675_v39, 0  ;;  %v804_v40 = vsel %vm798_vm5, %v801_v19, %v803_v62  ;;  %v811_v61 = vsel %vm799_vm3, %v793_v59, %v810_v58 }
 0x11f   : > { %v654_v32 = vxor.u32 2147483648, %v1867_v38  ;;  %v732_v4 = vsel %vm1676_vm6, 0, %v1675_v39  ;;  %v808_v45 = vsel %vm798_vm5, %v805_v57, %v807_v48  ;;  %v812_v50 = vsel %vm798_vm5, %v809_v44, %v811_v61 }
 0x120   : > { %v658_v51 = vsel %vm656_vm14, %v657_v10, %v1867_v38  ;;  %v733_v14 = vsub.s32 32, %v732_v4  ;;  %v734_v8 = vshll.u32 %v2444_v49, %v732_v4  ;;  %v737_v6 = vsub.s32 4294967266, %v732_v4 }
 0x121   : > { %v655_v52 = vsel %vm653_vm15, %v1865_v43, %v654_v32  ;;  %v2481_v29 = vmul.u32.u64.low %v2431_v60, %v812_v50  ;;  %v2482_v56 = vmul.u32.u64.high %v2431_v60, %v812_v50, %v2481_v29  ;;  %vm880_vm7 = vcmp.gt.s32.totalorder %v879_v13, 0 }
 0x122   : > { %v659_v3 = vsel %vm652_vm0, %v655_v52, %v658_v51  ;;  %v735_v47 = vshrl.u32 %v2427_v54, %v733_v14  ;;  %v738_v12 = vadd.s32 127, %v737_v6  ;;  %v881_v1 = vsel %vm880_vm7, %v879_v13, 0 }
 0x123   : > { %v660_v53 = vsel %vm649_vm1, nan, %v659_v3  ;;  %v2490_v49 = vmul.u32.u64.low %v2431_v60, %v808_v45  ;;  %v2491_v5 = vmul.u32.u64.high %v2431_v60, %v808_v45, %v2490_v49  ;;  %v2494_v59 = vshrl.u32 %v881_v1, 5 }
 0x124   : > { %1392 = vst.msk [vmem:[%s2371_s8 + $0x10] sm:$0xff] %vm1389_vm11, %v660_v53  ;;  %v736_v0 = vor.u32 %v735_v47, %v734_v8  ;;  %v739_v33 = vshll.u32 %v738_v12, 23  ;;  %v883_v41 = vand.u32 31, %v881_v1  ;;  %v2498_v22 = vshll.u32 %v877_v34, 8 }
 0x125   : > { %v754_v54 = vadd.s32 3, %v750_v63  ;;  %v820_v31 = vmul.u32 %v2431_v60, %v804_v40  ;;  %v2502_v55 = vadd.f32 %v2080_v36, %v328_v30  ;;  %v2506_v9 = vadd.f32 %v2442_v46, %v2062_v23 }
 0x126   : > { %v740_v26 = vor.u32 4788187, %v739_v33  ;;  %vm822_vm8 = vc.u32 %v2482_v56, %v2490_v49  ;;  %v884_v19 = vsub.s32 32, %v883_v41  ;;  %vm901_vm9 = vcmp.lt.s32.totalorder %v2494_v59, 1 }
 0x127   : > { %v743_v24 = vcvt.s32.f32 %v736_v0  ;;  %v823_v34 = vadd.s32 1, %v2491_v5  ;;  %v886_v63 = vshll.u32 %v1992_v11, %v883_v41  ;;  %v889_v60 = vshll.u32 %v1993_v15, %v883_v41 }
 0x128   : > { %v741_v36 = vand.u32 2147483647, %v740_v26  ;;  %v887_v30 = vshrl.u32 %v1993_v15, %v884_v19  ;;  %v890_v23 = vshrl.u32 %v1994_v17, %v884_v19  ;;  %v892_v46 = vshll.u32 %v1994_v17, %v883_v41 }
 0x129   : > { %v824_v57 = vsel %vm822_vm8, %v823_v34, %v2491_v5  ;;  %v893_v39 = vshrl.u32 %v1995_v21, %v884_v19  ;;  %v895_v62 = vshll.u32 %v1995_v21, %v883_v41  ;;  %v896_v18 = vshrl.u32 %v1996_v25, %v884_v19 }
 0x12a   : > { %v744_v44 = vmul.f32 %v743_v24, %v741_v36  ;;  %v825_v43 = vadd.s32 %v824_v57, %v820_v31  ;;  %v888_v48 = vor.u32 %v887_v30, %v886_v63  ;;  %v891_v58 = vor.u32 %v890_v23, %v889_v60 }
 0x12b   : > { %v894_v13 = vor.u32 %v893_v39, %v892_v46  ;;  %v897_v38 = vor.u32 %v896_v18, %v895_v62  ;;  %v898_v10 = vshll.u32 %v1996_v25, %v883_v41  ;;  %v899_v40 = vshrl.u32 %v1997_v35, %v884_v19 }
 0x12c   : > { %v745_v61 = vxor.u32 2147483648, %v744_v44  ;;  %v826_v32 = vadd.s32 536870912, %v825_v43  ;;  %vm902_vm10 = vcmp.lt.s32.totalorder %v2494_v59, 2  ;;  %vm904_vm14 = vcmp.lt.s32.totalorder %v2494_v59, 4 }
 0x12d   : > { %v900_v4 = vor.u32 %v899_v40, %v898_v10  ;;  %vm903_vm15 = vcmp.lt.s32.totalorder %v2494_v59, 3  ;;  %v909_v45 = vsel %vm901_vm9, %v888_v48, %v891_v58  ;;  %v910_v50 = vsel %vm904_vm14, %v897_v38, 920167782 }
 0x12e   : > { %v746_v51 = vsel %vm663_vm12, %v745_v61, %v744_v44  ;;  %v827_v14 = vshrl.u32 %v826_v32, 30  ;;  %v885_v8 = vshrl.u32 %v1992_v11, %v884_v19  ;;  %v911_v6 = vsel %vm903_vm15, %v894_v13, %v910_v50 }
 0x12f   : > { %v749_v52 = vsel %vm2422_vm13, %v2180_v16, %v746_v51  ;;  %v906_v29 = vsel %vm904_vm14, %v894_v13, 2102212464  ;;  %v912_v3 = vsel %vm902_vm10, %v909_v45, %v911_v6  ;;  %v913_v47 = vsel %vm901_vm9, %v891_v58, %v894_v13 }
 0x130   : > { %1868 = vcosq.f32 %v749_v52  ;;  %v828_v12 = vshll.u32 %v827_v14, 30  ;;  %v851_v1 = vsub.s32 4, %v827_v14  ;;  %v914_v53 = vsel %vm904_vm14, %v900_v4, 1326507024 }
 0x131   : > { %1870 = vsinq.f32 %v749_v52  ;;  %v915_v42 = vsel %vm903_vm15, %v897_v38, %v914_v53  ;;  %v2549_v5 = vmul.u32.u64.low %v2498_v22, %v912_v3  ;;  %v2550_v0 = vmul.u32.u64.high %v2498_v22, %v912_v3, %v2549_v5 }
 0x132   : > { %v2553_v33 = vsub.s32 %v825_v43, %v828_v12  ;;  %v905_v41 = vsel %vm901_vm9, %v885_v8, %v888_v48  ;;  %v907_v31 = vsel %vm903_vm15, %v891_v58, %v906_v29  ;;  %v916_v26 = vsel %vm902_vm10, %v913_v47, %v915_v42 }
 0x133   : > { %v2562_v19 = vmul.u32.u64.low %v2498_v22, %v916_v26  ;;  %v2563_v24 = vmul.u32.u64.high %v2498_v22, %v916_v26, %v2562_v19  ;;  %v755_v34 = vand.u32 3, %v754_v54  ;;  %vm767_vm12 = vcmp.lt.s32.totalorder %v2293_v20, 0  ;;  %v2578_v54 = vld [vmem:[%s2990_s2] ss:$0 sm:$0xff] }
 0x134   : > { %v831_v63 = vsub.s32 0, %v2553_v33  ;;  %v976_v60 = vand.u32 2139095040, %v2502_v55  ;;  %v852_v36 = vsel %vm767_vm12, %v851_v1, %v827_v14  ;;  %v908_v30 = vsel %vm902_vm10, %v905_v41, %v907_v31 }
 0x135   : > { %v927_v23 = vadd.s32 1, %v2550_v0  ;;  %v973_v46 = vand.u32 2147483647, %v2502_v55  ;;  %v2582_v62 = vadd.f32 %v2578_v54, %v2506_v9  ;;  %vm753_vm13 = vweird.f32 %v2180_v16 }
 0x136   : > { %v1678_v57 = vmin.u32 %v831_v63, %v2553_v33  ;;  %v977_v39 = vshrl.u32 %v976_v60, 23  ;;  %vm2587_vm0 = vcmp.le.f32.partialorder %v765_v2, 0.7853982  ;;  %vm926_vm1 = vc.u32 %v2563_v24, %v2549_v5 }
 0x137   : > { %vm756_vm2 = vcmp.lt.s32.totalorder %v755_v34, 2  ;;  %v854_v44 = vsel %vm2587_vm0, 0, %v852_v36  ;;  %v924_v43 = vmul.u32 %v2498_v22, %v908_v30  ;;  %vm757_vm3 = vcmp.eq.s32.totalorder %v755_v34, 0 }
 0x138   : > { %v833_v18 = vclz %v1678_v57  ;;  %v928_v9 = vsel %vm926_vm1, %v927_v23, %v2550_v0  ;;  %v1685_v48 = vadd.s32 4294967169, %v977_v39  ;;  %v980_v2 = vand.u32 8388607, %v973_v46 }
 0x139   : > { %vm760_vm4 = vcmp.eq.s32.totalorder %v755_v34, 2  ;;  %v929_v38 = vadd.s32 %v928_v9, %v924_v43  ;;  %v1080_v10 = vand.u32 2139095040, %v2582_v62  ;;  %v821_v32 = vadd.s32 %v2490_v49, %v2482_v56 }
 0x13a   : > { %v1869_v58 = vpop.eup %1868  ;;  %v1679_v13 = vadd.s32 4294967294, %v833_v18  ;;  %v858_v4 = vadd.s32 3, %v854_v44  ;;  %v983_v22 = vadd.s32 1, %v1685_v48  ;;  %v981_v6 = vor.u32 8388608, %v980_v2 }
 0x13b   : > { %v1871_v40 = vpop.eup %1870  ;;  %v761_v61 = vxor.u32 2147483648, %v1869_v58  ;;  %v930_v50 = vadd.s32 536870912, %v929_v38  ;;  %v1081_v51 = vshrl.u32 %v1080_v10, 23  ;;  %v1077_v47 = vand.u32 2147483647, %v2582_v62 }
 0x13c   : > { %v758_v45 = vxor.u32 2147483648, %v1871_v40  ;;  %vm1680_vm5 = vcmp.lt.s32.totalorder %v1679_v13, 0  ;;  %vm984_vm6 = vcmp.gt.s32.totalorder %v983_v22, 0  ;;  %v2610_v31 = vand.u32 3, %v858_v4 }
 0x13d   : > { %v762_v14 = vsel %vm760_vm4, %v761_v61, %v1871_v40  ;;  %v836_v8 = vsel %vm1680_vm5, 0, %v1679_v13  ;;  %v931_v49 = vshrl.u32 %v930_v50, 30  ;;  %v985_v1 = vsel %vm984_vm6, %v983_v22, 0 }
 0x13e   : > { %v759_v52 = vsel %vm757_vm3, %v1869_v58, %v758_v45  ;;  %v837_v29 = vsub.s32 32, %v836_v8  ;;  %v841_v3 = vsub.s32 4294967266, %v836_v8  ;;  %v838_v56 = vshll.u32 %v2553_v33, %v836_v8 }
 0x13f   : > { %v763_v12 = vsel %vm756_vm2, %v759_v52, %v762_v14  ;;  %v1689_v41 = vadd.s32 4294967169, %v1081_v51  ;;  %vm871_vm7 = vcmp.lt.s32.totalorder %v2398_v7, 0  ;;  %v932_v26 = vshll.u32 %v931_v49, 30 }
 0x140   : > { %v764_v53 = vsel %vm753_vm13, nan, %v763_v12  ;;  %v839_v42 = vshrl.u32 %v821_v32, %v837_v29  ;;  %v842_v0 = vadd.s32 127, %v841_v3  ;;  %v987_v19 = vand.u32 31, %v985_v1 }
 0x141   : > { %1393 = vst.msk [vmem:[%s2371_s8 + $0x18] sm:$0xff] %vm1389_vm11, %v764_v53  ;;  %v925_v33 = vadd.s32 %v2549_v5, %v2563_v24  ;;  %v2615_v60 = vshll.u32 %v981_v6, 8  ;;  %v2617_v16 = vsub.s32 %v929_v38, %v932_v26  ;;  %v2619_v36 = vshrl.u32 %v985_v1, 5 }
 0x142   : > { %v840_v34 = vor.u32 %v839_v42, %v838_v56  ;;  %v843_v63 = vshll.u32 %v842_v0, 23  ;;  %v988_v30 = vsub.s32 32, %v987_v19  ;;  %v2623_v23 = vand.u32 8388607, %v1077_v47 }
 0x143   : > { %v955_v39 = vsub.s32 4, %v931_v49  ;;  %v990_v18 = vshll.u32 %v1992_v11, %v987_v19  ;;  %v1087_v44 = vadd.s32 1, %v1689_v41  ;;  %vm2628_vm8 = vcmp.le.f32.partialorder %v869_v37, 0.7853982 }
 0x144   : > { %v844_v57 = vor.u32 4788187, %v843_v63  ;;  %v847_v43 = vcvt.s32.f32 %v840_v34  ;;  %v935_v24 = vsub.s32 0, %v2617_v16  ;;  %v991_v9 = vshrl.u32 %v1993_v15, %v988_v30 }
 0x145   : > { %v993_v48 = vshll.u32 %v1993_v15, %v987_v19  ;;  %v994_v58 = vshrl.u32 %v1994_v17, %v988_v30  ;;  %v996_v13 = vshll.u32 %v1994_v17, %v987_v19  ;;  %v997_v38 = vshrl.u32 %v1995_v21, %v988_v30 }
 0x146   : > { %v845_v2 = vand.u32 2147483647, %v844_v57  ;;  %v1682_v10 = vmin.u32 %v935_v24, %v2617_v16  ;;  %v992_v40 = vor.u32 %v991_v9, %v990_v18  ;;  %v999_v37 = vshll.u32 %v1995_v21, %v987_v19 }
 0x147   : > { %vm1005_vm9 = vcmp.lt.s32.totalorder %v2619_v36, 1  ;;  %v995_v32 = vor.u32 %v994_v58, %v993_v48  ;;  %v998_v4 = vor.u32 %v997_v38, %v996_v13  ;;  %v1000_v22 = vshrl.u32 %v1996_v25, %v988_v30  ;;  %v302_v48 = vpop.permute.xlu1 %301 }
 0x148   : > { %v848_v61 = vmul.f32 %v847_v43, %v845_v2  ;;  %v937_v45 = vclz %v1682_v10  ;;  %v956_v50 = vsel %vm871_vm7, %v955_v39, %v931_v49  ;;  %v989_v51 = vshrl.u32 %v1992_v11, %v988_v30 }
 0x149   : > { %vm1006_vm10 = vcmp.lt.s32.totalorder %v2619_v36, 2  ;;  %v1001_v8 = vor.u32 %v1000_v22, %v999_v37  ;;  %v1002_v6 = vshll.u32 %v1996_v25, %v987_v19  ;;  %v1003_v52 = vshrl.u32 %v1997_v35, %v988_v30 }
 0x14a   : > { %v849_v14 = vxor.u32 2147483648, %v848_v61  ;;  %v1683_v29 = vadd.s32 4294967294, %v937_v45  ;;  %vm1007_vm14 = vcmp.lt.s32.totalorder %v2619_v36, 3  ;;  %vm1008_vm15 = vcmp.lt.s32.totalorder %v2619_v36, 4  ;;  %v2695_v36 = vld [vmem:[%s2989_s1 + $0x1] ss:$0 sm:$0xff] }
 0x14b   : > { %v1009_v3 = vsel %vm1005_vm9, %v989_v51, %v992_v40  ;;  %v1004_v56 = vor.u32 %v1003_v52, %v1002_v6  ;;  %v1010_v49 = vsel %vm1008_vm15, %v998_v4, 2102212464  ;;  %v1013_v1 = vsel %vm1005_vm9, %v992_v40, %v995_v32 }
 0x14c   : > { %v850_v12 = vsel %vm767_vm12, %v849_v14, %v848_v61  ;;  %vm1684_vm13 = vcmp.lt.s32.totalorder %v1683_v29, 0  ;;  %v1011_v42 = vsel %vm1007_vm14, %v995_v32, %v1010_v49  ;;  %v1014_v0 = vsel %vm1008_vm15, %v1001_v8, 920167782 }
 0x14d   : > { %v853_v53 = vsel %vm2587_vm0, %v2293_v20, %v850_v12  ;;  %v940_v41 = vsel %vm1684_vm13, 0, %v1683_v29  ;;  %v958_v26 = vsel %vm2628_vm8, 0, %v956_v50  ;;  %v1015_v19 = vsel %vm1007_vm14, %v998_v4, %v1014_v0 }
 0x14e   : > { %1872 = vcosq.f32 %v853_v53  ;;  %v941_v34 = vsub.s32 32, %v940_v41  ;;  %v945_v63 = vsub.s32 4294967266, %v940_v41  ;;  %v1012_v59 = vsel %vm1006_vm10, %v1009_v3, %v1011_v42 }
 0x14f   : > { %1874 = vsinq.f32 %v853_v53  ;;  %v942_v30 = vshll.u32 %v2617_v16, %v940_v41  ;;  %v1016_v57 = vsel %vm1006_vm10, %v1013_v1, %v1015_v19  ;;  %v1017_v39 = vsel %vm1005_vm9, %v995_v32, %v998_v4 }
 0x150   : > { %v1018_v18 = vsel %vm1008_vm15, %v1004_v56, 1326507024  ;;  %v943_v43 = vshrl.u32 %v925_v33, %v941_v34  ;;  %v946_v24 = vadd.s32 127, %v945_v63  ;;  %vm1088_vm12 = vcmp.gt.s32.totalorder %v1087_v44, 0 }
 0x151   : > { %v1019_v9 = vsel %vm1007_vm14, %v1001_v8, %v1018_v18  ;;  %v2683_v16 = vmul.u32.u64.low %v2615_v60, %v1016_v57  ;;  %v2684_v58 = vmul.u32.u64.high %v2615_v60, %v1016_v57, %v2683_v16  ;;  %v1089_v13 = vsel %vm1088_vm12, %v1087_v44, 0 }
 0x152   : > { %v1020_v2 = vsel %vm1006_vm10, %v1017_v39, %v1019_v9  ;;  %v944_v38 = vor.u32 %v943_v43, %v942_v30  ;;  %v947_v10 = vshll.u32 %v946_v24, 23  ;;  %vm860_vm0 = vcmp.lt.s32.totalorder %v2610_v31, 2 }
 0x153   : > { %v2688_v40 = vmul.u32.u64.low %v2615_v60, %v1020_v2  ;;  %v2689_v33 = vmul.u32.u64.high %v2615_v60, %v1020_v2, %v2688_v40  ;;  %v1091_v37 = vand.u32 31, %v1089_v13  ;;  %v320_v61 = vmul.f32 %v2695_v36, %v302_v48 }
 0x154   : > { %vm857_vm1 = vweird.f32 %v2293_v20  ;;  %vm861_vm2 = vcmp.eq.s32.totalorder %v2610_v31, 0  ;;  %vm864_vm3 = vcmp.eq.s32.totalorder %v2610_v31, 2  ;;  %v948_v44 = vor.u32 4788187, %v947_v10 }
 0x155   : > { %v1085_v32 = vor.u32 8388608, %v2623_v23  ;;  %v962_v4 = vadd.s32 3, %v958_v26  ;;  %v1028_v22 = vmul.u32 %v2615_v60, %v1012_v59  ;;  %v1031_v45 = vadd.s32 1, %v2684_v58 }
 0x156   : > { %v1092_v50 = vsub.s32 32, %v1091_v37  ;;  %v949_v51 = vand.u32 2147483647, %v948_v44  ;;  %v951_v14 = vcvt.s32.f32 %v944_v38  ;;  %vm1030_vm4 = vc.u32 %v2689_v33, %v2683_v16 }
 0x157   : > { %v1094_v8 = vshll.u32 %v1992_v11, %v1091_v37  ;;  %v1032_v52 = vsel %vm1030_vm4, %v1031_v45, %v2684_v58  ;;  %v1097_v23 = vshll.u32 %v1993_v15, %v1091_v37  ;;  %v1090_v42 = vshrl.u32 %v1089_v13, 5 }
 0x158   : > { %v1873_v6 = vpop.eup %1872  ;;  %v1095_v29 = vshrl.u32 %v1993_v15, %v1092_v50  ;;  %v1098_v3 = vshrl.u32 %v1994_v17, %v1092_v50  ;;  %v952_v56 = vmul.f32 %v951_v14, %v949_v51  ;;  %v1033_v49 = vadd.s32 %v1032_v52, %v1028_v22 }
 0x159   : > { %v1875_v60 = vpop.eup %1874  ;;  %v865_v12 = vxor.u32 2147483648, %v1873_v6  ;;  %v1101_v1 = vshrl.u32 %v1995_v21, %v1092_v50  ;;  %v1100_v41 = vshll.u32 %v1994_v17, %v1091_v37  ;;  %v1103_v30 = vshll.u32 %v1995_v21, %v1091_v37 }
 0x15a   : > { %v862_v53 = vxor.u32 2147483648, %v1875_v60  ;;  %v1096_v0 = vor.u32 %v1095_v29, %v1094_v8  ;;  %v953_v19 = vxor.u32 2147483648, %v952_v56  ;;  %v1034_v34 = vadd.s32 536870912, %v1033_v49 }
 0x15b   : > { %v866_v26 = vsel %vm864_vm3, %v865_v12, %v1875_v60  ;;  %v1099_v63 = vor.u32 %v1098_v3, %v1097_v23  ;;  %v1104_v57 = vshrl.u32 %v1996_v25, %v1092_v50  ;;  %v1107_v39 = vshrl.u32 %v1997_v35, %v1092_v50 }
 0x15c   : > { %v863_v59 = vsel %vm861_vm2, %v1873_v6, %v862_v53  ;;  %v954_v43 = vsel %vm871_vm7, %v953_v19, %v952_v56  ;;  %v1035_v24 = vshrl.u32 %v1034_v34, 30  ;;  %v1102_v9 = vor.u32 %v1101_v1, %v1100_v41 }
 0x15d   : > { %v867_v18 = vsel %vm860_vm0, %v863_v59, %v866_v26  ;;  %v957_v2 = vsel %vm2628_vm8, %v2398_v7, %v954_v43  ;;  %v1105_v58 = vor.u32 %v1104_v57, %v1103_v30  ;;  %v1106_v13 = vshll.u32 %v1996_v25, %v1091_v37  ;;  %v306_v37 = vpop.permute.xlu0 %305 }
 0x15e   : > { %v868_v48 = vsel %vm857_vm1, nan, %v867_v18  ;;  %1876 = vcosq.f32 %v957_v2  ;;  %v2732_v31 = vand.u32 3, %v962_v4  ;;  %v1036_v38 = vshll.u32 %v1035_v24, 30 }
 0x15f   : > { %1394 = vst.msk [vmem:[%s2371_s8 + $0x20] sm:$0xff] %vm1389_vm11, %v868_v48  ;;  %v2734_v10 = vshll.u32 %v1085_v32, 8  ;;  %1878 = vsinq.f32 %v957_v2  ;;  %v1108_v40 = vor.u32 %v1107_v39, %v1106_v13  ;;  %vm1109_vm5 = vcmp.lt.s32.totalorder %v1090_v42, 1 }
 0x160   : > { %v330_v20 = vadd.f32 %v320_v61, %v2068_v28  ;;  %v2737_v44 = vsub.s32 %v1033_v49, %v1036_v38  ;;  %v1093_v5 = vshrl.u32 %v1992_v11, %v1092_v50  ;;  %vm1112_vm6 = vcmp.lt.s32.totalorder %v1090_v42, 4 }
 0x161   : > { %v1117_v22 = vsel %vm1109_vm5, %v1096_v0, %v1099_v63  ;;  %v1059_v45 = vsub.s32 4, %v1035_v24  ;;  %vm1111_vm7 = vcmp.lt.s32.totalorder %v1090_v42, 3  ;;  %v1114_v51 = vsel %vm1112_vm6, %v1102_v9, 2102212464 }
 0x162   : > { %v1118_v4 = vsel %vm1112_vm6, %v1105_v58, 920167782  ;;  %v1039_v14 = vsub.s32 0, %v2737_v44  ;;  %vm1110_vm8 = vcmp.lt.s32.totalorder %v1090_v42, 2  ;;  %v1121_v8 = vsel %vm1109_vm5, %v1099_v63, %v1102_v9 }
 0x163   : > { %v1119_v32 = vsel %vm1111_vm7, %v1102_v9, %v1118_v4  ;;  %v1113_v6 = vsel %vm1109_vm5, %v1093_v5, %v1096_v0  ;;  %v1122_v28 = vsel %vm1112_vm6, %v1108_v40, 1326507024  ;;  %v321_v61 = vmul.f32 %v2695_v36, %v306_v37 }
 0x164   : > { %v1120_v52 = vsel %vm1110_vm8, %v1117_v22, %v1119_v32  ;;  %v1686_v50 = vmin.u32 %v1039_v14, %v2737_v44  ;;  %v1115_v29 = vsel %vm1111_vm7, %v1099_v63, %v1114_v51  ;;  %v1123_v23 = vsel %vm1111_vm7, %v1105_v58, %v1122_v28 }
 0x165   : > { %v2745_v3 = vadd.f32 %v2578_v54, %v330_v20  ;;  %vm961_vm9 = vweird.f32 %v2398_v7  ;;  %vm975_vm10 = vcmp.lt.s32.totalorder %v2502_v55, 0  ;;  %v1124_v60 = vsel %vm1110_vm8, %v1121_v8, %v1123_v23 }
 0x166   : > { %v2751_v12 = vmul.u32.u64.low %v2734_v10, %v1120_v52  ;;  %v2752_v56 = vmul.u32.u64.high %v2734_v10, %v1120_v52, %v2751_v12  ;;  %vm964_vm14 = vcmp.lt.s32.totalorder %v2732_v31, 2  ;;  %vm2758_vm15 = vcmp.le.f32.partialorder %v973_v46, 0.7853982 }
 0x167   : > { %v1041_v49 = vclz %v1686_v50  ;;  %v1060_v1 = vsel %vm975_vm10, %v1059_v45, %v1035_v24  ;;  %vm965_vm13 = vcmp.eq.s32.totalorder %v2732_v31, 0  ;;  %v1116_v53 = vsel %vm1110_vm8, %v1113_v6, %v1115_v29 }
 0x168   : > { %v2767_v0 = vmul.u32.u64.low %v2734_v10, %v1124_v60  ;;  %v2768_v41 = vmul.u32.u64.high %v2734_v10, %v1124_v60, %v2767_v0  ;;  %v1877_v26 = vpop.eup %1876  ;;  %vm968_vm12 = vcmp.eq.s32.totalorder %v2732_v31, 2  ;;  %v1184_v46 = vand.u32 2139095040, %v2745_v3 }
 0x169   : > { %v1687_v19 = vadd.s32 4294967294, %v1041_v49  ;;  %v331_v34 = vadd.f32 %v321_v61, %v2066_v27  ;;  %v1879_v63 = vpop.eup %1878  ;;  %v969_v59 = vxor.u32 2147483648, %v1877_v26  ;;  %v1029_v30 = vadd.s32 %v2683_v16, %v2689_v33 }
 0x16a   : > { %v1062_v42 = vsel %vm2758_vm15, 0, %v1060_v1  ;;  %v1135_v57 = vadd.s32 1, %v2752_v56  ;;  %v966_v39 = vxor.u32 2147483648, %v1879_v63  ;;  %v1132_v18 = vmul.u32 %v2734_v10, %v1116_v53 }
 0x16b   : > { %vm1688_vm0 = vcmp.lt.s32.totalorder %v1687_v19, 0  ;;  %v1185_v43 = vshrl.u32 %v1184_v46, 23  ;;  %v970_v24 = vsel %vm968_vm12, %v969_v59, %v1879_v63  ;;  %vm1134_vm1 = vc.u32 %v2768_v41, %v2751_v12 }
 0x16c   : > { %v1044_v9 = vsel %vm1688_vm0, 0, %v1687_v19  ;;  %v1181_v27 = vand.u32 2147483647, %v2745_v3  ;;  %v967_v16 = vsel %vm965_vm13, %v1877_v26, %v966_v39  ;;  %v2785_v2 = vadd.f32 %v2578_v54, %v331_v34 }
 0x16d   : > { %v1045_v33 = vsub.s32 32, %v1044_v9  ;;  %v1049_v48 = vsub.s32 4294967266, %v1044_v9  ;;  %v971_v58 = vsel %vm964_vm14, %v967_v16, %v970_v24  ;;  %v1046_v13 = vshll.u32 %v2737_v44, %v1044_v9 }
 0x16e   : > { %v1136_v38 = vsel %vm1134_vm1, %v1135_v57, %v2752_v56  ;;  %v1693_v10 = vadd.s32 4294967169, %v1185_v43  ;;  %v972_v40 = vsel %vm961_vm9, nan, %v971_v58  ;;  %v1066_v4 = vadd.s32 3, %v1062_v42 }
 0x16f   : > { %v1047_v20 = vshrl.u32 %v1029_v30, %v1045_v33  ;;  %v1050_v5 = vadd.s32 127, %v1049_v48  ;;  %v1137_v22 = vadd.s32 %v1136_v38, %v1132_v18  ;;  %1395 = vst.msk [vmem:[%s2371_s8 + $0x28] sm:$0xff] %vm1389_vm11, %v972_v40  ;;  %v1188_v31 = vand.u32 8388607, %v1181_v27 }
 0x170   : > { %v1191_v37 = vadd.s32 1, %v1693_v10  ;;  %v1288_v7 = vand.u32 2139095040, %v2785_v2  ;;  %v2801_v61 = vand.u32 3, %v1066_v4  ;;  %v1133_v48 = vadd.s32 %v2751_v12, %v2768_v41 }
 0x171   : > { %v1048_v45 = vor.u32 %v1047_v20, %v1046_v13  ;;  %v1051_v54 = vshll.u32 %v1050_v5, 23  ;;  %v1138_v51 = vadd.s32 536870912, %v1137_v22  ;;  %v1189_v60 = vor.u32 8388608, %v1188_v31 }
 0x172   : > { %vm1192_vm2 = vcmp.gt.s32.totalorder %v1191_v37, 0  ;;  %v1289_v56 = vshrl.u32 %v1288_v7, 23  ;;  %vm1065_vm8 = vweird.f32 %v2502_v55  ;;  %vm1068_vm9 = vcmp.lt.s32.totalorder %v2801_v61, 2 }
 0x173   : > { %v1052_v44 = vor.u32 4788187, %v1051_v54  ;;  %v2797_v14 = vshrl.u32 %v1138_v51, 30  ;;  %v1193_v32 = vsel %vm1192_vm2, %v1191_v37, 0  ;;  %v1055_v52 = vcvt.s32.f32 %v1048_v45 }
 0x174   : > { %v1195_v8 = vand.u32 31, %v1193_v32  ;;  %v1194_v49 = vshrl.u32 %v1193_v32, 5  ;;  %v1229_v13 = vshll.u32 %v1189_v60, 8  ;;  %v1697_v40 = vadd.s32 4294967169, %v1289_v56 }
 0x175   : > { %v1053_v6 = vand.u32 2147483647, %v1052_v44  ;;  %v1140_v28 = vshll.u32 %v2797_v14, 30  ;;  %vm1079_vm14 = vcmp.lt.s32.totalorder %v2582_v62, 0  ;;  %vm1069_vm12 = vcmp.eq.s32.totalorder %v2801_v61, 0 }
 0x176   : > { %v1196_v50 = vsub.s32 32, %v1195_v8  ;;  %v1198_v1 = vshll.u32 %v1992_v11, %v1195_v8  ;;  %v1201_v46 = vshll.u32 %v1993_v15, %v1195_v8  ;;  %v1204_v59 = vshll.u32 %v1994_v17, %v1195_v8 }
 0x177   : > { %v1056_v29 = vmul.f32 %v1055_v52, %v1053_v6  ;;  %v2803_v23 = vsub.s32 %v1137_v22, %v1140_v28  ;;  %v1207_v30 = vshll.u32 %v1995_v21, %v1195_v8  ;;  %v1210_v43 = vshll.u32 %v1996_v25, %v1195_v8 }
 0x178   : > { %v1199_v53 = vshrl.u32 %v1993_v15, %v1196_v50  ;;  %v1202_v0 = vshrl.u32 %v1994_v17, %v1196_v50  ;;  %v1205_v34 = vshrl.u32 %v1995_v21, %v1196_v50  ;;  %v1208_v42 = vshrl.u32 %v1996_v25, %v1196_v50 }
 0x179   : > { %v1057_v26 = vxor.u32 2147483648, %v1056_v29  ;;  %v1143_v19 = vsub.s32 0, %v2803_v23  ;;  %v1211_v33 = vshrl.u32 %v1997_v35, %v1196_v50  ;;  %v1197_v38 = vshrl.u32 %v1992_v11, %v1196_v50 }
 0x17a   : > { %v1200_v63 = vor.u32 %v1199_v53, %v1198_v1  ;;  %v1203_v18 = vor.u32 %v1202_v0, %v1201_v46  ;;  %v1206_v9 = vor.u32 %v1205_v34, %v1204_v59  ;;  %v1209_v16 = vor.u32 %v1208_v42, %v1207_v30 }
 0x17b   : > { %v1058_v57 = vsel %vm975_vm10, %v1057_v26, %v1056_v29  ;;  %v1690_v39 = vmin.u32 %v1143_v19, %v2803_v23  ;;  %v1212_v10 = vor.u32 %v1211_v33, %v1210_v43  ;;  %vm1213_vm3 = vcmp.lt.s32.totalorder %v1194_v49, 1 }
 0x17c   : > { %v1061_v24 = vsel %vm2758_vm15, %v2502_v55, %v1058_v57  ;;  %vm1215_vm4 = vcmp.lt.s32.totalorder %v1194_v49, 3  ;;  %vm1216_vm5 = vcmp.lt.s32.totalorder %v1194_v49, 4  ;;  %v1221_v5 = vsel %vm1213_vm3, %v1200_v63, %v1203_v18 }
 0x17d   : > { %1880 = vcosq.f32 %v1061_v24  ;;  %v1145_v58 = vclz %v1690_v39  ;;  %v1218_v36 = vsel %vm1216_vm5, %v1206_v9, 2102212464  ;;  %v1222_v22 = vsel %vm1216_vm5, %v1209_v16, 920167782 }
 0x17e   : > { %1882 = vsinq.f32 %v1061_v24  ;;  %v1225_v37 = vsel %vm1213_vm3, %v1203_v18, %v1206_v9  ;;  %vm1214_vm7 = vcmp.lt.s32.totalorder %v1194_v49, 2  ;;  %v1223_v45 = vsel %vm1215_vm4, %v1206_v9, %v1222_v22 }
 0x17f   : > { %v1691_v20 = vadd.s32 4294967294, %v1145_v58  ;;  %v1226_v12 = vsel %vm1216_vm5, %v1212_v10, 1326507024  ;;  %v1217_v54 = vsel %vm1213_vm3, %v1197_v38, %v1200_v63  ;;  %v1224_v51 = vsel %vm1214_vm7, %v1221_v5, %v1223_v45 }
 0x180   : > { %v1227_v4 = vsel %vm1215_vm4, %v1209_v16, %v1226_v12  ;;  %v1219_v32 = vsel %vm1215_vm4, %v1203_v18, %v1218_v36  ;;  %v2834_v52 = vmul.u32.u64.low %v1229_v13, %v1224_v51  ;;  %v2835_v28 = vmul.u32.u64.high %v1229_v13, %v1224_v51, %v2834_v52 }
 0x181   : > { %vm1692_vm6 = vcmp.lt.s32.totalorder %v1691_v20, 0  ;;  %v1228_v7 = vsel %vm1214_vm7, %v1225_v37, %v1227_v4  ;;  %v1295_v56 = vadd.s32 1, %v1697_v40  ;;  %vm1072_vm10 = vcmp.eq.s32.totalorder %v2801_v61, 2 }
 0x182   : > { %v1148_v41 = vsel %vm1692_vm6, 0, %v1691_v20  ;;  %v2831_v8 = vmul.u32.u64.low %v1229_v13, %v1228_v7  ;;  %v2832_v6 = vmul.u32.u64.high %v1229_v13, %v1228_v7, %v2831_v8  ;;  %v1220_v1 = vsel %vm1214_vm7, %v1217_v54, %v1219_v32 }
 0x183   : > { %v1149_v31 = vsub.s32 32, %v1148_v41  ;;  %v1153_v44 = vsub.s32 4294967266, %v1148_v41  ;;  %v1150_v50 = vshll.u32 %v2803_v23, %v1148_v41  ;;  %v1285_v19 = vand.u32 2147483647, %v2785_v2 }
 0x184   : > { %vm1296_vm15 = vcmp.gt.s32.totalorder %v1295_v56, 0  ;;  %v1163_v23 = vsub.s32 4, %v2797_v14  ;;  %vm1238_vm13 = vc.u32 %v2832_v6, %v2834_v52  ;;  %v1239_v63 = vadd.s32 1, %v2835_v28 }
 0x185   : > { %v1151_v29 = vshrl.u32 %v1133_v48, %v1149_v31  ;;  %v1154_v60 = vadd.s32 127, %v1153_v44  ;;  %v1236_v42 = vmul.u32 %v1229_v13, %v1220_v1  ;;  %v1297_v49 = vsel %vm1296_vm15, %v1295_v56, 0 }
 0x186   : > { %v1240_v39 = vsel %vm1238_vm13, %v1239_v63, %v2835_v28  ;;  %v1299_v18 = vand.u32 31, %v1297_v49  ;;  %vm2856_vm0 = vcmp.le.f32.partialorder %v1077_v47, 0.7853982  ;;  %v1292_v58 = vand.u32 8388607, %v1285_v19 }
 0x187   : > { %v1881_v53 = vpop.eup %1880  ;;  %v1152_v0 = vor.u32 %v1151_v29, %v1150_v50  ;;  %v1155_v26 = vshll.u32 %v1154_v60, 23  ;;  %v1241_v16 = vadd.s32 %v1240_v39, %v1236_v42  ;;  %v1164_v40 = vsel %vm1079_vm14, %v1163_v23, %v2797_v14 }
 0x188   : > { %v1883_v46 = vpop.eup %1882  ;;  %v1073_v34 = vxor.u32 2147483648, %v1881_v53  ;;  %v1300_v13 = vsub.s32 32, %v1299_v18  ;;  %v1302_v47 = vshll.u32 %v1992_v11, %v1299_v18  ;;  %v1305_v36 = vshll.u32 %v1993_v15, %v1299_v18 }
 0x189   : > { %v1070_v59 = vxor.u32 2147483648, %v1883_v46  ;;  %v1156_v30 = vor.u32 4788187, %v1155_v26  ;;  %v1159_v9 = vcvt.s32.f32 %v1152_v0  ;;  %v1242_v61 = vadd.s32 536870912, %v1241_v16 }
 0x18a   : > { %v1074_v57 = vsel %vm1072_vm10, %v1073_v34, %v1883_v46  ;;  %v1303_v20 = vshrl.u32 %v1993_v15, %v1300_v13  ;;  %v1306_v5 = vshrl.u32 %v1994_v17, %v1300_v13  ;;  %v1309_v55 = vshrl.u32 %v1995_v21, %v1300_v13 }
 0x18b   : > { %v1071_v43 = vsel %vm1069_vm12, %v1881_v53, %v1070_v59  ;;  %v1157_v24 = vand.u32 2147483647, %v1156_v30  ;;  %v2873_v37 = vshrl.u32 %v1242_v61, 30  ;;  %v1312_v45 = vshrl.u32 %v1996_v25, %v1300_v13 }
 0x18c   : > { %v1075_v33 = vsel %vm1068_vm9, %v1071_v43, %v1074_v57  ;;  %v1166_v14 = vsel %vm2856_vm0, 0, %v1164_v40  ;;  %v1298_v12 = vshrl.u32 %v1297_v49, 5  ;;  %v1308_v41 = vshll.u32 %v1994_v17, %v1299_v18 }
 0x18d   : > { %v1076_v38 = vsel %vm1065_vm8, nan, %v1075_v33  ;;  %v1160_v10 = vmul.f32 %v1159_v9, %v1157_v24  ;;  %v1311_v54 = vshll.u32 %v1995_v21, %v1299_v18  ;;  %v1244_v51 = vshll.u32 %v2873_v37, 30 }
 0x18e   : > { %1396 = vst.msk [vmem:[%s2371_s8 + $0x30] sm:$0xff] %vm1389_vm11, %v1076_v38  ;;  %v1304_v4 = vor.u32 %v1303_v20, %v1302_v47  ;;  %v1307_v31 = vor.u32 %v1306_v5, %v1305_v36  ;;  %v1314_v7 = vshll.u32 %v1996_v25, %v1299_v18  ;;  %v1315_v8 = vshrl.u32 %v1997_v35, %v1300_v13 }
 0x18f   : > { %v1161_v22 = vxor.u32 2147483648, %v1160_v10  ;;  %v1313_v32 = vor.u32 %v1312_v45, %v1311_v54  ;;  %v1245_v17 = vsub.s32 %v1241_v16, %v1244_v51  ;;  %v1310_v28 = vor.u32 %v1309_v55, %v1308_v41 }
 0x190   : > { %v1293_v21 = vor.u32 8388608, %v1292_v58  ;;  %v1316_v50 = vor.u32 %v1315_v8, %v1314_v7  ;;  %v1170_v29 = vadd.s32 3, %v1166_v14  ;;  %vm1317_vm1 = vcmp.lt.s32.totalorder %v1298_v12, 1 }
 0x191   : > { %v1162_v15 = vsel %vm1079_vm14, %v1161_v22, %v1160_v10  ;;  %v1247_v60 = vsub.s32 0, %v1245_v17  ;;  %vm1320_vm2 = vcmp.lt.s32.totalorder %v1298_v12, 4  ;;  %v1301_v56 = vshrl.u32 %v1992_v11, %v1300_v13 }
 0x192   : > { %v1165_v44 = vsel %vm2856_vm0, %v2582_v62, %v1162_v15  ;;  %vm1319_vm3 = vcmp.lt.s32.totalorder %v1298_v12, 3  ;;  %v1325_v1 = vsel %vm1317_vm1, %v1304_v4, %v1307_v31  ;;  %v1326_v53 = vsel %vm1320_vm2, %v1313_v32, 920167782 }
 0x193   : > { %1884 = vcosq.f32 %v1165_v44  ;;  %v1694_v0 = vmin.u32 %v1247_v60, %v1245_v17  ;;  %vm1318_vm4 = vcmp.lt.s32.totalorder %v1298_v12, 2  ;;  %v1322_v25 = vsel %vm1320_vm2, %v1310_v28, 2102212464 }
 0x194   : > { %1886 = vsinq.f32 %v1165_v44  ;;  %v1327_v35 = vsel %vm1319_vm3, %v1310_v28, %v1326_v53  ;;  %v1329_v46 = vsel %vm1317_vm1, %v1307_v31, %v1310_v28  ;;  %v1330_v34 = vsel %vm1320_vm2, %v1316_v50, 1326507024 }
 0x195   : > { %v1328_v26 = vsel %vm1318_vm4, %v1325_v1, %v1327_v35  ;;  %v1333_v23 = vshll.u32 %v1293_v21, 8  ;;  %v1171_v63 = vand.u32 3, %v1170_v29  ;;  %v1249_v59 = vclz %v1694_v0 }
 0x196   : > { %v1321_v30 = vsel %vm1317_vm1, %v1301_v56, %v1304_v4  ;;  %v1323_v42 = vsel %vm1319_vm3, %v1307_v31, %v1322_v25  ;;  %v1331_v11 = vsel %vm1319_vm3, %v1313_v32, %v1330_v34  ;;  %v1237_v10 = vadd.s32 %v2834_v52, %v2832_v6 }
 0x197   : > { %v2894_v49 = vmul.u32.u64.low %v1333_v23, %v1328_v26  ;;  %v2895_v57 = vmul.u32.u64.high %v1333_v23, %v1328_v26, %v2894_v49  ;;  %v1695_v39 = vadd.s32 4294967294, %v1249_v59  ;;  %v1332_v18 = vsel %vm1318_vm4, %v1329_v46, %v1331_v11 }
 0x198   : > { %v2898_v43 = vmul.u32.u64.low %v1333_v23, %v1332_v18  ;;  %v2899_v24 = vmul.u32.u64.high %v1333_v23, %v1332_v18, %v2898_v43  ;;  %vm1172_vm5 = vcmp.lt.s32.totalorder %v1171_v63, 2  ;;  %vm1173_vm6 = vcmp.eq.s32.totalorder %v1171_v63, 0 }
 0x199   : > { %vm1696_vm7 = vcmp.lt.s32.totalorder %v1695_v39, 0  ;;  %v1324_v16 = vsel %vm1318_vm4, %v1321_v30, %v1323_v42  ;;  %vm1176_vm8 = vcmp.eq.s32.totalorder %v1171_v63, 2  ;;  %v1343_v13 = vadd.s32 1, %v2895_v57 }
 0x19a   : > { %v1252_v58 = vsel %vm1696_vm7, 0, %v1695_v39  ;;  %v1340_v36 = vmul.u32 %v1333_v23, %v1324_v16  ;;  %vm1342_vm9 = vc.u32 %v2899_v24, %v2894_v49  ;;  %vm1169_vm10 = vweird.f32 %v2582_v62 }
 0x19b   : > { %v1253_v40 = vsub.s32 32, %v1252_v58  ;;  %v1257_v61 = vsub.s32 4294967266, %v1252_v58  ;;  %v1254_v20 = vshll.u32 %v1245_v17, %v1252_v58  ;;  %v1344_v45 = vsel %vm1342_vm9, %v1343_v13, %v2895_v57 }
 0x19c   : > { %v1345_v12 = vadd.s32 %v1344_v45, %v1340_v36  ;;  %v1267_v7 = vsub.s32 4, %v2873_v37  ;;  %vm1183_vm14 = vcmp.lt.s32.totalorder %v2745_v3, 0  ;;  %vm1182_vm15 = vcmp.le.f32.partialorder %v1181_v27, 0.7853982 }
 0x19d   : > { %v1885_v9 = vpop.eup %1884  ;;  %v1255_v22 = vshrl.u32 %v1237_v10, %v1253_v40  ;;  %v1258_v55 = vadd.s32 127, %v1257_v61  ;;  %v1341_v25 = vadd.s32 %v2894_v49, %v2899_v24  ;;  %vm1273_vm2 = vweird.f32 %v2745_v3 }
 0x19e   : > { %v1887_v33 = vpop.eup %1886  ;;  %v1177_v48 = vxor.u32 2147483648, %v1885_v9  ;;  %v1346_v54 = vadd.s32 536870912, %v1345_v12  ;;  %v1268_v21 = vsel %vm1183_vm14, %v1267_v7, %v2873_v37  ;;  %vm1287_vm3 = vcmp.lt.s32.totalorder %v2785_v2, 0 }
 0x19f   : > { %v1174_v38 = vxor.u32 2147483648, %v1887_v33  ;;  %v1256_v52 = vor.u32 %v1255_v22, %v1254_v20  ;;  %v1259_v41 = vshll.u32 %v1258_v55, 23  ;;  %v1270_v60 = vsel %vm1182_vm15, 0, %v1268_v21 }
 0x1a0   : > { %v1178_v47 = vsel %vm1176_vm8, %v1177_v48, %v1887_v33  ;;  %v1347_v51 = vshrl.u32 %v1346_v54, 30  ;;  %v1274_v53 = vadd.s32 3, %v1270_v60  ;;  %vm1286_vm4 = vcmp.le.f32.partialorder %v1285_v19, 0.7853982 }
 0x1a1   : > { %v1175_v5 = vsel %vm1173_vm6, %v1885_v9, %v1174_v38  ;;  %v1260_v15 = vor.u32 4788187, %v1259_v41  ;;  %v1263_v31 = vcvt.s32.f32 %v1256_v52  ;;  %vm1377_vm8 = vweird.f32 %v2785_v2 }
 0x1a2   : > { %v1179_v14 = vsel %vm1172_vm5, %v1175_v5, %v1178_v47  ;;  %v1348_v44 = vshll.u32 %v1347_v51, 30  ;;  %v1275_v46 = vand.u32 3, %v1274_v53  ;;  %v1371_v33 = vsub.s32 4, %v1347_v51 }
 0x1a3   : > { %v1180_v6 = vsel %vm1169_vm10, nan, %v1179_v14  ;;  %v1261_v4 = vand.u32 2147483647, %v1260_v15 }
 0x1a4   : > { %1397 = vst.msk [vmem:[%s2371_s8 + $0x38] sm:$0xff] %vm1389_vm11, %v1180_v6  ;;  %v1349_v8 = vsub.s32 %v1345_v12, %v1348_v44  ;;  %vm1280_vm12 = vcmp.eq.s32.totalorder %v1275_v46, 2  ;;  %vm1277_vm0 = vcmp.eq.s32.totalorder %v1275_v46, 0  ;;  %vm1276_vm1 = vcmp.lt.s32.totalorder %v1275_v46, 2 }
 0x1a5   : > { %v1264_v32 = vmul.f32 %v1263_v31, %v1261_v4  ;;  %v1372_v13 = vsel %vm1287_vm3, %v1371_v33, %v1347_v51 }
 0x1a6   : > { %v1351_v62 = vsub.s32 0, %v1349_v8 }
 0x1a7   : > { %v1265_v17 = vxor.u32 2147483648, %v1264_v32 }
 0x1a8   : > { %v1698_v29 = vmin.u32 %v1351_v62, %v1349_v8 }
 0x1a9   : > { %v1266_v28 = vsel %vm1183_vm14, %v1265_v17, %v1264_v32 }
 0x1aa   : > { %v1269_v50 = vsel %vm1182_vm15, %v2745_v3, %v1266_v28  ;;  %v1353_v56 = vclz %v1698_v29  ;;  %v1374_v3 = vsel %vm1286_vm4, 0, %v1372_v13 }
 0x1ab   : > { %1888 = vcosq.f32 %v1269_v50  ;;  %v1378_v10 = vadd.s32 3, %v1374_v3 }
 0x1ac   : > { %1890 = vsinq.f32 %v1269_v50  ;;  %v1699_v1 = vadd.s32 4294967294, %v1353_v56 }
 0x1ad   : > { %v1379_v40 = vand.u32 3, %v1378_v10 }
 0x1ae   : > { %vm1700_vm13 = vcmp.lt.s32.totalorder %v1699_v1, 0 }
 0x1af   : > { %v1356_v0 = vsel %vm1700_vm13, 0, %v1699_v1  ;;  %vm1384_vm5 = vcmp.eq.s32.totalorder %v1379_v40, 2  ;;  %vm1381_vm6 = vcmp.eq.s32.totalorder %v1379_v40, 0  ;;  %vm1380_vm7 = vcmp.lt.s32.totalorder %v1379_v40, 2 }
 0x1b0   : > { %v1357_v35 = vsub.s32 32, %v1356_v0  ;;  %v1361_v26 = vsub.s32 4294967266, %v1356_v0  ;;  %v1358_v27 = vshll.u32 %v1349_v8, %v1356_v0 }
 0x1b2   : > { %v1359_v34 = vshrl.u32 %v1341_v25, %v1357_v35  ;;  %v1362_v23 = vadd.s32 127, %v1361_v26 }
 0x1b4   : > { %v1360_v30 = vor.u32 %v1359_v34, %v1358_v27  ;;  %v1363_v42 = vshll.u32 %v1362_v23, 23 }
 0x1b5   : > { %v1889_v37 = vpop.eup %1888 }
 0x1b6   : > { %v1891_v63 = vpop.eup %1890  ;;  %v1281_v59 = vxor.u32 2147483648, %v1889_v37  ;;  %v1364_v39 = vor.u32 4788187, %v1363_v42  ;;  %v1367_v24 = vcvt.s32.f32 %v1360_v30 }
 0x1b7   : > { %v1278_v11 = vxor.u32 2147483648, %v1891_v63 }
 0x1b8   : > { %v1282_v57 = vsel %vm1280_vm12, %v1281_v59, %v1891_v63  ;;  %v1365_v43 = vand.u32 2147483647, %v1364_v39 }
 0x1b9   : > { %v1279_v18 = vsel %vm1277_vm0, %v1889_v37, %v1278_v11 }
 0x1ba   : > { %v1283_v49 = vsel %vm1276_vm1, %v1279_v18, %v1282_v57  ;;  %v1368_v16 = vmul.f32 %v1367_v24, %v1365_v43 }
 0x1bb   : > { %v1284_v9 = vsel %vm1273_vm2, nan, %v1283_v49 }
 0x1bc   : > { %1398 = vst.msk [vmem:[%s2371_s8 + $0x40] sm:$0xff] %vm1389_vm11, %v1284_v9  ;;  %v1369_v48 = vxor.u32 2147483648, %v1368_v16 }
 0x1be   : > { %v1370_v58 = vsel %vm1287_vm3, %v1369_v48, %v1368_v16 }
 0x1bf   : > { %v1373_v38 = vsel %vm1286_vm4, %v2785_v2, %v1370_v58 }
 0x1c0   : > { %1892 = vcosq.f32 %v1373_v38 }
 0x1c1   : > { %1894 = vsinq.f32 %v1373_v38 }
 0x1ca   : > { %v1893_v61 = vpop.eup %1892 }
 0x1cb   : > { %v1895_v47 = vpop.eup %1894  ;;  %v1385_v20 = vxor.u32 2147483648, %v1893_v61  ;;  %1406 = sbr.rel (!%p2043_p4) target bundleno = 527 (0x20f), region = 36 }
 0x1cc   : > { %v1382_v36 = vxor.u32 2147483648, %v1895_v47 }
 0x1cd   : > { %v1386_v5 = vsel %vm1384_vm5, %v1385_v20, %v1895_v47 }
 0x1ce   : > { %v1383_v22 = vsel %vm1381_vm6, %v1893_v61, %v1382_v36 }
 0x1cf   : > { %v1387_v19 = vsel %vm1380_vm7, %v1383_v22, %v1386_v5 }
 0x1d0   : > { %v1388_v55 = vsel %vm1377_vm8, nan, %v1387_v19 }
 0x1d1   : > { %1399 = vst.msk [vmem:[%s2371_s8 + $0x48] sm:$0xff] %vm1389_vm11, %v1388_v55 }
 0x1d2   : > { %s3016_s14 = smov (!%p1409_p8, %s1408_s14), 10 }
 0x1d3   : > { %s1701_s24 = sshll.u32 %s3016_s14, 7 }
 0x1d4   : > { %p1704_p9 = scmp.eq.s32.totalorder %s1701_s24, 0 }
 0x1d5   : > { %1898 = sdivrem.u32 (!%p1704_p9), %s3016_s14, 10 }
 0x1d6   : > { %1417 = sbr.rel (%p1704_p9) target bundleno = 527 (0x20f), region = 40 }
 0x1de   : > { %s2942_s20 = spop.drf %1898 }
 0x1df   : > { %p1705_p10 = scmp.le.s32.totalorder %s2942_s20, 0 }
 0x1e0   : > { %s3009_s15 = smov (!%p1705_p10), %s2936_s23  ;;  %s3010_s21 = smov (!%p1705_p10), %s2371_s8 }
 0x1e1   : > { %1609 = sbr.rel (%p1705_p10) target bundleno = 498 (0x1f2), region = 116  ;;  %s2951_s25 = smov (!%p1705_p10), 0  }
 0x1e2   : > { %s2953_s26 = smov (!%p1705_p10), 0  }
 0x1e8 LB: >> { %v1499_v2 = vld [vmem:[%s1964_s21] sm:$0xff]  ;;  %v1501_v45 = vld [vmem:[%s1964_s21 + $0x8] sm:$0xff]  ;;  %v1503_v14 = vld [vmem:[%s1964_s21 + $0x10] sm:$0xff]  ;;  %s1519_s27 = sadd.s32 1, %s1968_s25  ;;  %s1493_s26 = sadd.s32 1, %s1972_s26   ;;  %s1972_s26 = sphi %s2953_s26, %s1493_s26   ;;  %s1968_s25 = sphi %s2951_s25, %s3011_s25   ;;  %s1964_s21 = sphi %s3010_s21, %s1524_s21   ;;  %s1960_s15 = sphi %s3009_s15, %s1525_s15  }
 0x1e9   : >> { %1500 = vst [vmem:[%s1960_s15] sm:$0xff] %v1499_v2  ;;  %1502 = vst [vmem:[%s1960_s15 + $0x8] sm:$0xff] %v1501_v45  ;;  %v1505_v12 = vld [vmem:[%s1964_s21 + $0x18] sm:$0xff]  ;;  %v1507_v6 = vld [vmem:[%s1964_s21 + $0x20] sm:$0xff]  ;;  %p1520_p11 = scmp.ge.s32.totalorder %s1519_s27, %s2942_s20  ;;  %p1492_p12 = scmp.ge.s32.totalorder %s1493_s26, %s2942_s20 }
 0x1ea   : >> { %1504 = vst [vmem:[%s1960_s15 + $0x10] sm:$0xff] %v1503_v14  ;;  %v1509_v52 = vld [vmem:[%s1964_s21 + $0x28] sm:$0xff]  ;;  %1506 = vst [vmem:[%s1960_s15 + $0x18] sm:$0xff] %v1505_v12  ;;  %v1511_v41 = vld [vmem:[%s1964_s21 + $0x30] sm:$0xff] }
 0x1eb   : >> { %1508 = vst [vmem:[%s1960_s15 + $0x20] sm:$0xff] %v1507_v6  ;;  %1510 = vst [vmem:[%s1960_s15 + $0x28] sm:$0xff] %v1509_v52  ;;  %v1513_v54 = vld [vmem:[%s1964_s21 + $0x38] sm:$0xff]  ;;  %v1515_v15 = vld [vmem:[%s1964_s21 + $0x40] sm:$0xff]  ;;  %s3018_s27 = smov (%p1520_p11, %s1519_s27), 0  ;;  %1495 = sbr.rel (!%p1492_p12) target bundleno = 488 (0x1e8), region = 122 }
 0x1ec   : >> { %1512 = vst [vmem:[%s1960_s15 + $0x30] sm:$0xff] %v1511_v41  ;;  %1514 = vst [vmem:[%s1960_s15 + $0x38] sm:$0xff] %v1513_v54  ;;  %v1517_v51 = vld [vmem:[%s1964_s21 + $0x48] sm:$0xff]  ;;  %s1522_s28 = smul.u32 80, %s3018_s27  ;;  %s3011_s25 = smov %s3018_s27 }
 0x1ed   : >> { %1516 = vst [vmem:[%s1960_s15 + $0x40] sm:$0xff] %v1515_v15  ;;  %1518 = vst [vmem:[%s1960_s15 + $0x48] sm:$0xff] %v1517_v51 }
 0x1ee   : >> { %s1524_s21 = scalar_lea.vmem %s2371_s8, %s1522_s28 [#allocation2]   ;;  %s1525_s15 = scalar_lea.vmem %s2936_s23, %s1522_s28  }
 0x1f2 PF: > { %1900 = sdivrem.u32 %s3016_s14, 10 }
 0x1f3   : > { %s1706_s29 = smul.u32 80, %s2942_s20 }
 0x1f5   : > { %s1530_s30 = scalar_lea.vmem %s2371_s8, %s1706_s29 [#allocation2]   ;;  %s1532_s4 = scalar_lea.vmem %s2936_s23, %s1706_s29  }
 0x1fb   : > { %s1901_s5 = spop.drf %1900 }
 0x1fc   : > { %p1708_p13 = scmp.le.s32.totalorder %s1901_s5, 0 }
 0x1fd   : > { %s1974_s6 = smov (!%p1708_p13), %s1532_s4   ;;  %s1978_s7 = smov (!%p1708_p13), %s1530_s30  }
 0x1fe   : > { %1623 = sbr.rel (%p1708_p13) target bundleno = 527 (0x20f), region = 127  ;;  %s1982_s9 = smov (!%p1708_p13), 0  }
 0x1ff   : > { %s1986_s10 = smov (!%p1708_p13), 0  }
 0x205 LB: >> { %v1542_v4 = vld [vmem:[%s1980_s7] sm:$0xff]  ;;  %s1544_s11 = sadd.s32 1, %s1984_s9  ;;  %s1536_s10 = sadd.s32 1, %s1988_s10   ;;  %s1988_s10 = sphi %s1986_s10, %s1536_s10   ;;  %s1984_s9 = sphi %s1982_s9, %s1983_s9   ;;  %s1980_s7 = sphi %s1978_s7, %s1549_s7   ;;  %s1976_s6 = sphi %s1974_s6, %s1550_s6  }
 0x206   : >> { %1543 = vst [vmem:[%s1976_s6] sm:$0xff] %v1542_v4  ;;  %p1545_p0 = scmp.ge.s32.totalorder %s1544_s11, %s1901_s5  ;;  %p1535_p1 = scmp.ge.s32.totalorder %s1536_s10, %s1901_s5 }
 0x208   : >> { %s3020_s11 = smov (%p1545_p0, %s1544_s11), 0  ;;  %1538 = sbr.rel (!%p1535_p1) target bundleno = 517 (0x205), region = 133 }
 0x209   : >> { %s1709_s8 = sshll.u32 %s3020_s11, 3  ;;  %s1983_s9 = smov %s3020_s11  }
 0x20a   : >> { %s1549_s7 = scalar_lea.vmem %s1530_s30, %s1709_s8 [#allocation2]   ;;  %s1550_s6 = scalar_lea.vmem %s1532_s4, %s1709_s8  }
 0x20f PF: > { %p10_p2 = scmp.ge.s32.totalorder %s2033_s16, 6   ;;  %s3012_s12 = smov %s1952_s13 }
 0x210   : > { %s3013_s13 = smov %s2041_s19  ;;  %s3014_s14 = smov %s2033_s16 }
 0x211   :  { %12 = sbr.rel (!%p10_p2) target bundleno = 2 (0x2), region = 144 }

</bundles_post_ra>
